<compile_context>
chip_gen: v6e
topology: v6e:2x2x1
jax: 0.10.0
libtpu: 0.0.40
codegen_flags: <defaults>
</compile_context>

<pallas_src>
import jax
import jax.numpy as jnp
from jax.experimental import pallas as pl
from jax.experimental.pallas import tpu as pltpu

CLASS_SIZE = 10          # spec leaves CLASS_SIZE = None -> pick 10
IN_FEATURES = 28 * 28    # 784
HIDDEN = 512
OUT_PAD = 128            # pad CLASS_SIZE -> 128 lanes for a lane-dense store
TILE_B_MAX = 256         # fills the 2x256x256 MXU on v6e/v7x; fewer steps on v5e too
N_LAYERS = 5


def _round_up(x, m):
    return (x + m - 1) // m * m


def _cdiv(a, b):
    return -(-a // b)


def _device_kind():
    try:
        return jax.devices()[0].device_kind.lower()
    except Exception:
        return ""


def _tensorcores_per_chip():
    # Chips with 2 TensorCores that benefit from a >=2-tile "parallel" batch axis.
    kind = _device_kind()
    return 2 if any(t in kind for t in ("v7", "v5p", "v4")) else 1


def _epilogue_dtype():
    # v6e / v7x VPUs have bf16 VALU -> bf16 bias+ReLU epilogue (half the vregs /
    # intermediate VMEM traffic).  v5e and older: keep the f32 epilogue.
    kind = _device_kind()
    return jnp.bfloat16 if ("v6" in kind or "v7" in kind) else jnp.float32


# --------------------------------------------------------------------------- kernel
def _make_mlp_kernel(epi_dtype):
    def kernel(x_ref,
               w1_ref, s1_ref, b1_ref,
               w2_ref, s2_ref, b2_ref,
               w3_ref, s3_ref, b3_ref,
               w4_ref, s4_ref, b4_ref,
               w5_ref, s5_ref, b5_ref,
               out_ref):
        def layer(h, w_ref, s_ref, b_ref, relu):
            # int8 (or bf16) weights dequantized on the fly; the MXU matmul is
            # always bf16 x bf16 with f32 accumulation (valid on all TPU gens,
            # including v7x which has no integer MXU).  The per-output-channel
            # scale is applied to the f32 accumulator, then bias + ReLU in the
            # generation-appropriate epilogue dtype.
            acc = jnp.dot(h, w_ref[...].astype(jnp.bfloat16),
                          preferred_element_type=jnp.float32)
            z = (acc.astype(epi_dtype) * s_ref[...].astype(epi_dtype)
                 + b_ref[...].astype(epi_dtype))
            if relu:
                z = jnp.maximum(z, 0.0)
            return z

        h = x_ref[...]                                              # (tile_b, 784) bf16
        h = layer(h, w1_ref, s1_ref, b1_ref, True).astype(jnp.bfloat16)
        h = layer(h, w2_ref, s2_ref, b2_ref, True).astype(jnp.bfloat16)
        h = layer(h, w3_ref, s3_ref, b3_ref, True).astype(jnp.bfloat16)
        h = layer(h, w4_ref, s4_ref, b4_ref, True).astype(jnp.bfloat16)
        out_ref[...] = layer(h, w5_ref, s5_ref, b5_ref, False).astype(out_ref.dtype)

    return kernel


# ------------------------------------------------------------------- param handling
def _quantize_per_channel(w):
    """Symmetric per-output-channel int8 quantization of an (in, out) f32 weight."""
    amax = jnp.max(jnp.abs(w), axis=0)
    scale = jnp.where(amax > 0.0, amax / 127.0, 1.0).astype(jnp.float32)
    q = jnp.clip(jnp.round(w / scale[None, :]), -127.0, 127.0).astype(jnp.int8)
    return q, scale.reshape(1, -1)


def prepare_params(params, quantize=True):
    """One-time (off the hot path) weight prep.

    Per layer -> (weight, scale_row, bias_row):
      * weight: int8, per-output-channel symmetric quant (halves weight DMA and
        resident VMEM vs bf16).  quantize=False keeps bf16 weights + unit scales.
      * scale_row: (1, out) f32 applied to the f32 MXU accumulator in-kernel.
      * bias_row:  (1, out) f32.
    The last layer's output dim is zero-padded to OUT_PAD lanes (sliced outside).
    """
    out = []
    for li, (w, b) in enumerate(params):
        w = w.astype(jnp.float32)
        b = b.astype(jnp.float32)
        if li == N_LAYERS - 1:
            n_out = w.shape[1]
            w = jnp.zeros((w.shape[0], OUT_PAD), jnp.float32).at[:, :n_out].set(w)
            b = jnp.zeros((OUT_PAD,), jnp.float32).at[:n_out].set(b)
        if quantize:
            q, scale = _quantize_per_channel(w)
        else:
            q = w.astype(jnp.bfloat16)
            scale = jnp.ones((1, w.shape[1]), jnp.float32)
        out.extend([q, scale, b.reshape(1, -1)])
    return tuple(out)


# ------------------------------------------------------------------------- forward
@jax.jit
def large_mlp_forward(x_nchw, prepared):
    """x_nchw: (B, 1, 28, 28) float32. Returns (B, CLASS_SIZE) f32 logits."""
    b = x_nchw.shape[0]

    # ---- batch tiling -------------------------------------------------------
    b_pad = max(8, _round_up(b, 8))
    n_tiles = _cdiv(b_pad, TILE_B_MAX)
    nc = _tensorcores_per_chip()
    if nc > 1 and b_pad >= nc * 8:
        # Give every TensorCore at least one batch tile on dual-TC chips (v7x).
        n_tiles = max(n_tiles, nc)
    tile_b = _round_up(_cdiv(b_pad, n_tiles), 8)
    n_tiles = _cdiv(b_pad, tile_b)
    b_pad = tile_b * n_tiles

    # ---- prologue: flatten -> pad rows -> cast (single fused XLA pass) ------
    x = x_nchw.reshape(b, IN_FEATURES)
    if b_pad != b:
        x = jnp.pad(x, ((0, b_pad - b), (0, 0)))
    x = x.astype(jnp.bfloat16)

    epi_dtype = _epilogue_dtype()

    def weight_spec(shape):
        # Constant block index -> DMA'd once, VMEM-resident across batch tiles;
        # Buffered(1) drops the useless second pipeline buffer.
        return pl.BlockSpec(shape, lambda i: (0, 0), pipeline_mode=pl.Buffered(1))

    in_specs = [pl.BlockSpec((tile_b, IN_FEATURES), lambda i: (i, 0))]
    for t in range(N_LAYERS):
        w, s, bias = prepared[3 * t], prepared[3 * t + 1], prepared[3 * t + 2]
        in_specs += [weight_spec(w.shape), weight_spec(s.shape), weight_spec(bias.shape)]

    flops = 2 * b_pad * (IN_FEATURES * HIDDEN + 3 * HIDDEN * HIDDEN + HIDDEN * OUT_PAD)
    bytes_accessed = (x.size * x.dtype.itemsize           # input activations
                      + b_pad * OUT_PAD * 2               # bf16 padded logits
                      + sum(int(p.size) * p.dtype.itemsize for p in prepared))

    out_pad = pl.pallas_call(
        _make_mlp_kernel(epi_dtype),
        out_shape=jax.ShapeDtypeStruct((b_pad, OUT_PAD), jnp.bfloat16),
        grid=(n_tiles,),
        in_specs=in_specs,
        out_specs=pl.BlockSpec((tile_b, OUT_PAD), lambda i: (i, 0)),
        compiler_params=pltpu.CompilerParams(
            dimension_semantics=("parallel",),   # batch tiles split across TCs
            vmem_limit_bytes=32 << 20),
        cost_estimate=pl.CostEstimate(
            flops=int(flops), transcendentals=0, bytes_accessed=int(bytes_accessed)),
    )(x, *prepared)

    return out_pad[:b, :CLASS_SIZE].astype(jnp.float32)


# ----------------------------------------------------------------------- references
def reference_forward_prepared(x_nchw, prepared, epi_dtype):
    """Pure-JAX emulation of the kernel's exact math (tight check)."""
    b = x_nchw.shape[0]
    h = x_nchw.reshape(b, IN_FEATURES).astype(jnp.bfloat16)
    out = None
    for t in range(N_LAYERS):
        w, s, bias = prepared[3 * t], prepared[3 * t + 1], prepared[3 * t + 2]
        acc = jnp.dot(h, w.astype(jnp.bfloat16), preferred_element_type=jnp.float32)
        z = acc.astype(epi_dtype) * s.astype(epi_dtype) + bias.astype(epi_dtype)
        if t < N_LAYERS - 1:
            z = jnp.maximum(z, 0.0)
            h = z.astype(jnp.bfloat16)
        else:
            out = z.astype(jnp.bfloat16)
    return out[:, :CLASS_SIZE].astype(jnp.float32)


def reference_forward_f32(x_nchw, params):
    """Full-precision reference of the original module's math (loose check)."""
    h = x_nchw.reshape(x_nchw.shape[0], -1).astype(jnp.float32)
    for i, (w, b) in enumerate(params):
        h = jnp.dot(h, w) + b
        if i < len(params) - 1:
            h = jnp.maximum(h, 0.0)
    return h


def init_params(key):
    """Deterministic init matching LargeMLP layer shapes.

    Mirrors PyTorch default nn.Linear init (uniform(+-1/sqrt(fan_in))),
    stored as (in_features, out_features).
    """
    dims = [(IN_FEATURES, HIDDEN), (HIDDEN, HIDDEN), (HIDDEN, HIDDEN),
            (HIDDEN, HIDDEN), (HIDDEN, CLASS_SIZE)]
    params = []
    for (fan_in, fan_out) in dims:
        key, kw, kb = jax.random.split(key, 3)
        bound = 1.0 / jnp.sqrt(jnp.float32(fan_in))
        w = jax.random.uniform(kw, (fan_in, fan_out), jnp.float32, -bound, bound)
        b = jax.random.uniform(kb, (fan_out,), jnp.float32, -bound, bound)
        params.append((w, b))
    return params


if __name__ == "__main__":
    key = jax.random.PRNGKey(0)
    k_params, k_x1, k_x2 = jax.random.split(key, 3)

    params = init_params(k_params)
    prepared = prepare_params(params)        # one-time int8 weight prep, off hot path
    epi_dtype = _epilogue_dtype()

    # Small batch (B=2), MNIST-shaped input (B, 1, 28, 28).
    x_small = jax.random.normal(k_x1, (2, 1, 28, 28), dtype=jnp.float32)
    logits = jax.block_until_ready(large_mlp_forward(x_small, prepared))
    assert logits.shape == (2, CLASS_SIZE), logits.shape

    ref_q = reference_forward_prepared(x_small, prepared, epi_dtype)
    ref_f = reference_forward_f32(x_small, params)
    assert jnp.allclose(logits, ref_q, atol=5e-3, rtol=5e-3), (
        float(jnp.max(jnp.abs(logits - ref_q))))
    assert jnp.allclose(logits, ref_f, atol=5e-2, rtol=5e-2), (
        float(jnp.max(jnp.abs(logits - ref_f))))

    # Larger batch exercises the multi-tile batch grid + row padding.
    x_big = jax.random.normal(k_x2, (300, 1, 28, 28), dtype=jnp.float32)
    logits_big = jax.block_until_ready(large_mlp_forward(x_big, prepared))
    assert logits_big.shape == (300, CLASS_SIZE), logits_big.shape
    ref_q_big = reference_forward_prepared(x_big, prepared, epi_dtype)
    assert jnp.allclose(logits_big, ref_q_big, atol=5e-3, rtol=5e-3), (
        float(jnp.max(jnp.abs(logits_big - ref_q_big))))

    print("KERNEL_OK")
</pallas_src>

<mosaic_0001>
module attributes {stable_mosaic.version = 11 : i64} {
  func.func @kernel(%arg0: i32, %arg1: memref<8x784xbf16, #tpu.memory_space<vmem>>, %arg2: memref<784x512xi8, #tpu.memory_space<vmem>>, %arg3: memref<1x512xf32, #tpu.memory_space<vmem>>, %arg4: memref<1x512xf32, #tpu.memory_space<vmem>>, %arg5: memref<512x512xi8, #tpu.memory_space<vmem>>, %arg6: memref<1x512xf32, #tpu.memory_space<vmem>>, %arg7: memref<1x512xf32, #tpu.memory_space<vmem>>, %arg8: memref<512x512xi8, #tpu.memory_space<vmem>>, %arg9: memref<1x512xf32, #tpu.memory_space<vmem>>, %arg10: memref<1x512xf32, #tpu.memory_space<vmem>>, %arg11: memref<512x512xi8, #tpu.memory_space<vmem>>, %arg12: memref<1x512xf32, #tpu.memory_space<vmem>>, %arg13: memref<1x512xf32, #tpu.memory_space<vmem>>, %arg14: memref<512x128xi8, #tpu.memory_space<vmem>>, %arg15: memref<1x128xf32, #tpu.memory_space<vmem>>, %arg16: memref<1x128xf32, #tpu.memory_space<vmem>>, %arg17: memref<8x128xbf16, #tpu.memory_space<vmem>>) attributes {dimension_semantics = [#tpu.dimension_semantics<parallel>], iteration_bounds = array<i64: 1>, scalar_prefetch = 0 : i64, scratch_operands = 0 : i64, tpu.core_type = #tpu.core_type<tc>, window_params = [{transform_indices = @transform_0, window_bounds = array<i64: 8, 784>}, {pipeline_mode = #tpu.pipeline_mode<synchronous>, transform_indices = @transform_1, window_bounds = array<i64: 784, 512>}, {pipeline_mode = #tpu.pipeline_mode<synchronous>, transform_indices = @transform_2, window_bounds = array<i64: 1, 512>}, {pipeline_mode = #tpu.pipeline_mode<synchronous>, transform_indices = @transform_3, window_bounds = array<i64: 1, 512>}, {pipeline_mode = #tpu.pipeline_mode<synchronous>, transform_indices = @transform_4, window_bounds = array<i64: 512, 512>}, {pipeline_mode = #tpu.pipeline_mode<synchronous>, transform_indices = @transform_5, window_bounds = array<i64: 1, 512>}, {pipeline_mode = #tpu.pipeline_mode<synchronous>, transform_indices = @transform_6, window_bounds = array<i64: 1, 512>}, {pipeline_mode = #tpu.pipeline_mode<synchronous>, transform_indices = @transform_7, window_bounds = array<i64: 512, 512>}, {pipeline_mode = #tpu.pipeline_mode<synchronous>, transform_indices = @transform_8, window_bounds = array<i64: 1, 512>}, {pipeline_mode = #tpu.pipeline_mode<synchronous>, transform_indices = @transform_9, window_bounds = array<i64: 1, 512>}, {pipeline_mode = #tpu.pipeline_mode<synchronous>, transform_indices = @transform_10, window_bounds = array<i64: 512, 512>}, {pipeline_mode = #tpu.pipeline_mode<synchronous>, transform_indices = @transform_11, window_bounds = array<i64: 1, 512>}, {pipeline_mode = #tpu.pipeline_mode<synchronous>, transform_indices = @transform_12, window_bounds = array<i64: 1, 512>}, {pipeline_mode = #tpu.pipeline_mode<synchronous>, transform_indices = @transform_13, window_bounds = array<i64: 512, 128>}, {pipeline_mode = #tpu.pipeline_mode<synchronous>, transform_indices = @transform_14, window_bounds = array<i64: 1, 128>}, {pipeline_mode = #tpu.pipeline_mode<synchronous>, transform_indices = @transform_15, window_bounds = array<i64: 1, 128>}, {transform_indices = @transform_16, window_bounds = array<i64: 8, 128>}]} {
    %c0 = arith.constant 0 : index
    %c0_0 = arith.constant 0 : index
    %0 = vector.load %arg1[%c0, %c0_0] : memref<8x784xbf16, #tpu.memory_space<vmem>>, vector<8x784xbf16>
    %c0_1 = arith.constant 0 : index
    %c0_2 = arith.constant 0 : index
    %1 = vector.load %arg2[%c0_1, %c0_2] : memref<784x512xi8, #tpu.memory_space<vmem>>, vector<784x512xi8>
    %2 = arith.sitofp %1 : vector<784x512xi8> to vector<784x512xbf16>
    %cst = arith.constant dense<0.000000e+00> : vector<8x512xf32>
    %3 = tpu.matmul %0, %2, %cst {dimension_numbers = #tpu.dot_dimension_numbers<[1], [0], [0], [1], [0, 0, 1, 1], [], []>} : vector<8x784xbf16>, vector<784x512xbf16>, vector<8x512xf32> -> vector<8x512xf32>
    %c0_3 = arith.constant 0 : index
    %c0_4 = arith.constant 0 : index
    %4 = vector.load %arg3[%c0_3, %c0_4] : memref<1x512xf32, #tpu.memory_space<vmem>>, vector<1x512xf32>
    %5 = vector.broadcast %4 : vector<1x512xf32> to vector<8x512xf32>
    %6 = arith.mulf %3, %5 : vector<8x512xf32>
    %c0_5 = arith.constant 0 : index
    %c0_6 = arith.constant 0 : index
    %7 = vector.load %arg4[%c0_5, %c0_6] : memref<1x512xf32, #tpu.memory_space<vmem>>, vector<1x512xf32>
    %8 = vector.broadcast %7 : vector<1x512xf32> to vector<8x512xf32>
    %9 = arith.addf %6, %8 : vector<8x512xf32>
    %cst_7 = arith.constant 0.000000e+00 : f32
    %10 = vector.broadcast %cst_7 : f32 to vector<8x512xf32>
    %11 = arith.maximumf %9, %10 : vector<8x512xf32>
    %12 = arith.truncf %11 : vector<8x512xf32> to vector<8x512xbf16>
    %c0_8 = arith.constant 0 : index
    %c0_9 = arith.constant 0 : index
    %13 = vector.load %arg5[%c0_8, %c0_9] : memref<512x512xi8, #tpu.memory_space<vmem>>, vector<512x512xi8>
    %14 = arith.sitofp %13 : vector<512x512xi8> to vector<512x512xbf16>
    %cst_10 = arith.constant dense<0.000000e+00> : vector<8x512xf32>
    %15 = tpu.matmul %12, %14, %cst_10 {dimension_numbers = #tpu.dot_dimension_numbers<[1], [0], [0], [1], [0, 0, 1, 1], [], []>} : vector<8x512xbf16>, vector<512x512xbf16>, vector<8x512xf32> -> vector<8x512xf32>
    %c0_11 = arith.constant 0 : index
    %c0_12 = arith.constant 0 : index
    %16 = vector.load %arg6[%c0_11, %c0_12] : memref<1x512xf32, #tpu.memory_space<vmem>>, vector<1x512xf32>
    %17 = vector.broadcast %16 : vector<1x512xf32> to vector<8x512xf32>
    %18 = arith.mulf %15, %17 : vector<8x512xf32>
    %c0_13 = arith.constant 0 : index
    %c0_14 = arith.constant 0 : index
    %19 = vector.load %arg7[%c0_13, %c0_14] : memref<1x512xf32, #tpu.memory_space<vmem>>, vector<1x512xf32>
    %20 = vector.broadcast %19 : vector<1x512xf32> to vector<8x512xf32>
    %21 = arith.addf %18, %20 : vector<8x512xf32>
    %cst_15 = arith.constant 0.000000e+00 : f32
    %22 = vector.broadcast %cst_15 : f32 to vector<8x512xf32>
    %23 = arith.maximumf %21, %22 : vector<8x512xf32>
    %24 = arith.truncf %23 : vector<8x512xf32> to vector<8x512xbf16>
    %c0_16 = arith.constant 0 : index
    %c0_17 = arith.constant 0 : index
    %25 = vector.load %arg8[%c0_16, %c0_17] : memref<512x512xi8, #tpu.memory_space<vmem>>, vector<512x512xi8>
    %26 = arith.sitofp %25 : vector<512x512xi8> to vector<512x512xbf16>
    %cst_18 = arith.constant dense<0.000000e+00> : vector<8x512xf32>
    %27 = tpu.matmul %24, %26, %cst_18 {dimension_numbers = #tpu.dot_dimension_numbers<[1], [0], [0], [1], [0, 0, 1, 1], [], []>} : vector<8x512xbf16>, vector<512x512xbf16>, vector<8x512xf32> -> vector<8x512xf32>
    %c0_19 = arith.constant 0 : index
    %c0_20 = arith.constant 0 : index
    %28 = vector.load %arg9[%c0_19, %c0_20] : memref<1x512xf32, #tpu.memory_space<vmem>>, vector<1x512xf32>
    %29 = vector.broadcast %28 : vector<1x512xf32> to vector<8x512xf32>
    %30 = arith.mulf %27, %29 : vector<8x512xf32>
    %c0_21 = arith.constant 0 : index
    %c0_22 = arith.constant 0 : index
    %31 = vector.load %arg10[%c0_21, %c0_22] : memref<1x512xf32, #tpu.memory_space<vmem>>, vector<1x512xf32>
    %32 = vector.broadcast %31 : vector<1x512xf32> to vector<8x512xf32>
    %33 = arith.addf %30, %32 : vector<8x512xf32>
    %cst_23 = arith.constant 0.000000e+00 : f32
    %34 = vector.broadcast %cst_23 : f32 to vector<8x512xf32>
    %35 = arith.maximumf %33, %34 : vector<8x512xf32>
    %36 = arith.truncf %35 : vector<8x512xf32> to vector<8x512xbf16>
    %c0_24 = arith.constant 0 : index
    %c0_25 = arith.constant 0 : index
    %37 = vector.load %arg11[%c0_24, %c0_25] : memref<512x512xi8, #tpu.memory_space<vmem>>, vector<512x512xi8>
    %38 = arith.sitofp %37 : vector<512x512xi8> to vector<512x512xbf16>
    %cst_26 = arith.constant dense<0.000000e+00> : vector<8x512xf32>
    %39 = tpu.matmul %36, %38, %cst_26 {dimension_numbers = #tpu.dot_dimension_numbers<[1], [0], [0], [1], [0, 0, 1, 1], [], []>} : vector<8x512xbf16>, vector<512x512xbf16>, vector<8x512xf32> -> vector<8x512xf32>
    %c0_27 = arith.constant 0 : index
    %c0_28 = arith.constant 0 : index
    %40 = vector.load %arg12[%c0_27, %c0_28] : memref<1x512xf32, #tpu.memory_space<vmem>>, vector<1x512xf32>
    %41 = vector.broadcast %40 : vector<1x512xf32> to vector<8x512xf32>
    %42 = arith.mulf %39, %41 : vector<8x512xf32>
    %c0_29 = arith.constant 0 : index
    %c0_30 = arith.constant 0 : index
    %43 = vector.load %arg13[%c0_29, %c0_30] : memref<1x512xf32, #tpu.memory_space<vmem>>, vector<1x512xf32>
    %44 = vector.broadcast %43 : vector<1x512xf32> to vector<8x512xf32>
    %45 = arith.addf %42, %44 : vector<8x512xf32>
    %cst_31 = arith.constant 0.000000e+00 : f32
    %46 = vector.broadcast %cst_31 : f32 to vector<8x512xf32>
    %47 = arith.maximumf %45, %46 : vector<8x512xf32>
    %48 = arith.truncf %47 : vector<8x512xf32> to vector<8x512xbf16>
    %c0_32 = arith.constant 0 : index
    %c0_33 = arith.constant 0 : index
    %49 = vector.load %arg14[%c0_32, %c0_33] : memref<512x128xi8, #tpu.memory_space<vmem>>, vector<512x128xi8>
    %50 = arith.sitofp %49 : vector<512x128xi8> to vector<512x128xbf16>
    %cst_34 = arith.constant dense<0.000000e+00> : vector<8x128xf32>
    %51 = tpu.matmul %48, %50, %cst_34 {dimension_numbers = #tpu.dot_dimension_numbers<[1], [0], [0], [1], [0, 0, 1, 1], [], []>} : vector<8x512xbf16>, vector<512x128xbf16>, vector<8x128xf32> -> vector<8x128xf32>
    %c0_35 = arith.constant 0 : index
    %c0_36 = arith.constant 0 : index
    %52 = vector.load %arg15[%c0_35, %c0_36] : memref<1x128xf32, #tpu.memory_space<vmem>>, vector<1x128xf32>
    %53 = vector.broadcast %52 : vector<1x128xf32> to vector<8x128xf32>
    %54 = arith.mulf %51, %53 : vector<8x128xf32>
    %c0_37 = arith.constant 0 : index
    %c0_38 = arith.constant 0 : index
    %55 = vector.load %arg16[%c0_37, %c0_38] : memref<1x128xf32, #tpu.memory_space<vmem>>, vector<1x128xf32>
    %56 = vector.broadcast %55 : vector<1x128xf32> to vector<8x128xf32>
    %57 = arith.addf %54, %56 : vector<8x128xf32>
    %58 = arith.truncf %57 : vector<8x128xf32> to vector<8x128xbf16>
    %c0_39 = arith.constant 0 : index
    %c0_40 = arith.constant 0 : index
    %59 = vector.load %arg17[%c0_39, %c0_40] : memref<8x128xbf16, #tpu.memory_space<vmem>>, vector<8x128xbf16>
    tpu.vector_store %arg17[%c0_39, %c0_40], %58 {strides = array<i32>} : memref<8x128xbf16, #tpu.memory_space<vmem>>, vector<8x128xbf16>,
    return
  }
  func.func @transform_0(%arg0: i32) -> (i32, i32) {
    %c0_i32 = arith.constant 0 : i32
    %c0_i32_0 = arith.constant 0 : i32
    return %arg0, %c0_i32 : i32, i32
  }
  func.func @transform_1(%arg0: i32) -> (i32, i32) {
    %c0_i32 = arith.constant 0 : i32
    %c0_i32_0 = arith.constant 0 : i32
    %c0_i32_1 = arith.constant 0 : i32
    return %c0_i32, %c0_i32_0 : i32, i32
  }
  func.func @transform_2(%arg0: i32) -> (i32, i32) {
    %c0_i32 = arith.constant 0 : i32
    %c0_i32_0 = arith.constant 0 : i32
    %c0_i32_1 = arith.constant 0 : i32
    return %c0_i32, %c0_i32_0 : i32, i32
  }
  func.func @transform_3(%arg0: i32) -> (i32, i32) {
    %c0_i32 = arith.constant 0 : i32
    %c0_i32_0 = arith.constant 0 : i32
    %c0_i32_1 = arith.constant 0 : i32
    return %c0_i32, %c0_i32_0 : i32, i32
  }
  func.func @transform_4(%arg0: i32) -> (i32, i32) {
    %c0_i32 = arith.constant 0 : i32
    %c0_i32_0 = arith.constant 0 : i32
    %c0_i32_1 = arith.constant 0 : i32
    return %c0_i32, %c0_i32_0 : i32, i32
  }
  func.func @transform_5(%arg0: i32) -> (i32, i32) {
    %c0_i32 = arith.constant 0 : i32
    %c0_i32_0 = arith.constant 0 : i32
    %c0_i32_1 = arith.constant 0 : i32
    return %c0_i32, %c0_i32_0 : i32, i32
  }
  func.func @transform_6(%arg0: i32) -> (i32, i32) {
    %c0_i32 = arith.constant 0 : i32
    %c0_i32_0 = arith.constant 0 : i32
    %c0_i32_1 = arith.constant 0 : i32
    return %c0_i32, %c0_i32_0 : i32, i32
  }
  func.func @transform_7(%arg0: i32) -> (i32, i32) {
    %c0_i32 = arith.constant 0 : i32
    %c0_i32_0 = arith.constant 0 : i32
    %c0_i32_1 = arith.constant 0 : i32
    return %c0_i32, %c0_i32_0 : i32, i32
  }
  func.func @transform_8(%arg0: i32) -> (i32, i32) {
    %c0_i32 = arith.constant 0 : i32
    %c0_i32_0 = arith.constant 0 : i32
    %c0_i32_1 = arith.constant 0 : i32
    return %c0_i32, %c0_i32_0 : i32, i32
  }
  func.func @transform_9(%arg0: i32) -> (i32, i32) {
    %c0_i32 = arith.constant 0 : i32
    %c0_i32_0 = arith.constant 0 : i32
    %c0_i32_1 = arith.constant 0 : i32
    return %c0_i32, %c0_i32_0 : i32, i32
  }
  func.func @transform_10(%arg0: i32) -> (i32, i32) {
    %c0_i32 = arith.constant 0 : i32
    %c0_i32_0 = arith.constant 0 : i32
    %c0_i32_1 = arith.constant 0 : i32
    return %c0_i32, %c0_i32_0 : i32, i32
  }
  func.func @transform_11(%arg0: i32) -> (i32, i32) {
    %c0_i32 = arith.constant 0 : i32
    %c0_i32_0 = arith.constant 0 : i32
    %c0_i32_1 = arith.constant 0 : i32
    return %c0_i32, %c0_i32_0 : i32, i32
  }
  func.func @transform_12(%arg0: i32) -> (i32, i32) {
    %c0_i32 = arith.constant 0 : i32
    %c0_i32_0 = arith.constant 0 : i32
    %c0_i32_1 = arith.constant 0 : i32
    return %c0_i32, %c0_i32_0 : i32, i32
  }
  func.func @transform_13(%arg0: i32) -> (i32, i32) {
    %c0_i32 = arith.constant 0 : i32
    %c0_i32_0 = arith.constant 0 : i32
    %c0_i32_1 = arith.constant 0 : i32
    return %c0_i32, %c0_i32_0 : i32, i32
  }
  func.func @transform_14(%arg0: i32) -> (i32, i32) {
    %c0_i32 = arith.constant 0 : i32
    %c0_i32_0 = arith.constant 0 : i32
    %c0_i32_1 = arith.constant 0 : i32
    return %c0_i32, %c0_i32_0 : i32, i32
  }
  func.func @transform_15(%arg0: i32) -> (i32, i32) {
    %c0_i32 = arith.constant 0 : i32
    %c0_i32_0 = arith.constant 0 : i32
    %c0_i32_1 = arith.constant 0 : i32
    return %c0_i32, %c0_i32_0 : i32, i32
  }
  func.func @transform_16(%arg0: i32) -> (i32, i32) {
    %c0_i32 = arith.constant 0 : i32
    %c0_i32_0 = arith.constant 0 : i32
    return %arg0, %c0_i32 : i32, i32
  }
}

</mosaic_0001>

<bundles_post_ra>
// kernel: large_mlp_forward.1
= control target key start
LH: loop header
LB: loop body
LE: loop exit
PB: predicated region body
PF: predicated region fallthrough
CT: control target
= control target key end

     0   :  { %s4831_s0 = inlined_call_operand.vmem [shape: bf16[8,784], index: 0, kind: input, shape index: {}]   ;;  %s4832_s1 = inlined_call_operand.hbm [shape: s8[784,512], index: 1, kind: input, shape index: {}]   ;;  %s4833_s2 = inlined_call_operand.vmem [shape: f32[1,512], index: 2, kind: input, shape index: {}]   ;;  %s4834_s3 = inlined_call_operand.vmem [shape: f32[1,512], index: 3, kind: input, shape index: {}]   ;;  %s4835_s4 = inlined_call_operand.hbm [shape: s8[512,512], index: 4, kind: input, shape index: {}]   ;;  %s4836_s5 = inlined_call_operand.vmem [shape: f32[1,512], index: 5, kind: input, shape index: {}]   ;;  %s4837_s6 = inlined_call_operand.vmem [shape: f32[1,512], index: 6, kind: input, shape index: {}]   ;;  %s4838_s7 = inlined_call_operand.hbm [shape: s8[512,512], index: 7, kind: input, shape index: {}]   ;;  %s4839_s8 = inlined_call_operand.vmem [shape: f32[1,512], index: 8, kind: input, shape index: {}]   ;;  %s4840_s9 = inlined_call_operand.vmem [shape: f32[1,512], index: 9, kind: input, shape index: {}]   ;;  %s4841_s10 = inlined_call_operand.hbm [shape: s8[512,512], index: 10, kind: input, shape index: {}]   ;;  %s4842_s11 = inlined_call_operand.vmem [shape: f32[1,512], index: 11, kind: input, shape index: {}]   ;;  %s4843_s12 = inlined_call_operand.vmem [shape: f32[1,512], index: 12, kind: input, shape index: {}]   ;;  %s4844_s13 = inlined_call_operand.vmem [shape: s8[512,128], index: 13, kind: input, shape index: {}]   ;;  %s4845_s14 = inlined_call_operand.vmem [shape: f32[1,128], index: 14, kind: input, shape index: {}]   ;;  %s4846_s15 = inlined_call_operand.vmem [shape: f32[1,128], index: 15, kind: input, shape index: {}]   ;;  %s4847_s16 = inlined_call_operand.vmem [shape: bf16[8,128], index: 16, kind: output, shape index: {}]  }
   0x1   :  { %4901 = sst [smem:[#allocation78_spill]] %s4831_s0 }
   0x2   :  { %21 = vsyncpa [#allocation3], 0 }
   0x3   :  { %22 = vsyncpa [#allocation5], 0 }
   0x4   :  { %23 = vsyncpa [#allocation8], 0  ;;  %s3557_s21 = smov [#allocation4]  }
   0x5   :  { %s47_s22 = sshll.u32 %s3557_s21, 4  ;;  %s48_s22 = int_to_ptr.vmem [resolvable:$true] %s47_s22 }
   0x6   :  { %s3479_s23 = scalar_lea.vmem %s48_s22, 8192  ;;  %p3484_p1 = scmp.lt.s32.totalorder %s48_s22, %s48_s22 }
   0x7   :  { %p3480_p0 = scmp.ne.s32.totalorder %s48_s22, %s3479_s23  ;;  %p3485_p2 = scmp.lt.s32.totalorder %s3479_s23, %s3479_s23 }
   0x9   :  { %p3486_p3 = por %p3485_p2, %p3484_p1 }
   0xb   :  { %p3487_p4 = pnand %p3486_p3, %p3480_p0 }
   0xd   :  { %3490 = shalt.err (!%p3487_p4)
}
   0xe   :  { %s3558_s24 = smov 512   ;;  %s3559_s25 = smov 32  }
   0xf   :  { %53 = dma.hbm_to_vmem [thread:$0]  %s4835_s4, 8192, %s48_s22, [#allocation5], %s3558_s24, %s3558_s24, %s3559_s25  }
  0x10   :  { %s3560_s28 = smov [#allocation2]  }
  0x11   :  { %s31_s29 = sshll.u32 %s3560_s28, 4  ;;  %s32_s29 = int_to_ptr.vmem [resolvable:$true] %s31_s29 }
  0x12   :  { %s3499_s30 = scalar_lea.vmem %s32_s29, 12544  ;;  %p3504_p6 = scmp.lt.s32.totalorder %s32_s29, %s32_s29 }
  0x13   :  { %p3500_p5 = scmp.ne.s32.totalorder %s32_s29, %s3499_s30  ;;  %p3505_p7 = scmp.lt.s32.totalorder %s3499_s30, %s3499_s30 }
  0x15   :  { %p3506_p8 = por %p3505_p7, %p3504_p6 }
  0x17   :  { %p3507_p9 = pnand %p3506_p8, %p3500_p5 }
  0x19   :  { %3510 = shalt.err (!%p3507_p9)
}
  0x1a   :  { %s3561_s0 = smov 128   ;;  %s3562_s17 = smov 8  }
  0x1b   :  { %37 = dma.hbm_to_vmem [thread:$0]  %s4832_s1, 12544, %s32_s29, [#allocation3], %s3561_s0, %s3561_s0, %s3562_s17  }
  0x1c   :  { %s3563_s20 = smov [#allocation6]   ;;  %s3564_s23 = smov [#allocation7]  }
  0x1d   :  { %s63_s21 = sshll.u32 %s3563_s20, 4  ;;  %s79_s4 = sshll.u32 %s3564_s23, 4  ;;  %s64_s21 = int_to_ptr.vmem [resolvable:$true] %s63_s21  ;;  %s80_s4 = int_to_ptr.vmem [resolvable:$true] %s79_s4 }
  0x1e   :  { %s3519_s22 = scalar_lea.vmem %s64_s21, 8192  ;;  %p3524_p11 = scmp.lt.s32.totalorder %s64_s21, %s64_s21 }
  0x1f   :  { %p3520_p10 = scmp.ne.s32.totalorder %s64_s21, %s3519_s22  ;;  %p3525_p12 = scmp.lt.s32.totalorder %s3519_s22, %s3519_s22 }
  0x21   :  { %p3526_p13 = por %p3525_p12, %p3524_p11 }
  0x23   :  { %p3527_p0 = pnand %p3526_p13, %p3520_p10 }
  0x25   :  { %3530 = shalt.err (!%p3527_p0)
}
  0x26   :  { %69 = dma.hbm_to_vmem [thread:$0]  %s4838_s7, 8192, %s64_s21, [#allocation5], %s3558_s24, %s3558_s24, %s3559_s25  }
  0x27   :  { %s3539_s1 = scalar_lea.vmem %s80_s4, 8192  ;;  %p3544_p2 = scmp.lt.s32.totalorder %s80_s4, %s80_s4 }
  0x28   :  { %p3540_p1 = scmp.ne.s32.totalorder %s80_s4, %s3539_s1  ;;  %p3545_p3 = scmp.lt.s32.totalorder %s3539_s1, %s3539_s1 }
  0x2a   :  { %p3546_p4 = por %p3545_p3, %p3544_p2 }
  0x2c   :  { %p3547_p5 = pnand %p3546_p4, %p3540_p1 }
  0x2e   :  { %3550 = shalt.err (!%p3547_p5)
}
  0x2f   :  { %85 = dma.hbm_to_vmem [thread:$0]  %s4841_s10, 8192, %s80_s4, [#allocation8], %s3558_s24, %s3558_s24, %s3559_s25  }
  0x30   :  { %3551 = dma.done.wait [#allocation3], 12544  }
  0x31   :  { %3552 = vsyncadd [#allocation3], 4294954752 }
  0x32   :  { %3553 = dma.done.wait [#allocation5], 16384  }
  0x33   :  { %3554 = vsyncadd [#allocation5], 4294950912 }
  0x34   :  { %3555 = dma.done.wait [#allocation8], 8192  }
  0x35   :  { %3556 = vsyncadd [#allocation8], 4294959104  ;;  %v3672_v0 = vld [vmem:[#allocation2 + $0x70] sm:$0xff]  ;;  %v3674_v1 = vld [vmem:[#allocation2 + $0x78] sm:$0xff]  ;;  %s4936_s24 = sld [smem:[#allocation78_spill]]  ;;  %vm1411_vm0 = vcmask 130048  }
  0x36   :  { %v3676_v2 = vld [vmem:[#allocation2 + $0x170] sm:$0xff]  ;;  %v239_v3 = vunpack.c.l.s8.bf16 %v3672_v0  ;;  %v4851_v4 = vunpack.c.h.s8.bf16 %v3672_v0  ;;  %v241_v5 = vunpack.c.l.s8.bf16 %v3674_v1  ;;  %v4852_v6 = vunpack.c.h.s8.bf16 %v3674_v1  ;;  %v3682_v7 = vld [vmem:[#allocation2 + $0x178] sm:$0xff]  ;;  %v3684_v8 = vld [vmem:[#allocation2 + $0x60] sm:$0xff] }
  0x37   :  { %4902 = vst [vmem:[#allocation12_spill] sm:$0xff] %v3676_v2  ;;  %4903 = vst [vmem:[#allocation13_spill] sm:$0xff] %v3682_v7  ;;  %v3686_v9 = vld [vmem:[#allocation2 + $0x68] sm:$0xff]  ;;  %v303_v10 = vunpack.c.l.s8.bf16 %v3676_v2  ;;  %v4849_v11 = vunpack.c.h.s8.bf16 %v3676_v2  ;;  %v305_v12 = vunpack.c.l.s8.bf16 %v3682_v7  ;;  %v4850_v13 = vunpack.c.h.s8.bf16 %v3682_v7  ;;  %v3692_v14 = vld [vmem:[#allocation2 + $0x160] sm:$0xff] }
  0x38   :  { %4904 = vst [vmem:[#allocation14_spill] sm:$0xff] %v3692_v14  ;;  %v3694_v15 = vld [vmem:[#allocation2 + $0x168] sm:$0xff]  ;;  %v3696_v16 = vld [vmem:[#allocation2 + $0x50] sm:$0xff]  ;;  %v3240_v17 = vcombine.high %v239_v3, %v241_v5  ;;  %v3702_v18 = vcombine.low %v4851_v4, %v4852_v6  ;;  %v3239_v19 = vcombine.low %v239_v3, %v241_v5  ;;  %v235_v20 = vunpack.c.l.s8.bf16 %v3684_v8  ;;  %v3705_v21 = vld [vmem:[#allocation2 + $0x58] sm:$0xff] }
  0x39   :  { %4905 = vst [vmem:[#allocation15_spill] sm:$0xff] %v3694_v15  ;;  %v3707_v22 = vld [vmem:[#allocation2 + $0x150] sm:$0xff]  ;;  %v3709_v23 = vld [vmem:[#allocation2 + $0x158] sm:$0xff]  ;;  %v3304_v24 = vcombine.high %v303_v10, %v305_v12  ;;  %v3715_v25 = vcombine.low %v4849_v11, %v4850_v13  ;;  %v3303_v26 = vcombine.low %v303_v10, %v305_v12  ;;  %v237_v27 = vunpack.c.l.s8.bf16 %v3686_v9  ;;  %v3722_v32 = vld [vmem:[#allocation2 + $0x40] sm:$0xff] }
  0x3a   :  { %4906 = vst [vmem:[#allocation16_spill] sm:$0xff] %v3702_v18  ;;  %4907 = vst [vmem:[#allocation17_spill] sm:$0xff] %v3707_v22  ;;  %1415 = vmatprep.subr.bf16.mxu0 %v3240_v17  ;;  %v299_v28 = vunpack.c.l.s8.bf16 %v3692_v14  ;;  %v301_v29 = vunpack.c.l.s8.bf16 %v3694_v15  ;;  %v231_v30 = vunpack.c.l.s8.bf16 %v3696_v16  ;;  %v233_v31 = vunpack.c.l.s8.bf16 %v3705_v21  ;;  %v3724_v33 = vld [vmem:[#allocation2 + $0x48] sm:$0xff]  ;;  %v3728_v38 = vld [vmem:[#allocation2 + $0x140] sm:$0xff] }
  0x3b   :  { %4908 = vst [vmem:[#allocation18_spill] sm:$0xff] %v3709_v23  ;;  %4909 = vst [vmem:[#allocation19_spill] sm:$0xff] %v3715_v25  ;;  %1456 = vmatprep.subr.bf16.mxu1 %v3304_v24  ;;  %1416 = vmatpush1.bf16.msra.mxu0 %v3239_v19  ;;  %v3236_v34 = vcombine.high %v235_v20, %v237_v27  ;;  %v3235_v35 = vcombine.low %v235_v20, %v237_v27  ;;  %v295_v36 = vunpack.c.l.s8.bf16 %v3707_v22  ;;  %v3730_v39 = vld [vmem:[#allocation2 + $0x148] sm:$0xff]  ;;  %v3734_v46 = vld [vmem:[#allocation2 + $0x30] sm:$0xff] }
  0x3c   :  { %v297_v37 = vunpack.c.l.s8.bf16 %v3709_v23  ;;  %4910 = vst [vmem:[#allocation20_spill] sm:$0xff] %v3728_v38  ;;  %4911 = vst [vmem:[#allocation21_spill] sm:$0xff] %v3730_v39  ;;  %1457 = vmatpush1.bf16.msra.mxu1 %v3303_v26  ;;  %v3300_v40 = vcombine.high %v299_v28, %v301_v29  ;;  %v3299_v41 = vcombine.low %v299_v28, %v301_v29  ;;  %v227_v44 = vunpack.c.l.s8.bf16 %v3722_v32  ;;  %v3736_v47 = vld [vmem:[#allocation2 + $0x38] sm:$0xff]  ;;  %v3740_v50 = vld [vmem:[#allocation2 + $0x130] sm:$0xff] }
  0x3d   :  { %v3232_v42 = vcombine.high %v231_v30, %v233_v31  ;;  %1417 = vmatprep.subr.bf16.mxu0 %v3236_v34  ;;  %v229_v45 = vunpack.c.l.s8.bf16 %v3724_v33  ;;  %v291_v48 = vunpack.c.l.s8.bf16 %v3728_v38  ;;  %v293_v49 = vunpack.c.l.s8.bf16 %v3730_v39  ;;  %4912 = vst [vmem:[#allocation22_spill] sm:$0xff] %v3740_v50  ;;  %v3742_v51 = vld [vmem:[#allocation2 + $0x138] sm:$0xff]  ;;  %v3748_v60 = vld [vmem:[#allocation2 + $0x20] sm:$0xff]  ;;  %v3750_v61 = vld [vmem:[#allocation2 + $0x28] sm:$0xff] }
  0x3e   :  { %v3296_v43 = vcombine.high %v295_v36, %v297_v37  ;;  %1458 = vmatprep.subr.bf16.mxu1 %v3300_v40  ;;  %4913 = vst [vmem:[#allocation23_spill] sm:$0xff] %v3742_v51  ;;  %v3231_v52 = vcombine.low %v231_v30, %v233_v31  ;;  %v3295_v53 = vcombine.low %v295_v36, %v297_v37  ;;  %v223_v55 = vunpack.c.l.s8.bf16 %v3734_v46  ;;  %v3752_v62 = vld [vmem:[#allocation2 + $0x120] sm:$0xff]  ;;  %v3754_v63 = vld [vmem:[#allocation2 + $0x128] sm:$0xff]  ;;  %v3756_v5 = vld [vmem:[#allocation2 + $0x10] sm:$0xff] }
  0x3f   :  { %1418 = vmatpush1.bf16.msra.mxu0 %v3235_v35  ;;  %v3228_v54 = vcombine.high %v227_v44, %v229_v45  ;;  %v225_v56 = vunpack.c.l.s8.bf16 %v3736_v47  ;;  %v3292_v57 = vcombine.high %v291_v48, %v293_v49  ;;  %v287_v58 = vunpack.c.l.s8.bf16 %v3740_v50  ;;  %4914 = vst [vmem:[#allocation24_spill] sm:$0xff] %v3752_v62  ;;  %4915 = vst [vmem:[#allocation25_spill] sm:$0xff] %v3754_v63  ;;  %v3760_v20 = vld [vmem:[#allocation2 + $0x18] sm:$0xff]  ;;  %v3762_v24 = vld [vmem:[#allocation2 + $0x110] sm:$0xff] }
  0x40   :  { %1459 = vmatpush1.bf16.msra.mxu1 %v3299_v41  ;;  %1419 = vmatprep.subr.bf16.mxu0 %v3232_v42  ;;  %v289_v59 = vunpack.c.l.s8.bf16 %v3742_v51  ;;  %v3227_v3 = vcombine.low %v227_v44, %v229_v45  ;;  %v3291_v10 = vcombine.low %v291_v48, %v293_v49  ;;  %v219_v17 = vunpack.c.l.s8.bf16 %v3748_v60  ;;  %4916 = vst [vmem:[#allocation26_spill] sm:$0xff] %v3762_v24  ;;  %v3764_v26 = vld [vmem:[#allocation2 + $0x118] sm:$0xff]  ;;  %v3768_v31 = vld [vmem:[#allocation2] sm:$0xff]  ;;  %v3770_v34 = vld [vmem:[#allocation2 + $0x8] sm:$0xff] }
  0x41   :  { %1460 = vmatprep.subr.bf16.mxu1 %v3296_v43  ;;  %v3224_v12 = vcombine.high %v223_v55, %v225_v56  ;;  %v221_v19 = vunpack.c.l.s8.bf16 %v3750_v61  ;;  %4917 = vst [vmem:[#allocation27_spill] sm:$0xff] %v3764_v26  ;;  %v283_v28 = vunpack.c.l.s8.bf16 %v3752_v62  ;;  %v285_v29 = vunpack.c.l.s8.bf16 %v3754_v63  ;;  %v3776_v43 = vld [vmem:[#allocation2 + $0x100] sm:$0xff]  ;;  %v3778_v44 = vld [vmem:[#allocation2 + $0x108] sm:$0xff]  ;;  %v3798_v13 = vld [vmem:[#allocation2 + $0xd0] sm:$0xff] }
  0x42   :  { %v3288_v27 = vcombine.high %v287_v58, %v289_v59  ;;  %v3223_v30 = vcombine.low %v223_v55, %v225_v56  ;;  %v215_v35 = vunpack.c.l.s8.bf16 %v3756_v5  ;;  %v217_v36 = vunpack.c.l.s8.bf16 %v3760_v20  ;;  %4918 = vst [vmem:[#allocation28_spill] sm:$0xff] %v3776_v43  ;;  %4919 = vst [vmem:[#allocation29_spill] sm:$0xff] %v3778_v44  ;;  %v3788_v56 = vld [vmem:[#allocation2 + $0x1f8] sm:$0xff]  ;;  %v3796_v11 = vld [vmem:[#allocation2 + $0x1e8] sm:$0xff] }
  0x43   :  { %1420 = vmatpush1.bf16.msra.mxu0 %v3231_v52  ;;  %v279_v37 = vunpack.c.l.s8.bf16 %v3762_v24  ;;  %v281_v40 = vunpack.c.l.s8.bf16 %v3764_v26  ;;  %v3287_v41 = vcombine.low %v287_v58, %v289_v59  ;;  %v3220_v42 = vcombine.high %v219_v17, %v221_v19  ;;  %v3782_v52 = vld [vmem:[#allocation2 + $0xf0] sm:$0xff]  ;;  %4921 = vst [vmem:[#allocation31_spill] sm:$0xff] %v3788_v56  ;;  %v3792_v58 = vld [vmem:[#allocation2 + $0xe8] sm:$0xff]  ;;  %4923 = vst [vmem:[#allocation33_spill] sm:$0xff] %v3796_v11 }
  0x44   :  { %1461 = vmatpush1.bf16.msra.mxu1 %v3295_v53  ;;  %1421 = vmatprep.subr.bf16.mxu0 %v3228_v54  ;;  %v3284_v45 = vcombine.high %v283_v28, %v285_v29  ;;  %v211_v48 = vunpack.c.l.s8.bf16 %v3768_v31  ;;  %v213_v49 = vunpack.c.l.s8.bf16 %v3770_v34  ;;  %v3784_v53 = vld [vmem:[#allocation2 + $0xf8] sm:$0xff]  ;;  %v3786_v54 = vld [vmem:[#allocation2 + $0x1f0] sm:$0xff]  ;;  %v3219_v55 = vcombine.low %v219_v17, %v221_v19  ;;  %v3828_v50 = vld [vmem:[#allocation2 + $0x1c0] sm:$0xff] }
  0x45   :  { %1462 = vmatprep.subr.bf16.mxu1 %v3292_v57  ;;  %4920 = vst [vmem:[#allocation30_spill] sm:$0xff] %v3786_v54  ;;  %v3790_v57 = vld [vmem:[#allocation2 + $0xe0] sm:$0xff]  ;;  %v3283_v59 = vcombine.low %v283_v28, %v285_v29  ;;  %v3279_v17 = vcombine.low %v279_v37, %v281_v40  ;;  %v275_v19 = vunpack.c.l.s8.bf16 %v3776_v43  ;;  %v277_v4 = vunpack.c.l.s8.bf16 %v3778_v44  ;;  %v3805_v28 = vld [vmem:[#allocation2 + $0x1d0] sm:$0xff]  ;;  %v3807_v29 = vld [vmem:[#allocation2 + $0x1d8] sm:$0xff] }
  0x46   :  { %v271_v6 = vunpack.c.l.s8.bf16 %v3782_v52  ;;  %4924 = vst [vmem:[#allocation34_spill] sm:$0xff] %v3805_v28  ;;  %4925 = vst [vmem:[#allocation35_spill] sm:$0xff] %v3807_v29  ;;  %v333_v44 = vunpack.c.l.s8.bf16 %v3796_v11  ;;  %v263_v43 = vunpack.c.l.s8.bf16 %v3798_v13  ;;  %v327_v18 = vunpack.c.l.s8.bf16 %v3805_v28  ;;  %v3830_v28 = vld [vmem:[#allocation2 + $0x1c8] sm:$0xff]  ;;  %v3869_v23 = vld [vmem:[#allocation2 + $0x1a0] sm:$0xff] }
  0x47   :  { %1422 = vmatpush1.bf16.msra.mxu0 %v3227_v3  ;;  %v3216_v3 = vcombine.high %v215_v35, %v217_v36  ;;  %v329_v26 = vunpack.c.l.s8.bf16 %v3807_v29  ;;  %v3276_v24 = vcombine.high %v275_v19, %v277_v4  ;;  %v3211_v63 = vcombine.low %v211_v48, %v213_v49  ;;  %4928 = vst [vmem:[#allocation38_spill] sm:$0xff] %v3828_v50  ;;  %v3832_v29 = vld [vmem:[#allocation2 + $0xb0] sm:$0xff]  ;;  %v3871_v22 = vld [vmem:[#allocation2 + $0x1a8] sm:$0xff] }
  0x48   :  { %1463 = vmatpush1.bf16.msra.mxu1 %v3291_v10  ;;  %1423 = vmatprep.subr.bf16.mxu0 %v3224_v12  ;;  %v3280_v10 = vcombine.high %v279_v37, %v281_v40  ;;  %v3215_v12 = vcombine.low %v215_v35, %v217_v36  ;;  %v3212_v35 = vcombine.high %v211_v48, %v213_v49  ;;  %v273_v36 = vunpack.c.l.s8.bf16 %v3784_v53  ;;  %v3840_v49 = vld [vmem:[#allocation2 + $0xb8] sm:$0xff]  ;;  %v3876_v15 = vld [vmem:[%s4936_s24 + $0x8] sm:$0xff]  ;;  %v3890_v2 = vld [vmem:[#allocation2 + $0x190] sm:$0xff] }
  0x49   :  { %1464 = vmatprep.subr.bf16.mxu1 %v3288_v27  ;;  %v3794_v27 = vld [vmem:[#allocation2 + $0x1e0] sm:$0xff]  ;;  %v337_v37 = vunpack.c.l.s8.bf16 %v3788_v56  ;;  %v267_v40 = vunpack.c.l.s8.bf16 %v3790_v57  ;;  %v3822_v56 = vld [vmem:[#allocation2 + $0xc8] sm:$0xff]  ;;  %4929 = vst [vmem:[#allocation39_spill] sm:$0xff] %v3830_v28  ;;  %4930 = vst [vmem:[#allocation40_spill] sm:$0xff] %v3832_v29  ;;  %v3865_v38 = vcombine.low %v327_v18, %v329_v26 }
  0x4a   :  { %4922 = vst [vmem:[#allocation32_spill] sm:$0xff] %v3794_v27  ;;  %v331_v25 = vunpack.c.l.s8.bf16 %v3794_v27  ;;  %4927 = vst [vmem:[#allocation37_spill] sm:$0xff] %v3822_v56  ;;  %v3275_v27 = vcombine.low %v275_v19, %v277_v4  ;;  %v3272_v11 = vcombine.high %v271_v6, %v273_v36  ;;  %v3824_v62 = vcombine.low %v271_v6, %v273_v36  ;;  %v3842_v6 = vld [vmem:[#allocation2 + $0x1b0] sm:$0xff] }
  0x4b   :  { %1424 = vmatpush1.bf16.msra.mxu0 %v3223_v30  ;;  %v3803_v30 = vld [vmem:[#allocation2 + $0xd8] sm:$0xff]  ;;  %v261_v4 = vunpack.c.l.s8.bf16 %v3822_v56  ;;  %4931 = vst [vmem:[#allocation41_spill] sm:$0xff] %v3840_v49  ;;  %4932 = vst [vmem:[#allocation42_spill] sm:$0xff] %v3842_v6 }
  0x4c   :  { %1465 = vmatpush1.bf16.msra.mxu1 %v3287_v41  ;;  %1425 = vmatprep.subr.bf16.mxu0 %v3220_v42  ;;  %v335_v41 = vunpack.c.l.s8.bf16 %v3786_v54  ;;  %v269_v42 = vunpack.c.l.s8.bf16 %v3792_v58  ;;  %v3820_v54 = vld [vmem:[#allocation2 + $0xc0] sm:$0xff]  ;;  %v3848_v19 = vcombine.low %v331_v25, %v333_v44  ;;  %4937 = vst [vmem:[#allocation46_spill] sm:$0xff] %v3869_v23  ;;  %4938 = vst [vmem:[#allocation47_spill] sm:$0xff] %v3871_v22 }
  0x4d   :  { %1466 = vmatprep.subr.bf16.mxu1 %v3284_v45  ;;  %v265_v45 = vunpack.c.l.s8.bf16 %v3803_v30  ;;  %4926 = vst [vmem:[#allocation36_spill] sm:$0xff] %v3820_v54  ;;  %v259_v48 = vunpack.c.l.s8.bf16 %v3820_v54  ;;  %4941 = vst [vmem:[#allocation50_spill] sm:$0xff] %v3890_v2 }
  0x4e   :  { %v3826_v51 = vcombine.low %v335_v41, %v337_v37  ;;  %v3834_v39 = vcombine.high %v267_v40, %v269_v42 }
  0x4f   :  { %1426 = vmatpush1.bf16.msra.mxu0 %v3219_v55  ;;  %v3336_v55 = vcombine.high %v335_v41, %v337_v37  ;;  %v3850_v36 = vcombine.high %v263_v43, %v265_v45  ;;  %v3852_v41 = vcombine.high %v327_v18, %v329_v26  ;;  %v3854_v37 = vld [vmem:[#allocation2 + $0xa0] sm:$0xff]  ;;  %v319_v18 = vunpack.c.l.s8.bf16 %v3842_v6 }
  0x50   :  { %1467 = vmatpush1.bf16.msra.mxu1 %v3283_v59  ;;  %1427 = vmatprep.subr.bf16.mxu0 %v3216_v3  ;;  %v3836_v59 = vcombine.low %v267_v40, %v269_v42  ;;  %v3844_v3 = vld [vmem:[#allocation2 + $0x1b8] sm:$0xff]  ;;  %4934 = vst [vmem:[#allocation44_spill] sm:$0xff] %v3854_v37  ;;  %v3856_v40 = vld [vmem:[#allocation2 + $0xa8] sm:$0xff]  ;;  %v3861_v42 = vld [vmem:[%s4936_s24] sm:$0xff]  ;;  %v315_v6 = vunpack.c.l.s8.bf16 %v3869_v23 }
  0x51   :  { %1468 = vmatprep.subr.bf16.mxu1 %v3280_v10  ;;  %4933 = vst [vmem:[#allocation43_spill] sm:$0xff] %v3844_v3  ;;  %v3846_v10 = vcombine.high %v331_v25, %v333_v44  ;;  %4935 = vst [vmem:[#allocation45_spill] sm:$0xff] %v3856_v40  ;;  %v323_v25 = vunpack.c.l.s8.bf16 %v3828_v50  ;;  %v325_v44 = vunpack.c.l.s8.bf16 %v3830_v28  ;;  %v321_v26 = vunpack.c.l.s8.bf16 %v3844_v3 }
  0x52   :  { %v3886_v28 = vcombine.high %v259_v48, %v261_v4  ;;  %v251_v50 = vunpack.c.l.s8.bf16 %v3854_v37  ;;  %v253_v14 = vunpack.c.l.s8.bf16 %v3856_v40  ;;  %v3896_v7 = vcombine.high %v3861_v42, %v3861_v42 }
  0x53   :  { %1428 = vmatpush1.bf16.msra.mxu0 %v3215_v12  ;;  %v3863_v12 = vcombine.low %v263_v43, %v265_v45  ;;  %v257_v43 = vunpack.c.l.s8.bf16 %v3840_v49  ;;  %v3884_v45 = vld [vmem:[#allocation2 + $0x98] sm:$0xff]  ;;  %v3898_v3 = vcombine.low %v259_v48, %v261_v4  ;;  %v317_v49 = vunpack.c.l.s8.bf16 %v3871_v22  ;;  %v3912_v48 = vld [vmem:[#allocation2 + $0x80] sm:$0xff]  ;;  %v3914_v4 = vld [vmem:[#allocation2 + $0x88] sm:$0xff] }
  0x54   :  { %1469 = vmatpush1.bf16.msra.mxu1 %v3279_v17  ;;  %1429 = vmatprep.subr.bf16.mxu0 %v3212_v35  ;;  %v255_v17 = vunpack.c.l.s8.bf16 %v3832_v29  ;;  %v3882_v35 = vld [vmem:[#allocation2 + $0x90] sm:$0xff]  ;;  %4940 = vst [vmem:[#allocation49_spill] sm:$0xff] %v3884_v45  ;;  %v3904_v37 = vcombine.high %v3876_v15, %v3876_v15  ;;  %v3906_v40 = vcombine.high %v323_v25, %v325_v44 }
  0x55   :  { %1470 = vmatprep.subr.bf16.mxu1 %v3276_v24  ;;  %4939 = vst [vmem:[#allocation48_spill] sm:$0xff] %v3882_v35  ;;  %v3892_v24 = vld [vmem:[#allocation2 + $0x198] sm:$0xff]  ;;  %v3908_v29 = vcombine.low %v323_v25, %v325_v44  ;;  %v247_v56 = vunpack.c.l.s8.bf16 %v3882_v35  ;;  %v3918_v23 = vcombine.high %v319_v18, %v321_v26  ;;  %1447 = vmatprep.mubr.bf16.mxu0 %v3896_v7  ;;  %v4945_v35 = vunpack.c.h.s8.bf16 %v3672_v0 }
  0x56   :  { %4942 = vst [vmem:[#allocation51_spill] sm:$0xff] %v3892_v24  ;;  %4943 = vst [vmem:[#allocation52_spill] sm:$0xff] %v3904_v37  ;;  %v3916_v22 = vcombine.high %v255_v17, %v257_v43  ;;  %v3923_v25 = vcombine.low %v255_v17, %v257_v43  ;;  %v3925_v44 = vcombine.low %v319_v18, %v321_v26  ;;  %1488 = vmatprep.mubr.bf16.mxu1 %v3904_v37  ;;  %v3943_v18 = vld [vmem:[#allocation2 + $0x180] sm:$0xff]  ;;  %v3945_v26 = vld [vmem:[#allocation2 + $0x188] sm:$0xff] }
  0x57   :  { %1430 = vmatpush1.bf16.msra.mxu0 %v3211_v63  ;;  %v249_v63 = vunpack.c.l.s8.bf16 %v3884_v45  ;;  %v3927_v45 = vcombine.high %v251_v50, %v253_v14  ;;  %v243_v17 = vunpack.c.l.s8.bf16 %v3912_v48  ;;  %v245_v43 = vunpack.c.l.s8.bf16 %v3914_v4  ;;  %4946 = vst [vmem:[#allocation53_spill] sm:$0xff] %v3943_v18  ;;  %4947 = vst [vmem:[#allocation54_spill] sm:$0xff] %v3945_v26  ;;  %v3966_v37 = vld [vmem:[#allocation2 + $0x278] sm:$0xff] }
  0x58   :  { %1471 = vmatpush1.bf16.msra.mxu1 %v3275_v27  ;;  %1431 = vmatprep.subr.bf16.mxu0 %v3272_v11  ;;  %v311_v27 = vunpack.c.l.s8.bf16 %v3890_v2  ;;  %v313_v11 = vunpack.c.l.s8.bf16 %v3892_v24  ;;  %v3937_v2 = vcombine.high %v315_v6, %v317_v49  ;;  %v3939_v24 = vcombine.low %v251_v50, %v253_v14 }
  0x59   :  { %1472 = vmatprep.subr.bf16.mxu1 %v3336_v55  ;;  %v4944_v55 = vunpack.c.h.s8.bf16 %v3674_v1  ;;  %v3949_v0 = vcombine.low %v315_v6, %v317_v49  ;;  %v3951_v1 = vcombine.high %v247_v56, %v249_v63  ;;  %v238_v14 = vunpack.c.h.s8.bf16 %v3686_v9  ;;  %v3964_v6 = vld [vmem:[#allocation2 + $0x270] sm:$0xff] }
  0x5a   :  { %v3956_v50 = vcombine.high %v311_v27, %v313_v11  ;;  %v309_v49 = vunpack.c.l.s8.bf16 %v3945_v26 }
  0x5b   :  { %v3934_v54 = vcombine.high %v4945_v35, %v4944_v55  ;;  %1432 = vmatpush2.bf16.msra.mxu0 %v3824_v62  ;;  %v236_v62 = vunpack.c.h.s8.bf16 %v3684_v8  ;;  %v3958_v35 = vcombine.low %v247_v56, %v249_v63  ;;  %v232_v55 = vunpack.c.h.s8.bf16 %v3696_v16 }
  0x5c   :  { %1473 = vmatpush2.bf16.msra.mxu1 %v3826_v51  ;;  %1433 = vmatprep.subr.bf16.mxu0 %v3834_v39  ;;  %v234_v51 = vunpack.c.h.s8.bf16 %v3705_v21  ;;  %v307_v39 = vunpack.c.l.s8.bf16 %v3943_v18  ;;  %v3973_v56 = vcombine.low %v311_v27, %v313_v11  ;;  %v3979_v16 = vcombine.low %v3861_v42, %v3861_v42 }
  0x5d   :  { %1474 = vmatprep.subr.bf16.mxu1 %v3846_v10  ;;  %v3968_v8 = vcombine.high %v236_v62, %v238_v14  ;;  %v3970_v9 = vcombine.low %v236_v62, %v238_v14  ;;  %v3975_v10 = vcombine.high %v243_v17, %v245_v43  ;;  %v3985_v63 = vcombine.low %v243_v17, %v245_v43  ;;  %v3987_v62 = vld [vmem:[#allocation2 + $0x300] sm:$0xff]  ;;  %v3989_v14 = vld [vmem:[#allocation2 + $0x308] sm:$0xff] }
  0x5e   :  { %v3981_v21 = vcombine.high %v232_v55, %v234_v51  ;;  %4949 = vst [vmem:[#allocation56_spill] sm:$0xff] %v3987_v62  ;;  %4950 = vst [vmem:[#allocation57_spill] sm:$0xff] %v3989_v14  ;;  %v228_v27 = vunpack.c.h.s8.bf16 %v3722_v32  ;;  %v230_v11 = vunpack.c.h.s8.bf16 %v3724_v33  ;;  %v3998_v42 = vcombine.low %v3876_v15, %v3876_v15  ;;  %v4002_v17 = vld [vmem:[#allocation2 + $0x260] sm:$0xff] }
  0x5f   :  { %1434 = vmatpush2.bf16.msra.mxu0 %v3836_v59  ;;  %v3991_v59 = vcombine.low %v232_v55, %v234_v51  ;;  %v224_v43 = vunpack.c.h.s8.bf16 %v3734_v46  ;;  %v4005_v55 = vcombine.high %v307_v39, %v309_v49  ;;  %v4007_v51 = vld [vmem:[#allocation2 + $0x268] sm:$0xff]  ;;  %v4015_v15 = vcombine.low %v307_v39, %v309_v49 }
  0x60   :  { %4948 = vst [vmem:[#allocation55_spill] sm:$0xff] %v3981_v21  ;;  %1475 = vmatpush2.bf16.msra.mxu1 %v3848_v19  ;;  %1435 = vmatprep.subr.bf16.mxu0 %v3850_v36  ;;  %4952 = vst [vmem:[#allocation59_spill] sm:$0xff] %v3998_v42  ;;  %v367_v19 = vunpack.c.l.s8.bf16 %v3964_v6  ;;  %v369_v36 = vunpack.c.l.s8.bf16 %v3966_v37  ;;  %v4009_v32 = vcombine.high %v228_v27, %v230_v11  ;;  %v403_v26 = vunpack.c.l.s8.bf16 %v3987_v62 }
  0x61   :  { %4951 = vst [vmem:[#allocation58_spill] sm:$0xff] %v3991_v59  ;;  %1476 = vmatprep.subr.bf16.mxu1 %v3852_v41  ;;  %v4011_v33 = vcombine.low %v228_v27, %v230_v11  ;;  %v226_v41 = vunpack.c.h.s8.bf16 %v3736_v47  ;;  %v405_v18 = vunpack.c.l.s8.bf16 %v3989_v14  ;;  %v4019_v59 = vld [vmem:[#allocation2 + $0x250] sm:$0xff]  ;;  %v220_v46 = vunpack.c.h.s8.bf16 %v3748_v60  ;;  %v4025_v11 = vld [vmem:[#allocation2 + $0x258] sm:$0xff]  ;;  %v4027_v47 = vld [vmem:[#allocation2 + $0x240] sm:$0xff] }
  0x62   :  { %4953 = vst [vmem:[#allocation60_spill] sm:$0xff] %v4009_v32  ;;  %v363_v27 = vunpack.c.l.s8.bf16 %v4002_v17  ;;  %v222_v49 = vunpack.c.h.s8.bf16 %v3750_v61  ;;  %v4035_v14 = vcombine.high %v367_v19, %v369_v36  ;;  %v4037_v60 = vcombine.low %v367_v19, %v369_v36  ;;  %v4044_v32 = vld [vmem:[#allocation2 + $0x230] sm:$0xff] }
  0x63   :  { %4954 = vst [vmem:[#allocation61_spill] sm:$0xff] %v4011_v33  ;;  %1436 = vmatpush2.bf16.msra.mxu0 %v3863_v12  ;;  %v4029_v12 = vcombine.high %v224_v43, %v226_v41  ;;  %v4031_v39 = vcombine.low %v224_v43, %v226_v41  ;;  %v216_v62 = vunpack.c.h.s8.bf16 %v3756_v5  ;;  %v359_v33 = vunpack.c.l.s8.bf16 %v4019_v59  ;;  %v4046_v43 = vld [vmem:[#allocation2 + $0x238] sm:$0xff] }
  0x64   :  { %1477 = vmatpush2.bf16.msra.mxu1 %v3865_v38  ;;  %1437 = vmatprep.subr.bf16.mxu0 %v3886_v28  ;;  %v365_v38 = vunpack.c.l.s8.bf16 %v4007_v51  ;;  %v4040_v28 = vld [vmem:[#allocation2 + $0x248] sm:$0xff]  ;;  %v4048_v41 = vcombine.high %v220_v46, %v222_v49  ;;  %v4050_v61 = vcombine.low %v220_v46, %v222_v49  ;;  %v4054_v19 = vcombine.high %v403_v26, %v405_v18 }
  0x65   :  { %4955 = vst [vmem:[#allocation62_spill] sm:$0xff] %v4029_v12  ;;  %4956 = vst [vmem:[#allocation63_spill] sm:$0xff] %v4031_v39  ;;  %1478 = vmatprep.subr.bf16.mxu1 %v3906_v40  ;;  %v218_v40 = vunpack.c.h.s8.bf16 %v3760_v20  ;;  %v361_v36 = vunpack.c.l.s8.bf16 %v4025_v11  ;;  %v355_v5 = vunpack.c.l.s8.bf16 %v4027_v47  ;;  %v212_v39 = vunpack.c.h.s8.bf16 %v3768_v31 }
  0x66   :  { %4957 = vst [vmem:[#allocation64_spill] sm:$0xff] %v4048_v41  ;;  %4958 = vst [vmem:[#allocation65_spill] sm:$0xff] %v4050_v61  ;;  %v357_v41 = vunpack.c.l.s8.bf16 %v4040_v28  ;;  %v214_v20 = vunpack.c.h.s8.bf16 %v3770_v34  ;;  %v351_v61 = vunpack.c.l.s8.bf16 %v4044_v32  ;;  %v353_v31 = vunpack.c.l.s8.bf16 %v4046_v43 }
  0x67   :  { %1438 = vmatpush2.bf16.msra.mxu0 %v3898_v3  ;;  %v4062_v46 = vcombine.high %v216_v62, %v218_v40  ;;  %v4064_v49 = vcombine.low %v216_v62, %v218_v40  ;;  %v4068_v3 = vcombine.low %v403_v26, %v405_v18  ;;  %v4073_v12 = vcombine.high %v363_v27, %v365_v38  ;;  %v4089_v40 = vld [vmem:[#allocation2 + $0x228] sm:$0xff] }
  0x68   :  { %1479 = vmatpush2.bf16.msra.mxu1 %v3908_v29  ;;  %1439 = vmatprep.subr.bf16.mxu0 %v3916_v22  ;;  %v272_v29 = vunpack.c.h.s8.bf16 %v3782_v52  ;;  %v4075_v22 = vld [vmem:[#allocation2 + $0x220] sm:$0xff]  ;;  %v4077_v21 = vcombine.high %v212_v39, %v214_v20  ;;  %v4079_v62 = vcombine.low %v212_v39, %v214_v20  ;;  %v274_v34 = vunpack.c.h.s8.bf16 %v3784_v53  ;;  %v4096_v20 = vld [vmem:[#allocation2 + $0x210] sm:$0xff]  ;;  %v4098_v53 = vld [vmem:[#allocation2 + $0x218] sm:$0xff] }
  0x69   :  { %4959 = vst [vmem:[#allocation66_spill] sm:$0xff] %v4062_v46  ;;  %4960 = vst [vmem:[#allocation67_spill] sm:$0xff] %v4064_v49  ;;  %1480 = vmatprep.subr.bf16.mxu1 %v3918_v23  ;;  %v4083_v23 = vcombine.low %v363_v27, %v365_v38  ;;  %v4085_v18 = vcombine.high %v359_v33, %v361_v36  ;;  %v4087_v26 = vcombine.low %v359_v33, %v361_v36  ;;  %v4113_v36 = vld [vmem:[#allocation2 + $0x208] sm:$0xff]  ;;  %v4117_v49 = vld [vmem:[#allocation2 + $0x2f0] sm:$0xff] }
  0x6a   :  { %4961 = vst [vmem:[#allocation68_spill] sm:$0xff] %v4077_v21  ;;  %4962 = vst [vmem:[#allocation69_spill] sm:$0xff] %v4079_v62  ;;  %v268_v52 = vunpack.c.h.s8.bf16 %v3790_v57  ;;  %v4094_v39 = vcombine.high %v355_v5, %v357_v41  ;;  %v4102_v27 = vcombine.high %v272_v29, %v274_v34  ;;  %v4104_v33 = vcombine.low %v272_v29, %v274_v34  ;;  %v4119_v29 = vld [vmem:[#allocation2 + $0x2f8] sm:$0xff] }
  0x6b   :  { %1440 = vmatpush2.bf16.msra.mxu0 %v3923_v25  ;;  %v4100_v25 = vld [vmem:[#allocation2 + $0x200] sm:$0xff]  ;;  %v270_v38 = vunpack.c.h.s8.bf16 %v3792_v58  ;;  %v4108_v57 = vcombine.low %v355_v5, %v357_v41  ;;  %4967 = vst [vmem:[#allocation74_spill] sm:$0xff] %v4113_v36  ;;  %v264_v62 = vunpack.c.h.s8.bf16 %v3798_v13  ;;  %v349_v21 = vunpack.c.l.s8.bf16 %v4089_v40 }
  0x6c   :  { %1481 = vmatpush2.bf16.msra.mxu1 %v3925_v44  ;;  %1441 = vmatprep.subr.bf16.mxu0 %v3927_v45  ;;  %4963 = vst [vmem:[#allocation70_spill] sm:$0xff] %v4100_v25  ;;  %4964 = vst [vmem:[#allocation71_spill] sm:$0xff] %v4102_v27  ;;  %v4110_v44 = vcombine.high %v351_v61, %v353_v31  ;;  %v347_v45 = vunpack.c.l.s8.bf16 %v4075_v22  ;;  %v343_v41 = vunpack.c.l.s8.bf16 %v4096_v20  ;;  %v345_v5 = vunpack.c.l.s8.bf16 %v4098_v53 }
  0x6d   :  { %4965 = vst [vmem:[#allocation72_spill] sm:$0xff] %v4104_v33  ;;  %1482 = vmatprep.subr.bf16.mxu1 %v3937_v2  ;;  %v4121_v34 = vcombine.high %v268_v52, %v270_v38  ;;  %v4123_v58 = vcombine.low %v268_v52, %v270_v38  ;;  %v266_v2 = vunpack.c.h.s8.bf16 %v3803_v30  ;;  %v339_v13 = vunpack.c.l.s8.bf16 %v4100_v25  ;;  %v4970_v33 = vld [vmem:[#allocation36_spill] sm:$0xff]  ;;  %v4973_v30 = vld [vmem:[#allocation37_spill] sm:$0xff] }
  0x6e   :  { %4966 = vst [vmem:[#allocation73_spill] sm:$0xff] %v4110_v44  ;;  %v260_v27 = vunpack.c.h.s8.bf16 %v4970_v33  ;;  %v399_v46 = vunpack.c.l.s8.bf16 %v4117_v49  ;;  %v401_v33 = vunpack.c.l.s8.bf16 %v4119_v29  ;;  %v4974_v25 = vld [vmem:[#allocation40_spill] sm:$0xff]  ;;  %v4145_v44 = vcombine.high %v347_v45, %v349_v21 }
  0x6f   :  { %4968 = vst [vmem:[#allocation75_spill] sm:$0xff] %v4121_v34  ;;  %4969 = vst [vmem:[#allocation76_spill] sm:$0xff] %v4123_v58  ;;  %1442 = vmatpush2.bf16.msra.mxu0 %v3939_v24  ;;  %v341_v34 = vunpack.c.l.s8.bf16 %v4113_v36  ;;  %v4134_v52 = vcombine.high %v264_v62, %v266_v2  ;;  %v4136_v38 = vcombine.low %v264_v62, %v266_v2  ;;  %v262_v24 = vunpack.c.h.s8.bf16 %v4973_v30  ;;  %v4977_v2 = vld [vmem:[#allocation41_spill] sm:$0xff] }
  0x70   :  { %1483 = vmatpush2.bf16.msra.mxu1 %v3949_v0  ;;  %1443 = vmatprep.subr.bf16.mxu0 %v3951_v1  ;;  %v4140_v58 = vcombine.low %v351_v61, %v353_v31  ;;  %v256_v0 = vunpack.c.h.s8.bf16 %v4974_v25  ;;  %v4147_v1 = vld [vmem:[#allocation2 + $0x2e0] sm:$0xff]  ;;  %v258_v30 = vunpack.c.h.s8.bf16 %v4977_v2  ;;  %v4157_v61 = vcombine.high %v343_v41, %v345_v5  ;;  %v4978_v25 = vld [vmem:[#allocation44_spill] sm:$0xff] }
  0x71   :  { %4971 = vst [vmem:[#allocation36_spill] sm:$0xff] %v4134_v52  ;;  %4972 = vst [vmem:[#allocation77_spill] sm:$0xff] %v4136_v38  ;;  %1484 = vmatprep.subr.bf16.mxu1 %v3956_v50  ;;  %v4149_v36 = vcombine.high %v260_v27, %v262_v24  ;;  %v4151_v62 = vcombine.low %v260_v27, %v262_v24  ;;  %v4155_v50 = vcombine.low %v347_v45, %v349_v21  ;;  %v4161_v38 = vld [vmem:[#allocation2 + $0x2e8] sm:$0xff]  ;;  %v4168_v24 = vld [vmem:[#allocation2 + $0x2d0] sm:$0xff] }
  0x72   :  { %v4159_v31 = vcombine.low %v343_v41, %v345_v5  ;;  %v252_v52 = vunpack.c.h.s8.bf16 %v4978_v25  ;;  %v4166_v27 = vcombine.high %v339_v13, %v341_v34  ;;  %v4170_v2 = vcombine.high %v256_v0, %v258_v30  ;;  %v4981_v21 = vld [vmem:[#allocation45_spill] sm:$0xff]  ;;  %v4178_v41 = vld [vmem:[%s4936_s24 + $0x10] sm:$0xff] }
  0x73   :  { %4975 = vst [vmem:[#allocation37_spill] sm:$0xff] %v4149_v36  ;;  %4976 = vst [vmem:[#allocation40_spill] sm:$0xff] %v4151_v62  ;;  %1444 = vmatpush2.bf16.msra.mxu0 %v3958_v35  ;;  %v4172_v35 = vcombine.low %v256_v0, %v258_v30  ;;  %v254_v45 = vunpack.c.h.s8.bf16 %v4981_v21  ;;  %v4185_v5 = vcombine.low %v399_v46, %v401_v33  ;;  %v4987_v62 = vld [vmem:[#allocation12_spill] sm:$0xff] }
  0x74   :  { %1485 = vmatpush2.bf16.msra.mxu1 %v3973_v56  ;;  %1445 = vmatprep.subr.bf16.mxu0 %v3975_v10  ;;  %4979 = vst [vmem:[#allocation41_spill] sm:$0xff] %v4170_v2  ;;  %v4181_v56 = vcombine.low %v339_v13, %v341_v34  ;;  %v4183_v10 = vcombine.high %v399_v46, %v401_v33  ;;  %v4984_v46 = vld [vmem:[#allocation49_spill] sm:$0xff]  ;;  %v4988_v0 = vunpack.c.h.s8.bf16 %v4987_v62 }
  0x75   :  { %4980 = vst [vmem:[#allocation44_spill] sm:$0xff] %v4172_v35  ;;  %1486 = vmatprep.subr.bf16.mxu1 %v4005_v55  ;;  %v4189_v30 = vcombine.high %v252_v52, %v254_v45  ;;  %v4191_v21 = vcombine.low %v252_v52, %v254_v45  ;;  %v4983_v35 = vld [vmem:[#allocation48_spill] sm:$0xff]  ;;  %v4198_v34 = vcombine.high %v4178_v41, %v4178_v41  ;;  %v250_v13 = vunpack.c.h.s8.bf16 %v4984_v46  ;;  %v4985_v33 = vld [vmem:[#allocation13_spill] sm:$0xff]  ;;  %v4990_v55 = vld [vmem:[#allocation15_spill] sm:$0xff] }
  0x76   :  { %v248_v2 = vunpack.c.h.s8.bf16 %v4983_v35  ;;  %v4986_v25 = vunpack.c.h.s8.bf16 %v4985_v33  ;;  %v246_v52 = vunpack.c.h.s8.bf16 %v3914_v4  ;;  %v4989_v35 = vld [vmem:[#allocation14_spill] sm:$0xff]  ;;  %v364_v33 = vunpack.c.h.s8.bf16 %v4002_v17 }
  0x77   :  { %4982 = vst [vmem:[#allocation45_spill] sm:$0xff] %v4191_v21  ;;  %1446 = vmatpush2.bf16.msra.mxu0 %v3985_v63  ;;  %v244_v63 = vunpack.c.h.s8.bf16 %v3912_v48  ;;  %v300_v45 = vunpack.c.h.s8.bf16 %v4989_v35  ;;  %v302_v21 = vunpack.c.h.s8.bf16 %v4990_v55  ;;  %v4992_v55 = vld [vmem:[#allocation18_spill] sm:$0xff]  ;;  %v4994_v35 = vld [vmem:[#allocation21_spill] sm:$0xff] }
  0x78   :  { %v4205_v36 = vcombine.high %v4988_v0, %v4986_v25  ;;  %1487 = vmatpush2.bf16.msra.mxu1 %v4015_v15  ;;  %1497 = vmatprep.subr.bf16.mxu0 %v4035_v14  ;;  %v4214_v46 = vcombine.high %v248_v2, %v250_v13  ;;  %v4216_v62 = vcombine.low %v248_v2, %v250_v13  ;;  %v368_v25 = vunpack.c.h.s8.bf16 %v3964_v6  ;;  %v4991_v2 = vld [vmem:[#allocation17_spill] sm:$0xff] }
  0x79   :  { %1552 = vmatprep.subr.bf16.mxu1 %v4054_v19  ;;  %v370_v15 = vunpack.c.h.s8.bf16 %v3966_v37  ;;  %v4221_v14 = vcombine.high %v244_v63, %v246_v52  ;;  %v4223_v48 = vcombine.low %v244_v63, %v246_v52  ;;  %v4225_v4 = vcombine.high %v300_v45, %v302_v21  ;;  %v4993_v63 = vld [vmem:[#allocation20_spill] sm:$0xff] }
  0x7a   :  { %1448 = vmatmul.mubr.bf16.vlgmr.msra.gmra.mxu0 %v3979_v16  ;;  %v4227_v0 = vcombine.low %v300_v45, %v302_v21  ;;  %v296_v6 = vunpack.c.h.s8.bf16 %v4991_v2  ;;  %v298_v37 = vunpack.c.h.s8.bf16 %v4992_v55  ;;  %v366_v21 = vunpack.c.h.s8.bf16 %v4007_v51 }
  0x7b   :  { %1489 = vmatmul.mubr.bf16.vlgmr.msra.gmra.mxu1 %v3998_v42  ;;  %1498 = vmatpush1.bf16.msra.mxu0 %v4037_v60  ;;  %v4231_v19 = vcombine.high %v368_v25, %v370_v15  ;;  %v4235_v13 = vcombine.low %v368_v25, %v370_v15  ;;  %v292_v52 = vunpack.c.h.s8.bf16 %v4993_v63  ;;  %v294_v60 = vunpack.c.h.s8.bf16 %v4994_v35 }
  0x7c   :  { %1553 = vmatpush1.bf16.msra.mxu1 %v4068_v3  ;;  %1499 = vmatprep.subr.bf16.mxu0 %v4073_v12  ;;  %v4898_v45 = vmov 0   ;;  %v4245_v2 = vcombine.high %v296_v6, %v298_v37  ;;  %v4247_v25 = vcombine.low %v296_v6, %v298_v37  ;;  %v360_v3 = vunpack.c.h.s8.bf16 %v4019_v59  ;;  %v4998_v37 = vld [vmem:[#allocation23_spill] sm:$0xff] }
  0x7d   :  { %1570 = vmatprep.mubr.bf16.mxu1 %v4898_v45  ;;  %1579 = vmatprep.subr.bf16.mxu1 %v3934_v54  ;;  %v362_v12 = vunpack.c.h.s8.bf16 %v4025_v11  ;;  %v4252_v17 = vcombine.high %v364_v33, %v366_v21  ;;  %v4254_v51 = vcombine.high %v292_v52, %v294_v60  ;;  %v4256_v15 = vcombine.low %v364_v33, %v366_v21  ;;  %v4264_v54 = vld [vmem:[%s4936_s24 + $0x18] ss:$0 sps:$4 sm:$0xff]   ;;  %v4997_v11 = vld [vmem:[#allocation22_spill] sm:$0xff] }
  0x7e   :  { %1529 = vmatprep.mubr.bf16.mxu0 %v4198_v34  ;;  %v4258_v55 = vcombine.low %v292_v52, %v294_v60  ;;  %4996 = vst [vmem:[#allocation49_spill] sm:$0xff] %v4264_v54  ;;  %v288_v6 = vunpack.c.h.s8.bf16 %v4997_v11  ;;  %v290_v63 = vunpack.c.h.s8.bf16 %v4998_v37  ;;  %v356_v33 = vunpack.c.h.s8.bf16 %v4027_v47  ;;  %v5000_v60 = vld [vmem:[#allocation25_spill] sm:$0xff] }
  0x7f   :  { %4995 = vst [vmem:[#allocation48_spill] sm:$0xff] %v4256_v15  ;;  %1500 = vmatpush1.bf16.msra.mxu0 %v4083_v23  ;;  %v4266_v59 = vcombine.high %v360_v3, %v362_v12  ;;  %v4270_v35 = vcombine.low %v360_v3, %v362_v12  ;;  %v358_v21 = vunpack.c.h.s8.bf16 %v4040_v28  ;;  %v4999_v23 = vld [vmem:[#allocation24_spill] sm:$0xff]  ;;  %v286_v45 = vunpack.c.h.s8.bf16 %v5000_v60 }
  0x80   :  { %1501 = vmatprep.subr.bf16.mxu0 %v4085_v18  ;;  %v284_v52 = vunpack.c.h.s8.bf16 %v4999_v23  ;;  %v4277_v42 = vcombine.high %v288_v6, %v290_v63  ;;  %v4279_v15 = vcombine.low %v288_v6, %v290_v63  ;;  %v352_v11 = vunpack.c.h.s8.bf16 %v4044_v32  ;;  %v5001_v6 = vld [vmem:[#allocation26_spill] sm:$0xff]  ;;  %v5002_v32 = vld [vmem:[#allocation27_spill] sm:$0xff]  ;;  %v5003_v60 = vld [vmem:[#allocation16_spill] sm:$0xff] }
  0x81   :  { %v354_v37 = vunpack.c.h.s8.bf16 %v4046_v43  ;;  %v4283_v3 = vcombine.high %v356_v33, %v358_v21  ;;  %v4287_v18 = vcombine.low %v356_v33, %v358_v21  ;;  %v280_v63 = vunpack.c.h.s8.bf16 %v5001_v6  ;;  %v5004_v21 = vld [vmem:[#allocation28_spill] sm:$0xff] }
  0x82   :  { %v4285_v12 = vcombine.high %v284_v52, %v286_v45  ;;  %v4289_v47 = vcombine.low %v284_v52, %v286_v45  ;;  %v282_v23 = vunpack.c.h.s8.bf16 %v5002_v32  ;;  %v348_v45 = vunpack.c.h.s8.bf16 %v4075_v22 }
  0x83   :  { %3407 = vmatmul.mubr.msk.bf16.vlgmr.msra.gmra.mxu1 %vm1411_vm0, %v4264_v54  ;;  %1502 = vmatpush1.bf16.msra.mxu0 %v4087_v26  ;;  %v4294_v28 = vcombine.high %v352_v11, %v354_v37  ;;  %v4298_v43 = vcombine.low %v352_v11, %v354_v37  ;;  %v350_v33 = vunpack.c.h.s8.bf16 %v4089_v40  ;;  %v276_v52 = vunpack.c.h.s8.bf16 %v5004_v21  ;;  %v5005_v54 = vld [vmem:[#allocation29_spill] sm:$0xff] }
  0x84   :  { %1580 = vmatpush1.bf16.msra.mxu1 %v5003_v60  ;;  %1503 = vmatprep.subr.bf16.mxu0 %v4094_v39  ;;  %v278_v26 = vunpack.c.h.s8.bf16 %v5005_v54  ;;  %v4308_v6 = vcombine.high %v280_v63, %v282_v23  ;;  %v4310_v11 = vcombine.low %v280_v63, %v282_v23  ;;  %v344_v37 = vunpack.c.h.s8.bf16 %v4096_v20  ;;  %v5011_v63 = vld [vmem:[#allocation31_spill] sm:$0xff]  ;;  %v5013_v20 = vld [vmem:[#allocation73_spill] sm:$0xff] }
  0x85   :  { %1581 = vmatprep.subr.bf16.mxu1 %v3968_v8  ;;  %1611 = vmatprep.mubr.bf16.mxu1 %v3896_v7  ;;  %v346_v39 = vunpack.c.h.s8.bf16 %v4098_v53  ;;  %v4314_v32 = vcombine.high %v348_v45, %v350_v33  ;;  %v4318_v40 = vcombine.low %v348_v45, %v350_v33  ;;  %v5010_v7 = vld [vmem:[#allocation30_spill] sm:$0xff]  ;;  %v338_v23 = vunpack.c.h.s8.bf16 %v5011_v63 }
  0x86   :  { %v4316_v22 = vcombine.high %v276_v52, %v278_v26  ;;  %v4320_v60 = vcombine.low %v276_v52, %v278_v26  ;;  %v336_v54 = vunpack.c.h.s8.bf16 %v5010_v7  ;;  %v5014_v53 = vld [vmem:[#allocation70_spill] sm:$0xff]  ;;  %v5016_v52 = vld [vmem:[#allocation32_spill] sm:$0xff] }
  0x87   :  { %5006 = vst [vmem:[#allocation13_spill] sm:$0xff] %v4314_v32  ;;  %5007 = vst [vmem:[#allocation12_spill] sm:$0xff] %v4318_v40  ;;  %1504 = vmatpush1.bf16.msra.mxu0 %v4108_v57  ;;  %v4323_v8 = vcombine.high %v344_v37, %v346_v39  ;;  %v4327_v21 = vcombine.low %v344_v37, %v346_v39  ;;  %v340_v32 = vunpack.c.h.s8.bf16 %v5014_v53  ;;  %v5015_v45 = vld [vmem:[#allocation74_spill] sm:$0xff]  ;;  %v332_v26 = vunpack.c.h.s8.bf16 %v5016_v52  ;;  %v5017_v40 = vld [vmem:[#allocation33_spill] sm:$0xff] }
  0x88   :  { %5008 = vst [vmem:[#allocation14_spill] sm:$0xff] %v4320_v60  ;;  %1582 = vmatpush1.bf16.msra.mxu1 %v3970_v9  ;;  %1505 = vmatprep.subr.bf16.mxu0 %v5013_v20  ;;  %v342_v33 = vunpack.c.h.s8.bf16 %v5015_v45  ;;  %v334_v57 = vunpack.c.h.s8.bf16 %v5017_v40  ;;  %v5018_v60 = vld [vmem:[#allocation55_spill] sm:$0xff]  ;;  %v4338_v7 = vcombine.low %v336_v54, %v338_v23  ;;  %v400_v37 = vunpack.c.h.s8.bf16 %v4117_v49  ;;  %v5029_v49 = vld [vmem:[#allocation58_spill] sm:$0xff] }
  0x89   :  { %5009 = vst [vmem:[#allocation15_spill] sm:$0xff] %v4323_v8  ;;  %5012 = vst [vmem:[#allocation17_spill] sm:$0xff] %v4327_v21  ;;  %1583 = vmatprep.subr.bf16.mxu1 %v5018_v60  ;;  %v4336_v8 = vcombine.high %v336_v54, %v338_v23  ;;  %v402_v9 = vunpack.c.h.s8.bf16 %v4119_v29  ;;  %v5026_v60 = vld [vmem:[#allocation34_spill] sm:$0xff]  ;;  %v5027_v54 = vld [vmem:[#allocation35_spill] sm:$0xff] }
  0x8a   :  { %5020 = vst [vmem:[#allocation20_spill] sm:$0xff] %v4338_v7  ;;  %v4342_v39 = vcombine.high %v340_v32, %v342_v33  ;;  %v4344_v63 = vcombine.high %v332_v26, %v334_v57  ;;  %v4346_v20 = vcombine.low %v340_v32, %v342_v33  ;;  %v4348_v53 = vcombine.low %v332_v26, %v334_v57  ;;  %v4359_v29 = vld [vmem:[#allocation2 + $0x2d8] sm:$0xff]  ;;  %v5030_v26 = vld [vmem:[#allocation38_spill] sm:$0xff]  ;;  %v5031_v57 = vld [vmem:[#allocation39_spill] sm:$0xff] }
  0x8b   :  { %5019 = vst [vmem:[#allocation18_spill] sm:$0xff] %v4336_v8  ;;  %1506 = vmatpush1.bf16.msra.mxu0 %v4140_v58  ;;  %v4351_v40 = vcombine.high %v400_v37, %v402_v9  ;;  %v328_v45 = vunpack.c.h.s8.bf16 %v5026_v60  ;;  %v330_v23 = vunpack.c.h.s8.bf16 %v5027_v54  ;;  %v4355_v52 = vcombine.low %v400_v37, %v402_v9  ;;  %v5068_v8 = vld [vmem:[#allocation65_spill] sm:$0xff] }
  0x8c   :  { %5021 = vst [vmem:[#allocation21_spill] sm:$0xff] %v4342_v39  ;;  %5022 = vst [vmem:[#allocation22_spill] sm:$0xff] %v4344_v63  ;;  %1584 = vmatpush1.bf16.msra.mxu1 %v5029_v49  ;;  %1507 = vmatprep.subr.bf16.mxu0 %v4145_v44  ;;  %v396_v32 = vunpack.c.h.s8.bf16 %v4147_v1  ;;  %v398_v33 = vunpack.c.h.s8.bf16 %v4161_v38  ;;  %v324_v58 = vunpack.c.h.s8.bf16 %v5030_v26  ;;  %v392_v9 = vunpack.c.h.s8.bf16 %v4168_v24  ;;  %v4381_v26 = vld [vmem:[#allocation2 + $0x2c0] sm:$0xff] }
  0x8d   :  { %5023 = vst [vmem:[#allocation23_spill] sm:$0xff] %v4346_v20  ;;  %5024 = vst [vmem:[#allocation24_spill] sm:$0xff] %v4348_v53  ;;  %v5032_v20 = vld [vmem:[#allocation60_spill] sm:$0xff]  ;;  %v4366_v60 = vcombine.high %v328_v45, %v330_v23  ;;  %v4368_v37 = vcombine.low %v328_v45, %v330_v23  ;;  %v394_v44 = vunpack.c.h.s8.bf16 %v4359_v29  ;;  %v5040_v23 = vld [vmem:[#allocation42_spill] sm:$0xff] }
  0x8e   :  { %5025 = vst [vmem:[#allocation25_spill] sm:$0xff] %v4351_v40  ;;  %5028 = vst [vmem:[#allocation26_spill] sm:$0xff] %v4355_v52  ;;  %v326_v40 = vunpack.c.h.s8.bf16 %v5031_v57  ;;  %1585 = vmatprep.subr.bf16.mxu1 %v5032_v20  ;;  %v4372_v54 = vcombine.high %v396_v32, %v398_v33  ;;  %v4376_v52 = vcombine.low %v396_v32, %v398_v33  ;;  %v4383_v20 = vld [vmem:[#allocation2 + $0x2c8] sm:$0xff]  ;;  %v320_v57 = vunpack.c.h.s8.bf16 %v5040_v23  ;;  %v4395_v32 = vld [vmem:[#allocation2 + $0x2b8] sm:$0xff] }
  0x8f   :  { %5033 = vst [vmem:[#allocation27_spill] sm:$0xff] %v4366_v60  ;;  %5034 = vst [vmem:[#allocation16_spill] sm:$0xff] %v4368_v37  ;;  %1508 = vmatpush1.bf16.msra.mxu0 %v4155_v50  ;;  %v4385_v45 = vcombine.high %v392_v9, %v394_v44  ;;  %v5041_v37 = vld [vmem:[#allocation43_spill] sm:$0xff]  ;;  %v4389_v39 = vcombine.low %v392_v9, %v394_v44  ;;  %v388_v50 = vunpack.c.h.s8.bf16 %v4381_v26  ;;  %v390_v33 = vunpack.c.h.s8.bf16 %v4383_v20 }
  0x90   :  { %5035 = vst [vmem:[#allocation28_spill] sm:$0xff] %v4372_v54  ;;  %v4374_v49 = vcombine.high %v324_v58, %v326_v40  ;;  %5037 = vst [vmem:[#allocation30_spill] sm:$0xff] %v4376_v52  ;;  %v4378_v53 = vcombine.low %v324_v58, %v326_v40  ;;  %v322_v60 = vunpack.c.h.s8.bf16 %v5041_v37  ;;  %v5043_v54 = vld [vmem:[#allocation61_spill] sm:$0xff]  ;;  %1509 = vmatprep.subr.bf16.mxu0 %v4157_v61  ;;  %v4393_v40 = vld [vmem:[#allocation2 + $0x2b0] sm:$0xff]  ;;  %v386_v44 = vunpack.c.h.s8.bf16 %v4395_v32 }
  0x91   :  { %5039 = vst [vmem:[#allocation73_spill] sm:$0xff] %v4385_v45  ;;  %5042 = vst [vmem:[#allocation70_spill] sm:$0xff] %v4389_v39  ;;  %1586 = vmatpush1.bf16.msra.mxu1 %v5043_v54  ;;  %v5044_v58 = vld [vmem:[#allocation46_spill] sm:$0xff]  ;;  %v5045_v52 = vld [vmem:[#allocation47_spill] sm:$0xff]  ;;  %v384_v61 = vunpack.c.h.s8.bf16 %v4393_v40  ;;  %v4408_v54 = vcombine.high %v388_v50, %v390_v33 }
  0x92   :  { %5036 = vst [vmem:[#allocation29_spill] sm:$0xff] %v4374_v49  ;;  %5038 = vst [vmem:[#allocation31_spill] sm:$0xff] %v4378_v53  ;;  %v316_v45 = vunpack.c.h.s8.bf16 %v5044_v58  ;;  %v318_v23 = vunpack.c.h.s8.bf16 %v5045_v52  ;;  %v5046_v53 = vld [vmem:[#allocation62_spill] sm:$0xff]  ;;  %v4402_v37 = vcombine.high %v320_v57, %v322_v60  ;;  %v4404_v9 = vcombine.low %v320_v57, %v322_v60 }
  0x93   :  { %1587 = vmatprep.subr.bf16.mxu1 %v5046_v53  ;;  %5049 = vst [vmem:[#allocation33_spill] sm:$0xff] %v4408_v54  ;;  %v4412_v49 = vcombine.low %v388_v50, %v390_v33  ;;  %1510 = vmatpush1.bf16.msra.mxu0 %v4159_v31  ;;  %v4417_v52 = vld [vmem:[#allocation2 + $0x2a0] sm:$0xff]  ;;  %v4419_v53 = vld [vmem:[#allocation2 + $0x2a8] sm:$0xff]  ;;  %v4421_v60 = vcombine.high %v384_v61, %v386_v44  ;;  %v4431_v50 = vld [vmem:[#allocation2 + $0x298] sm:$0xff] }
  0x94   :  { %5047 = vst [vmem:[#allocation74_spill] sm:$0xff] %v4402_v37  ;;  %5048 = vst [vmem:[#allocation32_spill] sm:$0xff] %v4404_v9  ;;  %v4410_v39 = vcombine.high %v316_v45, %v318_v23  ;;  %v4414_v63 = vcombine.low %v316_v45, %v318_v23  ;;  %v5054_v57 = vld [vmem:[#allocation50_spill] sm:$0xff]  ;;  %v5055_v9 = vld [vmem:[#allocation51_spill] sm:$0xff]  ;;  %v4425_v21 = vcombine.low %v384_v61, %v386_v44  ;;  %1511 = vmatprep.subr.bf16.mxu0 %v4166_v27 }
  0x95   :  { %5051 = vst [vmem:[#allocation34_spill] sm:$0xff] %v4412_v49  ;;  %5053 = vst [vmem:[#allocation58_spill] sm:$0xff] %v4421_v60  ;;  %v312_v58 = vunpack.c.h.s8.bf16 %v5054_v57  ;;  %v314_v37 = vunpack.c.h.s8.bf16 %v5055_v9  ;;  %v5057_v54 = vld [vmem:[#allocation63_spill] sm:$0xff]  ;;  %v4429_v45 = vld [vmem:[#allocation2 + $0x290] sm:$0xff]  ;;  %v380_v31 = vunpack.c.h.s8.bf16 %v4417_v52  ;;  %v382_v33 = vunpack.c.h.s8.bf16 %v4419_v53 }
  0x96   :  { %5050 = vst [vmem:[#allocation55_spill] sm:$0xff] %v4410_v39  ;;  %5052 = vst [vmem:[#allocation35_spill] sm:$0xff] %v4414_v63  ;;  %1588 = vmatpush1.bf16.msra.mxu1 %v5057_v54  ;;  %v5058_v23 = vld [vmem:[#allocation53_spill] sm:$0xff]  ;;  %v5059_v49 = vld [vmem:[#allocation54_spill] sm:$0xff]  ;;  %v376_v27 = vunpack.c.h.s8.bf16 %v4429_v45  ;;  %v378_v44 = vunpack.c.h.s8.bf16 %v4431_v50 }
  0x97   :  { %5056 = vst [vmem:[#allocation38_spill] sm:$0xff] %v4425_v21  ;;  %v308_v60 = vunpack.c.h.s8.bf16 %v5058_v23  ;;  %v310_v57 = vunpack.c.h.s8.bf16 %v5059_v49  ;;  %v5060_v63 = vld [vmem:[#allocation64_spill] sm:$0xff]  ;;  %v4438_v9 = vcombine.high %v312_v58, %v314_v37  ;;  %v4440_v61 = vcombine.low %v312_v58, %v314_v37  ;;  %1512 = vmatpush1.bf16.msra.mxu0 %v4181_v56  ;;  %v4453_v49 = vld [vmem:[#allocation2 + $0x280] sm:$0xff] }
  0x98   :  { %1589 = vmatprep.subr.bf16.mxu1 %v5060_v63  ;;  %v4444_v54 = vcombine.high %v380_v31, %v382_v33  ;;  %v4448_v39 = vcombine.low %v380_v31, %v382_v33  ;;  %v4455_v63 = vld [vmem:[#allocation2 + $0x288] sm:$0xff]  ;;  %v4457_v37 = vcombine.high %v376_v27, %v378_v44  ;;  %v4459_v58 = vcombine.low %v376_v27, %v378_v44  ;;  %v5066_v23 = vld [vmem:[#allocation56_spill] sm:$0xff]  ;;  %v5071_v44 = vld [vmem:[#allocation66_spill] sm:$0xff] }
  0x99   :  { %5061 = vst [vmem:[#allocation39_spill] sm:$0xff] %v4438_v9  ;;  %5062 = vst [vmem:[#allocation60_spill] sm:$0xff] %v4440_v61  ;;  %v4446_v21 = vcombine.high %v308_v60, %v310_v57  ;;  %v4450_v7 = vcombine.low %v308_v60, %v310_v57  ;;  %v404_v61 = vunpack.c.h.s8.bf16 %v5066_v23  ;;  %v5067_v9 = vld [vmem:[#allocation57_spill] sm:$0xff]  ;;  %1513 = vmatprep.subr.bf16.mxu0 %v4183_v10  ;;  %v5069_v60 = vunpack.c.l.s8.bf16 %v4161_v38 }
  0x9a   :  { %5063 = vst [vmem:[#allocation42_spill] sm:$0xff] %v4444_v54  ;;  %5064 = vst [vmem:[#allocation43_spill] sm:$0xff] %v4457_v37  ;;  %v406_v54 = vunpack.c.h.s8.bf16 %v5067_v9  ;;  %1590 = vmatpush1.bf16.msra.mxu1 %v5068_v8  ;;  %v5070_v56 = vunpack.c.l.s8.bf16 %v4147_v1  ;;  %v393_v33 = vunpack.c.l.s8.bf16 %v4359_v29  ;;  %v372_v57 = vunpack.c.h.s8.bf16 %v4453_v49  ;;  %v5078_v38 = vld [vmem:[#allocation69_spill] sm:$0xff] }
  0x9b   :  { %5065 = vst [vmem:[#allocation61_spill] sm:$0xff] %v4459_v58  ;;  %v374_v27 = vunpack.c.h.s8.bf16 %v4455_v63  ;;  %1591 = vmatprep.subr.bf16.mxu1 %v5071_v44  ;;  %1514 = vmatpush2.bf16.msra.mxu0 %v4185_v5  ;;  %v5074_v58 = vld [vmem:[#allocation67_spill] sm:$0xff]  ;;  %v5075_v44 = vunpack.c.l.s8.bf16 %v4168_v24  ;;  %v381_v24 = vunpack.c.l.s8.bf16 %v4419_v53  ;;  %v371_v53 = vunpack.c.l.s8.bf16 %v4453_v49 }
  0x9c   :  { %v3396_v31 = vcombine.high %v5070_v56, %v5069_v60  ;;  %v4473_v23 = vcombine.high %v404_v61, %v406_v54  ;;  %v4475_v9 = vcombine.low %v404_v61, %v406_v54  ;;  %v5073_v29 = vmov %v5070_v56 }
  0x9d   :  { %v4477_v8 = vcombine.high %v372_v57, %v374_v27  ;;  %v4479_v10 = vcombine.low %v372_v57, %v374_v27  ;;  %v3395_v56 = vcombine.low %v5073_v29, %v5069_v60  ;;  %v3392_v37 = vcombine.high %v5075_v44, %v393_v33  ;;  %v5079_v27 = vld [vmem:[#allocation71_spill] sm:$0xff]  ;;  %v5080_v60 = vld [vmem:[#allocation72_spill] sm:$0xff] }
  0x9e   :  { %1592 = vmatpush1.bf16.msra.mxu1 %v5074_v58  ;;  %1515 = vmatprep.subr.bf16.mxu0 %v3396_v31  ;;  %v387_v61 = vunpack.c.l.s8.bf16 %v4381_v26  ;;  %v389_v54 = vunpack.c.l.s8.bf16 %v4383_v20  ;;  %v5077_v5 = vmov %v5075_v44  ;;  %v383_v58 = vunpack.c.l.s8.bf16 %v4393_v40  ;;  %v5082_v29 = vld [vmem:[#allocation76_spill] sm:$0xff] }
  0x9f   :  { %5072 = vst [vmem:[#allocation46_spill] sm:$0xff] %v4477_v8  ;;  %v5076_v8 = vld [vmem:[#allocation68_spill] sm:$0xff]  ;;  %1516 = vmatpush2.bf16.msra.mxu0 %v3395_v56  ;;  %v3391_v57 = vcombine.low %v5077_v5, %v393_v33  ;;  %v385_v31 = vunpack.c.l.s8.bf16 %v4395_v32  ;;  %v5081_v33 = vld [vmem:[#allocation75_spill] sm:$0xff]  ;;  %v375_v32 = vunpack.c.l.s8.bf16 %v4429_v45  ;;  %v377_v56 = vunpack.c.l.s8.bf16 %v4431_v50  ;;  %v5087_v50 = vld [vmem:[#allocation41_spill] sm:$0xff] }
  0xa0   :  { %1593 = vmatprep.subr.bf16.mxu1 %v5076_v8  ;;  %1517 = vmatprep.subr.bf16.mxu0 %v3392_v37  ;;  %v3388_v1 = vcombine.high %v387_v61, %v389_v54  ;;  %v3387_v26 = vcombine.low %v387_v61, %v389_v54  ;;  %v379_v8 = vunpack.c.l.s8.bf16 %v4417_v52  ;;  %v5083_v44 = vld [vmem:[#allocation36_spill] sm:$0xff]  ;;  %v5084_v54 = vld [vmem:[#allocation77_spill] sm:$0xff]  ;;  %v373_v5 = vunpack.c.l.s8.bf16 %v4455_v63 }
  0xa1   :  { %v3384_v20 = vcombine.high %v383_v58, %v385_v31  ;;  %v3383_v37 = vcombine.low %v383_v58, %v385_v31  ;;  %v3376_v52 = vcombine.high %v375_v32, %v377_v56  ;;  %v5088_v31 = vld [vmem:[#allocation44_spill] sm:$0xff]  ;;  %v4516_v49 = vcombine.low %v4178_v41, %v4178_v41  ;;  %v5089_v63 = vld [vmem:[#allocation45_spill] sm:$0xff] }
  0xa2   :  { %1594 = vmatpush1.bf16.msra.mxu1 %v5078_v38  ;;  %v3380_v40 = vcombine.high %v379_v8, %v381_v24  ;;  %v3379_v61 = vcombine.low %v379_v8, %v381_v24  ;;  %v3375_v38 = vcombine.low %v375_v32, %v377_v56  ;;  %v3372_v45 = vcombine.high %v371_v53, %v373_v5  ;;  %v5095_v41 = vld [vmem:[#allocation12_spill] sm:$0xff]  ;;  %v1816_v8 = vld [vmem:[#allocation4 + $0x68] sm:$0xff] }
  0xa3   :  { %1595 = vmatprep.subr.bf16.mxu1 %v5079_v27  ;;  %1518 = vmatpush2.bf16.msra.mxu0 %v3391_v57  ;;  %v5085_v57 = vld [vmem:[#allocation37_spill] sm:$0xff]  ;;  %v3371_v58 = vcombine.low %v371_v53, %v373_v5  ;;  %v5090_v27 = vld [vmem:[#allocation19_spill] sm:$0xff]  ;;  %v1896_v24 = vunpack.c.h.s8.bf16 %v1816_v8 }
  0xa4   :  { %1519 = vmatprep.subr.bf16.mxu0 %v3388_v1  ;;  %v5086_v1 = vld [vmem:[#allocation40_spill] sm:$0xff]  ;;  %v5130_v56 = vld [vmem:[#allocation49_spill] sm:$0xff] }
  0xa5   :  { %v1808_v53 = vld [vmem:[#allocation4 + $0x28] sm:$0xff] }
  0xa6   :  { %1596 = vmatpush2.bf16.msra.mxu1 %v5080_v60  ;;  %v5123_v60 = vld [vmem:[#allocation38_spill] sm:$0xff] }
  0xa7   :  { %1597 = vmatprep.subr.bf16.mxu1 %v5081_v33  ;;  %1520 = vmatpush2.bf16.msra.mxu0 %v3387_v26  ;;  %v5091_v26 = vld [vmem:[#allocation52_spill] sm:$0xff]  ;;  %v5125_v33 = vld [vmem:[#allocation43_spill] sm:$0xff]  ;;  %v5129_v32 = vld [vmem:[#allocation46_spill] sm:$0xff] }
  0xa8   :  { %1521 = vmatprep.subr.bf16.mxu0 %v3384_v20  ;;  %v5124_v20 = vld [vmem:[#allocation42_spill] sm:$0xff] }
  0xaa   :  { %1598 = vmatpush2.bf16.msra.mxu1 %v5082_v29  ;;  %v5127_v29 = vmov 0  }
  0xab   :  { %1599 = vmatprep.subr.bf16.mxu1 %v5083_v44  ;;  %1522 = vmatpush2.bf16.msra.mxu0 %v3383_v37  ;;  %v5126_v37 = vld [vmem:[#allocation59_spill] sm:$0xff] }
  0xac   :  { %1523 = vmatprep.subr.bf16.mxu0 %v3380_v40  ;;  %v5128_v40 = vld [vmem:[#allocation61_spill] sm:$0xff] }
  0xae   :  { %1600 = vmatpush2.bf16.msra.mxu1 %v5084_v54 }
  0xaf   :  { %1601 = vmatprep.subr.bf16.mxu1 %v5085_v57  ;;  %1524 = vmatpush2.bf16.msra.mxu0 %v3379_v61  ;;  %v1811_v61 = vld [vmem:[#allocation4 + $0x40] sm:$0xff] }
  0xb0   :  { %1525 = vmatprep.subr.bf16.mxu0 %v3376_v52  ;;  %v1887_v54 = vunpack.c.h.s8.bf16 %v1811_v61  ;;  %v1883_v5 = vunpack.c.l.s8.bf16 %v1811_v61  ;;  %v1807_v57 = vld [vmem:[#allocation4 + $0x20] sm:$0xff] }
  0xb2   :  { %1602 = vmatpush2.bf16.msra.mxu1 %v5086_v1  ;;  %v1848_v1 = vld [vmem:[#allocation4 + $0x168] sm:$0xff] }
  0xb3   :  { %1603 = vmatprep.subr.bf16.mxu1 %v5087_v50  ;;  %1526 = vmatpush2.bf16.msra.mxu0 %v3375_v38  ;;  %v1879_v38 = vunpack.c.h.s8.bf16 %v1807_v57  ;;  %v1876_v50 = vunpack.c.l.s8.bf16 %v1808_v53 }
  0xb4   :  { %1527 = vmatprep.subr.bf16.mxu0 %v3372_v45  ;;  %v1847_v45 = vld [vmem:[#allocation4 + $0x160] sm:$0xff] }
  0xb6   :  { %1604 = vmatpush2.bf16.msra.mxu1 %v5088_v31  ;;  %v1959_v31 = vunpack.c.h.s8.bf16 %v1847_v45 }
  0xb7   :  { %1605 = vmatprep.subr.bf16.mxu1 %v4189_v30  ;;  %1528 = vmatpush2.bf16.msra.mxu0 %v3371_v58  ;;  %v5096_v30 = vld [vmem:[#allocation18_spill] sm:$0xff]  ;;  %v1960_v58 = vunpack.c.h.s8.bf16 %v1848_v1 }
  0xb8   :  { %1620 = vmatprep.subr.bf16.mxu0 %v4205_v36  ;;  %v5092_v36 = vld [vmem:[#allocation48_spill] sm:$0xff] }
  0xba   :  { %1606 = vmatpush2.bf16.msra.mxu1 %v5089_v63  ;;  %1530 = vmatmul.mubr.bf16.vlgmr.msra.gmra.mxu0 %v4516_v49  ;;  %v1875_v63 = vunpack.c.l.s8.bf16 %v1807_v57 }
  0xbb   :  { %1607 = vmatprep.subr.bf16.mxu1 %v4214_v46  ;;  %1621 = vmatpush1.bf16.msra.mxu0 %v5090_v27  ;;  %v5098_v46 = vld [vmem:[#allocation20_spill] sm:$0xff]  ;;  %v1956_v27 = vunpack.c.l.s8.bf16 %v1848_v1 }
  0xbc   :  { %1652 = vmatprep.mubr.bf16.mxu0 %v5091_v26  ;;  %1622 = vmatprep.subr.bf16.mxu0 %v4225_v4  ;;  %v5102_v4 = vld [vmem:[#allocation24_spill] sm:$0xff]  ;;  %v1955_v26 = vunpack.c.l.s8.bf16 %v1847_v45  ;;  %v4598_v45 = vld [vmem:[#allocation4 + $0x78] sm:$0xff] }
  0xbe   :  { %1608 = vmatpush2.bf16.msra.mxu1 %v4216_v62  ;;  %v5099_v62 = vld [vmem:[#allocation17_spill] sm:$0xff] }
  0xbf   :  { %1609 = vmatprep.subr.bf16.mxu1 %v4221_v14  ;;  %1623 = vmatpush1.bf16.msra.mxu0 %v4227_v0  ;;  %v5100_v14 = vld [vmem:[#allocation22_spill] sm:$0xff]  ;;  %v5103_v0 = vld [vmem:[#allocation23_spill] sm:$0xff] }
  0xc0   :  { %1624 = vmatprep.subr.bf16.mxu0 %v4245_v2  ;;  %v5106_v2 = vld [vmem:[#allocation16_spill] sm:$0xff] }
  0xc2   :  { %1610 = vmatpush2.bf16.msra.mxu1 %v4223_v48  ;;  %v5101_v48 = vld [vmem:[#allocation21_spill] sm:$0xff] }
  0xc3   :  { %1661 = vmatprep.subr.bf16.mxu1 %v4231_v19  ;;  %1625 = vmatpush1.bf16.msra.mxu0 %v4247_v25  ;;  %v5104_v19 = vld [vmem:[#allocation27_spill] sm:$0xff]  ;;  %v5107_v25 = vld [vmem:[#allocation26_spill] sm:$0xff] }
  0xc4   :  { %1626 = vmatprep.subr.bf16.mxu0 %v4254_v51  ;;  %v5109_v51 = vld [vmem:[#allocation28_spill] sm:$0xff] }
  0xc5   :  { %1612 = vmatmul.mubr.bf16.vlgmr.msra.gmra.mxu1 %v3979_v16  ;;  %v5093_v16 = vld [vmem:[#allocation13_spill] sm:$0xff] }
  0xc6   :  { %1662 = vmatpush1.bf16.msra.mxu1 %v4235_v13  ;;  %1693 = vmatprep.mubr.bf16.mxu1 %v4198_v34  ;;  %v5097_v34 = vld [vmem:[#allocation15_spill] sm:$0xff]  ;;  %v5105_v13 = vld [vmem:[#allocation25_spill] sm:$0xff] }
  0xc7   :  { %1663 = vmatprep.subr.bf16.mxu1 %v4252_v17  ;;  %1627 = vmatpush1.bf16.msra.mxu0 %v4258_v55  ;;  %v5108_v17 = vld [vmem:[#allocation29_spill] sm:$0xff]  ;;  %v5111_v55 = vld [vmem:[#allocation30_spill] sm:$0xff] }
  0xc8   :  { %1628 = vmatprep.subr.bf16.mxu0 %v4277_v42  ;;  %v5094_v42 = vld [vmem:[#allocation14_spill] sm:$0xff] }
  0xca   :  { %1664 = vmatpush1.bf16.msra.mxu1 %v5092_v36 }
  0xcb   :  { %1665 = vmatprep.subr.bf16.mxu1 %v4266_v59  ;;  %1629 = vmatpush1.bf16.msra.mxu0 %v4279_v15  ;;  %v5110_v15 = vld [vmem:[#allocation31_spill] sm:$0xff]  ;;  %v5112_v59 = vld [vmem:[#allocation74_spill] sm:$0xff] }
  0xcc   :  { %1630 = vmatprep.subr.bf16.mxu0 %v4285_v12  ;;  %v5115_v12 = vld [vmem:[#allocation70_spill] sm:$0xff] }
  0xce   :  { %1666 = vmatpush1.bf16.msra.mxu1 %v4270_v35  ;;  %v5113_v35 = vld [vmem:[#allocation73_spill] sm:$0xff] }
  0xcf   :  { %1667 = vmatprep.subr.bf16.mxu1 %v4283_v3  ;;  %1631 = vmatpush1.bf16.msra.mxu0 %v4289_v47  ;;  %v5114_v3 = vld [vmem:[#allocation32_spill] sm:$0xff]  ;;  %v5117_v47 = vld [vmem:[#allocation33_spill] sm:$0xff] }
  0xd0   :  { %1632 = vmatprep.subr.bf16.mxu0 %v4308_v6  ;;  %v5120_v6 = vld [vmem:[#allocation39_spill] sm:$0xff] }
  0xd2   :  { %1668 = vmatpush1.bf16.msra.mxu1 %v4287_v18  ;;  %v5116_v18 = vld [vmem:[#allocation55_spill] sm:$0xff] }
  0xd3   :  { %1669 = vmatprep.subr.bf16.mxu1 %v4294_v28  ;;  %1633 = vmatpush1.bf16.msra.mxu0 %v4310_v11  ;;  %v5118_v28 = vld [vmem:[#allocation35_spill] sm:$0xff]  ;;  %v5121_v11 = vld [vmem:[#allocation58_spill] sm:$0xff] }
  0xd4   :  { %1634 = vmatprep.subr.bf16.mxu0 %v4316_v22  ;;  %v5122_v22 = vld [vmem:[#allocation60_spill] sm:$0xff] }
  0xd6   :  { %1670 = vmatpush1.bf16.msra.mxu1 %v4298_v43  ;;  %v5119_v43 = vld [vmem:[#allocation34_spill] sm:$0xff] }
  0xd7   :  { %1671 = vmatprep.subr.bf16.mxu1 %v5093_v16  ;;  %1635 = vmatpush1.bf16.msra.mxu0 %v5094_v42  ;;  %v1803_v16 = vld [vmem:[#allocation4] sm:$0xff] }
  0xd8   :  { %1636 = vmatprep.subr.bf16.mxu0 %v5096_v30  ;;  %v1871_v42 = vunpack.c.h.s8.bf16 %v1803_v16  ;;  %v1843_v30 = vld [vmem:[#allocation4 + $0x140] sm:$0xff] }
  0xda   :  { %1672 = vmatpush1.bf16.msra.mxu1 %v5095_v41  ;;  %v1844_v41 = vld [vmem:[#allocation4 + $0x148] sm:$0xff] }
  0xdb   :  { %1673 = vmatprep.subr.bf16.mxu1 %v5097_v34  ;;  %1637 = vmatpush2.bf16.msra.mxu0 %v5098_v46  ;;  %v1952_v46 = vunpack.c.h.s8.bf16 %v1844_v41 }
  0xdc   :  { %1638 = vmatprep.subr.bf16.mxu0 %v5100_v14  ;;  %v1832_v14 = vld [vmem:[#allocation4 + $0xe8] sm:$0xff] }
  0xde   :  { %1674 = vmatpush1.bf16.msra.mxu1 %v5099_v62  ;;  %v1951_v62 = vunpack.c.h.s8.bf16 %v1843_v30 }
  0xdf   :  { %1675 = vmatprep.subr.bf16.mxu1 %v5101_v48  ;;  %1639 = vmatpush2.bf16.msra.mxu0 %v5102_v4  ;;  %v1867_v48 = vunpack.c.l.s8.bf16 %v1803_v16  ;;  %v1948_v4 = vunpack.c.l.s8.bf16 %v1844_v41 }
  0xe0   :  { %1640 = vmatprep.subr.bf16.mxu0 %v5104_v19  ;;  %v1928_v19 = vunpack.c.h.s8.bf16 %v1832_v14 }
  0xe2   :  { %1676 = vmatpush1.bf16.msra.mxu1 %v5103_v0  ;;  %v1947_v0 = vunpack.c.l.s8.bf16 %v1843_v30  ;;  %v1856_v30 = vld [vmem:[#allocation4 + $0x1a8] sm:$0xff] }
  0xe3   :  { %1677 = vmatprep.subr.bf16.mxu1 %v5105_v13  ;;  %1641 = vmatpush2.bf16.msra.mxu0 %v5106_v2  ;;  %v1831_v13 = vld [vmem:[#allocation4 + $0xe0] sm:$0xff] }
  0xe4   :  { %1642 = vmatprep.subr.bf16.mxu0 %v5108_v17  ;;  %v1927_v2 = vunpack.c.h.s8.bf16 %v1831_v13  ;;  %v1839_v17 = vld [vmem:[#allocation4 + $0x120] sm:$0xff] }
  0xe6   :  { %1678 = vmatpush2.bf16.msra.mxu1 %v5107_v25  ;;  %v1840_v25 = vld [vmem:[#allocation4 + $0x128] sm:$0xff] }
  0xe7   :  { %1679 = vmatprep.subr.bf16.mxu1 %v5109_v51  ;;  %1643 = vmatpush2.bf16.msra.mxu0 %v5110_v15  ;;  %v1924_v51 = vunpack.c.l.s8.bf16 %v1832_v14  ;;  %v1944_v15 = vunpack.c.h.s8.bf16 %v1840_v25 }
  0xe8   :  { %1644 = vmatprep.subr.bf16.mxu0 %v5112_v59  ;;  %v1828_v59 = vld [vmem:[#allocation4 + $0xc8] sm:$0xff] }
  0xea   :  { %1680 = vmatpush2.bf16.msra.mxu1 %v5111_v55  ;;  %v1943_v55 = vunpack.c.h.s8.bf16 %v1839_v17 }
  0xeb   :  { %1681 = vmatprep.subr.bf16.mxu1 %v5113_v35  ;;  %1645 = vmatpush2.bf16.msra.mxu0 %v5114_v3  ;;  %v1923_v35 = vunpack.c.l.s8.bf16 %v1831_v13  ;;  %v1940_v3 = vunpack.c.l.s8.bf16 %v1840_v25  ;;  %v1852_v25 = vld [vmem:[#allocation4 + $0x188] sm:$0xff] }
  0xec   :  { %1646 = vmatprep.subr.bf16.mxu0 %v5116_v18  ;;  %v1920_v18 = vunpack.c.h.s8.bf16 %v1828_v59 }
  0xee   :  { %1682 = vmatpush2.bf16.msra.mxu1 %v5115_v12  ;;  %v1939_v12 = vunpack.c.l.s8.bf16 %v1839_v17  ;;  %v1968_v17 = vunpack.c.h.s8.bf16 %v1852_v25 }
  0xef   :  { %1683 = vmatprep.subr.bf16.mxu1 %v5117_v47  ;;  %1647 = vmatpush2.bf16.msra.mxu0 %v5118_v28  ;;  %v1827_v47 = vld [vmem:[#allocation4 + $0xc0] sm:$0xff] }
  0xf0   :  { %1648 = vmatprep.subr.bf16.mxu0 %v5120_v6  ;;  %v1919_v28 = vunpack.c.h.s8.bf16 %v1827_v47  ;;  %v1835_v6 = vld [vmem:[#allocation4 + $0x100] sm:$0xff] }
  0xf2   :  { %1684 = vmatpush2.bf16.msra.mxu1 %v5119_v43  ;;  %v1836_v43 = vld [vmem:[#allocation4 + $0x108] sm:$0xff] }
  0xf3   :  { %1685 = vmatprep.subr.bf16.mxu1 %v5121_v11  ;;  %1649 = vmatpush2.bf16.msra.mxu0 %v5122_v22  ;;  %v1916_v11 = vunpack.c.l.s8.bf16 %v1828_v59  ;;  %v1936_v22 = vunpack.c.h.s8.bf16 %v1836_v43  ;;  %v1964_v59 = vunpack.c.l.s8.bf16 %v1852_v25  ;;  %v1833_v25 = vld [vmem:[#allocation4 + $0xf0] sm:$0xff] }
  0xf4   :  { %1650 = vmatprep.subr.bf16.mxu0 %v4446_v21  ;;  %v1815_v21 = vld [vmem:[#allocation4 + $0x60] sm:$0xff] }
  0xf6   :  { %1686 = vmatpush2.bf16.msra.mxu1 %v5123_v60  ;;  %v1935_v60 = vunpack.c.h.s8.bf16 %v1835_v6 }
  0xf7   :  { %1687 = vmatprep.subr.bf16.mxu1 %v5124_v20  ;;  %1651 = vmatpush2.bf16.msra.mxu0 %v4450_v7  ;;  %v1895_v7 = vunpack.c.h.s8.bf16 %v1815_v21  ;;  %v1824_v20 = vld [vmem:[#allocation4 + $0xa8] sm:$0xff] }
  0xf8   :  { %1716 = vmatprep.subr.bf16.mxu0 %v4473_v23  ;;  %v1812_v23 = vld [vmem:[#allocation4 + $0x48] sm:$0xff] }
  0xf9   :  { %v1888_v44 = vunpack.c.h.s8.bf16 %v1812_v23  ;;  %v1884_v52 = vunpack.c.l.s8.bf16 %v1812_v23 }
  0xfa   :  { %1688 = vmatpush2.bf16.msra.mxu1 %v4448_v39  ;;  %1653 = vmatmul.mubr.bf16.vlgmr.msra.gmra.mxu0 %v5126_v37  ;;  %v1892_v39 = vunpack.c.l.s8.bf16 %v1816_v8  ;;  %v1915_v8 = vunpack.c.l.s8.bf16 %v1827_v47  ;;  %v1912_v37 = vunpack.c.h.s8.bf16 %v1824_v20 }
  0xfb   :  { %1689 = vmatprep.subr.bf16.mxu1 %v5125_v33  ;;  %1717 = vmatpush1.bf16.msra.mxu0 %v4475_v9  ;;  %v1891_v9 = vunpack.c.l.s8.bf16 %v1815_v21  ;;  %v1931_v33 = vunpack.c.l.s8.bf16 %v1835_v6  ;;  %v1864_v21 = vld [vmem:[#allocation4 + $0x1e8] sm:$0xff] }
  0xfc   :  { %1734 = vmatprep.mubr.bf16.mxu0 %v5127_v29  ;;  %1995 = vmatprep.subr.bf16.mxu0 %v1896_v24  ;;  %v1932_v24 = vunpack.c.l.s8.bf16 %v1836_v43  ;;  %v1823_v29 = vld [vmem:[#allocation4 + $0xa0] sm:$0xff]  ;;  %v4612_v43 = vld [vmem:[%s4833_s2] sm:$0xf] }
  0xfe   :  { %1690 = vmatpush2.bf16.msra.mxu1 %v5128_v40  ;;  %v1911_v40 = vunpack.c.h.s8.bf16 %v1823_v29 }
  0xff   :  { %1691 = vmatprep.subr.bf16.mxu1 %v5129_v32  ;;  %v1863_v32 = vld [vmem:[#allocation4 + $0x1e0] sm:$0xff] }
 0x100   :  { %v1991_v23 = vunpack.c.h.s8.bf16 %v1863_v32  ;;  %v1987_v61 = vunpack.c.l.s8.bf16 %v1863_v32 }
 0x102   :  { %1692 = vmatpush2.bf16.msra.mxu1 %v4479_v10  ;;  %3408 = vmatmul.mubr.msk.bf16.vlgmr.msra.gmra.mxu0 %vm1411_vm0, %v5130_v56  ;;  %v1880_v10 = vunpack.c.h.s8.bf16 %v1808_v53  ;;  %v1820_v56 = vld [vmem:[#allocation4 + $0x88] sm:$0xff] }
 0x103   :  { %1996 = vmatpush1.bf16.msra.mxu0 %v1895_v7  ;;  %2036 = vmatprep.subr.bf16.mxu1 %v1960_v58  ;;  %v1908_v7 = vunpack.c.l.s8.bf16 %v1824_v20  ;;  %v1900_v57 = vunpack.c.l.s8.bf16 %v1820_v56 }
 0x104   :  { %1997 = vmatprep.subr.bf16.mxu0 %v1892_v39  ;;  %v1992_v39 = vunpack.c.h.s8.bf16 %v1864_v21 }
 0x105   :  { %1694 = vmatmul.mubr.bf16.vlgmr.msra.gmra.mxu1 %v4516_v49  ;;  %v1804_v49 = vld [vmem:[#allocation4 + $0x8] sm:$0xff] }
 0x106   :  { %2037 = vmatpush1.bf16.msra.mxu1 %v1959_v31  ;;  %v1872_v36 = vunpack.c.h.s8.bf16 %v1804_v49  ;;  %v1868_v34 = vunpack.c.l.s8.bf16 %v1804_v49 }
 0x107   :  { %1998 = vmatpush1.bf16.msra.mxu0 %v1891_v9  ;;  %2038 = vmatprep.subr.bf16.mxu1 %v1956_v27  ;;  %v1907_v9 = vunpack.c.l.s8.bf16 %v1823_v29  ;;  %v1898_v27 = vunpack.c.h.s8.bf16 %v4598_v45 }
 0x108   :  { %1999 = vmatprep.subr.bf16.mxu0 %v1888_v44  ;;  %v1988_v44 = vunpack.c.l.s8.bf16 %v1864_v21 }
 0x10a   :  { %2039 = vmatpush1.bf16.msra.mxu1 %v1955_v26 }
 0x10b   :  { %2000 = vmatpush1.bf16.msra.mxu0 %v1887_v54  ;;  %2040 = vmatprep.subr.bf16.mxu1 %v1952_v46  ;;  %v1904_v54 = vunpack.c.h.s8.bf16 %v1820_v56  ;;  %v1976_v46 = vunpack.c.h.s8.bf16 %v1856_v30 }
 0x10c   :  { %2001 = vmatprep.subr.bf16.mxu0 %v1884_v52  ;;  %v1819_v52 = vld [vmem:[#allocation4 + $0x80] sm:$0xff] }
 0x10d   :  { %v1903_v53 = vunpack.c.h.s8.bf16 %v1819_v52  ;;  %v1899_v31 = vunpack.c.l.s8.bf16 %v1819_v52  ;;  %v1817_v52 = vld [vmem:[#allocation4 + $0x70] sm:$0xff] }
 0x10e   :  { %2041 = vmatpush1.bf16.msra.mxu1 %v1951_v62  ;;  %v1855_v62 = vld [vmem:[#allocation4 + $0x1a0] sm:$0xff] }
 0x10f   :  { %2002 = vmatpush1.bf16.msra.mxu0 %v1883_v5  ;;  %2042 = vmatprep.subr.bf16.mxu1 %v1948_v4  ;;  %v1860_v5 = vld [vmem:[#allocation4 + $0x1c8] sm:$0xff]  ;;  %v1971_v13 = vunpack.c.l.s8.bf16 %v1855_v62 }
 0x110   :  { %2003 = vmatprep.subr.bf16.mxu0 %v1880_v10  ;;  %v1859_v10 = vld [vmem:[#allocation4 + $0x1c0] sm:$0xff]  ;;  %v1980_v26 = vunpack.c.l.s8.bf16 %v1860_v5 }
 0x111   :  { %v1983_v1 = vunpack.c.h.s8.bf16 %v1859_v10  ;;  %v1979_v16 = vunpack.c.l.s8.bf16 %v1859_v10 }
 0x112   :  { %2043 = vmatpush1.bf16.msra.mxu1 %v1947_v0  ;;  %v1972_v0 = vunpack.c.l.s8.bf16 %v1856_v30 }
 0x113   :  { %2004 = vmatpush1.bf16.msra.mxu0 %v1879_v38  ;;  %2044 = vmatprep.subr.bf16.mxu1 %v1944_v15  ;;  %v1984_v38 = vunpack.c.h.s8.bf16 %v1860_v5 }
 0x114   :  { %2005 = vmatprep.subr.bf16.mxu0 %v1876_v50 }
 0x116   :  { %2045 = vmatpush1.bf16.msra.mxu1 %v1943_v55 }
 0x117   :  { %2006 = vmatpush1.bf16.msra.mxu0 %v1875_v63  ;;  %2046 = vmatprep.subr.bf16.mxu1 %v1940_v3  ;;  %v4601_v3 = vld [vmem:[#allocation4 + $0x178] sm:$0xff] }
 0x118   :  { %2007 = vmatprep.subr.bf16.mxu0 %v1872_v36 }
 0x11a   :  { %2047 = vmatpush1.bf16.msra.mxu1 %v1939_v12  ;;  %v1962_v12 = vunpack.c.h.s8.bf16 %v4601_v3 }
 0x11b   :  { %2008 = vmatpush1.bf16.msra.mxu0 %v1871_v42  ;;  %2048 = vmatprep.subr.bf16.mxu1 %v1936_v22  ;;  %v4620_v22 = vld [vmem:[%s4834_s3] sm:$0xf] }
 0x11c   :  { %2009 = vmatprep.subr.bf16.mxu0 %v1868_v34 }
 0x11e   :  { %2049 = vmatpush1.bf16.msra.mxu1 %v1935_v60 }
 0x11f   :  { %2010 = vmatpush1.bf16.msra.mxu0 %v1867_v48  ;;  %2050 = vmatprep.subr.bf16.mxu1 %v1932_v24  ;;  %v1975_v48 = vunpack.c.h.s8.bf16 %v1855_v62 }
 0x120   :  { %2011 = vmatprep.subr.bf16.mxu0 %v1928_v19 }
 0x122   :  { %2051 = vmatpush1.bf16.msra.mxu1 %v1931_v33 }
 0x123   :  { %2012 = vmatpush2.bf16.msra.mxu0 %v1927_v2  ;;  %2052 = vmatprep.subr.bf16.mxu1 %v1992_v39 }
 0x124   :  { %2013 = vmatprep.subr.bf16.mxu0 %v1924_v51  ;;  %v1851_v51 = vld [vmem:[#allocation4 + $0x180] sm:$0xff] }
 0x125   :  { %v1967_v55 = vunpack.c.h.s8.bf16 %v1851_v51 }
 0x126   :  { %2053 = vmatpush2.bf16.msra.mxu1 %v1991_v23 }
 0x127   :  { %2014 = vmatpush2.bf16.msra.mxu0 %v1923_v35  ;;  %2054 = vmatprep.subr.bf16.mxu1 %v1988_v44  ;;  %v1963_v35 = vunpack.c.l.s8.bf16 %v1851_v51 }
 0x128   :  { %2015 = vmatprep.subr.bf16.mxu0 %v1920_v18  ;;  %v1745_v18 = vlaneseq }
 0x12a   :  { %2055 = vmatpush2.bf16.msra.mxu1 %v1987_v61  ;;  %v4604_v47 = vshrl.u32 %v1745_v18, 7 }
 0x12b   :  { %2016 = vmatpush2.bf16.msra.mxu0 %v1919_v28  ;;  %2056 = vmatprep.subr.bf16.mxu1 %v1984_v38  ;;  %v1897_v38 = vunpack.c.h.s8.bf16 %v1817_v52 }
 0x12c   :  { %2017 = vmatprep.subr.bf16.mxu0 %v1916_v11  ;;  %v4607_v28 = vsub.s32 0, %v4604_v47  ;;  %v4615_v6 = vsub.s32 1, %v4604_v47 }
 0x12e   :  { %2057 = vmatpush2.bf16.msra.mxu1 %v1983_v1  ;;  %v1778_v39 = vrot.slane %v4620_v22, %v4615_v6 }
 0x12f   :  { %2018 = vmatpush2.bf16.msra.mxu0 %v1915_v8  ;;  %2058 = vmatprep.subr.bf16.mxu1 %v1980_v26  ;;  %v1748_v8 = vrot.slane %v4612_v43, %v4607_v28 }
 0x130   :  { %2019 = vmatprep.subr.bf16.mxu0 %v1912_v37  ;;  %v1774_v37 = vrot.slane %v4620_v22, %v4607_v28 }
 0x132   :  { %2059 = vmatpush2.bf16.msra.mxu1 %v1979_v16  ;;  %v1810_v16 = vld [vmem:[#allocation4 + $0x38] sm:$0xff] }
 0x133   :  { %2020 = vmatpush2.bf16.msra.mxu0 %v1911_v40  ;;  %2060 = vmatprep.subr.bf16.mxu1 %v1976_v46  ;;  %v1752_v40 = vrot.slane %v4612_v43, %v4615_v6  ;;  %v1806_v46 = vld [vmem:[#allocation4 + $0x18] sm:$0xff] }
 0x134   :  { %2021 = vmatprep.subr.bf16.mxu0 %v1908_v7 }
 0x136   :  { %2061 = vmatpush2.bf16.msra.mxu1 %v1975_v48  ;;  %v1805_v48 = vld [vmem:[#allocation4 + $0x10] sm:$0xff] }
 0x137   :  { %2022 = vmatpush2.bf16.msra.mxu0 %v1907_v9  ;;  %2062 = vmatprep.subr.bf16.mxu1 %v1972_v0  ;;  %v1870_v0 = vunpack.c.l.s8.bf16 %v1806_v46 }
 0x138   :  { %2023 = vmatprep.subr.bf16.mxu0 %v1904_v54 }
 0x13a   :  { %v1449_v50 = vpop.f32.mrf.mxu0  ;;  %2063 = vmatpush2.bf16.msra.mxu1 %v1971_v13  ;;  %v1869_v13 = vunpack.c.l.s8.bf16 %v1805_v48 }
 0x13b   :  { %v1490_v58 = vpop.f32.mrf.mxu1  ;;  %2024 = vmatpush2.bf16.msra.mxu0 %v1903_v53  ;;  %2064 = vmatprep.subr.bf16.mxu1 %v1968_v17  ;;  %v1929_v17 = vunpack.c.h.s8.bf16 %v1833_v25 }
 0x13c   :  { %v1491_v49 = vadd.f32 %v1490_v58, %v1449_v50  ;;  %v1451_v63 = vpop.f32.mrf.mxu0  ;;  %2025 = vmatprep.subr.bf16.mxu0 %v1900_v57  ;;  %v1894_v50 = vunpack.c.l.s8.bf16 %v4598_v45  ;;  %v1882_v45 = vunpack.c.h.s8.bf16 %v1810_v16 }
 0x13d   :  { %v1492_v36 = vpop.f32.mrf.mxu1 }
 0x13e   :  { %v1453_v42 = vpop.f32.mrf.mxu0  ;;  %2065 = vmatpush2.bf16.msra.mxu1 %v1967_v55  ;;  %v1493_v60 = vadd.f32 %v1492_v36, %v1451_v63  ;;  %v1925_v55 = vunpack.c.l.s8.bf16 %v1833_v25 }
 0x13f   :  { %v1494_v41 = vpop.f32.mrf.mxu1  ;;  %2026 = vmatpush2.bf16.msra.mxu0 %v1899_v31  ;;  %2066 = vmatprep.subr.bf16.mxu1 %v1964_v59  ;;  %v1814_v31 = vld [vmem:[#allocation4 + $0x58] sm:$0xff] }
 0x140   :  { %v1454_v34 = vpop.f32.mrf.mxu0  ;;  %2077 = vmatprep.subr.bf16.mxu0 %v1898_v27  ;;  %v1890_v63 = vunpack.c.h.s8.bf16 %v1814_v31  ;;  %v1813_v27 = vld [vmem:[#allocation4 + $0x50] sm:$0xff]  ;;  %v1886_v36 = vunpack.c.l.s8.bf16 %v1814_v31 }
 0x141   :  { %v1495_v14 = vpop.f32.mrf.mxu1  ;;  %v1889_v26 = vunpack.c.h.s8.bf16 %v1813_v27  ;;  %v1885_v42 = vunpack.c.l.s8.bf16 %v1813_v27  ;;  %v1809_v41 = vld [vmem:[#allocation4 + $0x30] sm:$0xff]  ;;  %v1878_v34 = vunpack.c.l.s8.bf16 %v1810_v16 }
 0x142   :  { %2067 = vmatpush2.bf16.msra.mxu1 %v1963_v35  ;;  %v1881_v30 = vunpack.c.h.s8.bf16 %v1809_v41  ;;  %v1877_v62 = vunpack.c.l.s8.bf16 %v1809_v41  ;;  %v1874_v14 = vunpack.c.h.s8.bf16 %v1806_v46  ;;  %v1829_v35 = vld [vmem:[#allocation4 + $0xd0] sm:$0xff] }
 0x143   :  { %v1572_v4 = vpop.f32.mrf.mxu1  ;;  %2118 = vmatprep.subr.bf16.mxu1 %v1962_v12  ;;  %v1921_v12 = vunpack.c.h.s8.bf16 %v1829_v35 }
 0x145   :  { %v1574_v19 = vpop.f32.mrf.mxu1 }
 0x147   :  { %v1576_v2 = vpop.f32.mrf.mxu1 }
 0x149   :  { %v1577_v15 = vpop.f32.mrf.mxu1 }
 0x14a   :  { %v1830_v15 = vld [vmem:[#allocation4 + $0xd8] sm:$0xff] }
 0x14b   :  { %v1922_v59 = vunpack.c.h.s8.bf16 %v1830_v15  ;;  %v1918_v18 = vunpack.c.l.s8.bf16 %v1830_v15 }
 0x17a   :  { %v1531_v11 = vpop.f32.mrf.mxu0 }
 0x17b   :  { %v1532_v20 = vadd.f32 %v1531_v11, %v1491_v49  ;;  %v1893_v49 = vunpack.c.l.s8.bf16 %v1817_v52  ;;  %v1826_v11 = vld [vmem:[#allocation4 + $0xb8] sm:$0xff] }
 0x17c   :  { %v1533_v24 = vpop.f32.mrf.mxu0 }
 0x17d   :  { %v1573_v33 = vadd.f32 %v1572_v4, %v1532_v20  ;;  %v1534_v29 = vadd.f32 %v1533_v24, %v1493_v60  ;;  %v1873_v4 = vunpack.c.h.s8.bf16 %v1805_v48  ;;  %v1917_v60 = vunpack.c.l.s8.bf16 %v1829_v35 }
 0x17e   :  { %v1535_v21 = vpop.f32.mrf.mxu0  ;;  %v1914_v20 = vunpack.c.h.s8.bf16 %v1826_v11 }
 0x17f   :  { %v1765_v32 = vmul.f32 %v1748_v8, %v1573_v33  ;;  %v1575_v7 = vadd.f32 %v1574_v19, %v1534_v29  ;;  %v1834_v19 = vld [vmem:[#allocation4 + $0xf8] sm:$0xff]  ;;  %v1825_v8 = vld [vmem:[#allocation4 + $0xb0] sm:$0xff]  ;;  %v1910_v33 = vunpack.c.l.s8.bf16 %v1826_v11 }
 0x180   :  { %v1536_v23 = vpop.f32.mrf.mxu0  ;;  %v1930_v2 = vunpack.c.h.s8.bf16 %v1834_v19  ;;  %v1926_v51 = vunpack.c.l.s8.bf16 %v1834_v19  ;;  %v1913_v24 = vunpack.c.h.s8.bf16 %v1825_v8  ;;  %v2231_v19 = vld [vmem:[#allocation6 + $0x60] sm:$0xff] }
 0x181   :  { %v1791_v56 = vadd.f32 %v1774_v37, %v1765_v32  ;;  %v1766_v9 = vmul.f32 %v1752_v40, %v1575_v7  ;;  %v1822_v37 = vld [vmem:[#allocation4 + $0x98] sm:$0xff]  ;;  %v1909_v40 = vunpack.c.l.s8.bf16 %v1825_v8  ;;  %v1821_v7 = vld [vmem:[#allocation4 + $0x90] sm:$0xff]  ;;  %v2307_v35 = vunpack.c.l.s8.bf16 %v2231_v19 }
 0x182   :  { %v1906_v32 = vunpack.c.h.s8.bf16 %v1822_v37  ;;  %v1905_v23 = vunpack.c.h.s8.bf16 %v1821_v7 }
 0x183   :  { %v1792_v61 = vadd.f32 %v1778_v39, %v1766_v9  ;;  %v1795_v54 = vmax.f32 %v1791_v56, 0.0  ;;  %v4639_v9 = vsub.s32 2, %v4604_v47 }
 0x185   :  { %v4630_v44 = vpop.f32.mrf.mxu1  ;;  %v1796_v5 = vmax.f32 %v1792_v61, 0.0  ;;  %v4634_v1 = vpack.c.bf16 %v1795_v54, %v1795_v54  ;;  %v1902_v61 = vunpack.c.l.s8.bf16 %v1822_v37 }
 0x187   :  { %v4632_v53 = vpop.f32.mrf.mxu1  ;;  %v1800_v57 = vpack.c.bf16 %v1796_v5, %v1796_v5  ;;  %v4643_v5 = vsub.s32 3, %v4604_v47 }
 0x189   :  { %v1617_v10 = vpop.f32.mrf.mxu1  ;;  %2027 = vmatprep.mubr.bf16.mxu0 %v1800_v57  ;;  %v1760_v47 = vrot.slane %v4612_v43, %v4643_v5 }
 0x18a   :  { %2028 = vmatmul.mubr.bf16.vlgmr.msra.gmra.mxu0 %v4634_v1 }
 0x18b   :  { %v1618_v58 = vpop.f32.mrf.mxu1  ;;  %2078 = vmatpush1.bf16.msra.mxu0 %v1897_v38  ;;  %2109 = vmatprep.mubr.bf16.mxu0 %v1800_v57  ;;  %v1901_v57 = vunpack.c.l.s8.bf16 %v1821_v7 }
 0x18c   :  { %2079 = vmatprep.subr.bf16.mxu0 %v1894_v50  ;;  %v1756_v58 = vrot.slane %v4612_v43, %v4639_v9 }
 0x18f   :  { %2080 = vmatpush1.bf16.msra.mxu0 %v1893_v49 }
 0x190   :  { %2081 = vmatprep.subr.bf16.mxu0 %v1890_v63 }
 0x193   :  { %2082 = vmatpush1.bf16.msra.mxu0 %v1889_v26 }
 0x194   :  { %2083 = vmatprep.subr.bf16.mxu0 %v1886_v36 }
 0x197   :  { %2084 = vmatpush1.bf16.msra.mxu0 %v1885_v42  ;;  %v1786_v42 = vrot.slane %v4620_v22, %v4643_v5 }
 0x198   :  { %2085 = vmatprep.subr.bf16.mxu0 %v1882_v45 }
 0x19b   :  { %2086 = vmatpush1.bf16.msra.mxu0 %v1881_v30 }
 0x19c   :  { %2087 = vmatprep.subr.bf16.mxu0 %v1878_v34 }
 0x19f   :  { %2088 = vmatpush1.bf16.msra.mxu0 %v1877_v62 }
 0x1a0   :  { %2089 = vmatprep.subr.bf16.mxu0 %v1874_v14  ;;  %v1849_v14 = vld [vmem:[#allocation4 + $0x170] sm:$0xff] }
 0x1a1   :  { %v1961_v43 = vunpack.c.h.s8.bf16 %v1849_v14  ;;  %v1957_v15 = vunpack.c.l.s8.bf16 %v1849_v14  ;;  %v2244_v14 = vld [vmem:[#allocation6 + $0xc8] sm:$0xff] }
 0x1a3   :  { %2090 = vmatpush1.bf16.msra.mxu0 %v1873_v4 }
 0x1a4   :  { %2091 = vmatprep.subr.bf16.mxu0 %v1870_v0  ;;  %v2232_v0 = vld [vmem:[#allocation6 + $0x68] sm:$0xff] }
 0x1a5   :  { %v2312_v25 = vunpack.c.h.s8.bf16 %v2232_v0 }
 0x1a7   :  { %2092 = vmatpush1.bf16.msra.mxu0 %v1869_v13 }
 0x1a8   :  { %2093 = vmatprep.subr.bf16.mxu0 %v1930_v2  ;;  %v1958_v2 = vunpack.c.l.s8.bf16 %v4601_v3  ;;  %v2227_v3 = vld [vmem:[#allocation6 + $0x40] sm:$0xff] }
 0x1ab   :  { %2094 = vmatpush2.bf16.msra.mxu0 %v1929_v17  ;;  %v1846_v17 = vld [vmem:[#allocation4 + $0x158] sm:$0xff] }
 0x1ac   :  { %2095 = vmatprep.subr.bf16.mxu0 %v1926_v51  ;;  %v2308_v51 = vunpack.c.l.s8.bf16 %v2232_v0  ;;  %v1950_v11 = vunpack.c.l.s8.bf16 %v1846_v17 }
 0x1af   :  { %2096 = vmatpush2.bf16.msra.mxu0 %v1925_v55  ;;  %v1954_v55 = vunpack.c.h.s8.bf16 %v1846_v17 }
 0x1b0   :  { %2097 = vmatprep.subr.bf16.mxu0 %v1922_v59  ;;  %v1845_v59 = vld [vmem:[#allocation4 + $0x150] sm:$0xff] }
 0x1b3   :  { %2098 = vmatpush2.bf16.msra.mxu0 %v1921_v12 }
 0x1b4   :  { %2099 = vmatprep.subr.bf16.mxu0 %v1918_v18  ;;  %v1953_v18 = vunpack.c.h.s8.bf16 %v1845_v59 }
 0x1b7   :  { %2100 = vmatpush2.bf16.msra.mxu0 %v1917_v60  ;;  %v2303_v60 = vunpack.c.h.s8.bf16 %v2227_v3 }
 0x1b8   :  { %2101 = vmatprep.subr.bf16.mxu0 %v1914_v20  ;;  %v1842_v20 = vld [vmem:[#allocation4 + $0x138] sm:$0xff] }
 0x1b9   :  { %v1946_v37 = vunpack.c.h.s8.bf16 %v1842_v20 }
 0x1ba   :  { %v1654_v29 = vpop.f32.mrf.mxu0 }
 0x1bb   :  { %2102 = vmatpush2.bf16.msra.mxu0 %v1913_v24  ;;  %v1655_v54 = vadd.f32 %v1654_v29, %v4630_v44  ;;  %v1782_v44 = vrot.slane %v4620_v22, %v4639_v9  ;;  %v2311_v22 = vunpack.c.h.s8.bf16 %v2231_v19  ;;  %v2224_v24 = vld [vmem:[#allocation6 + $0x28] sm:$0xff]  ;;  %v1841_v29 = vld [vmem:[#allocation4 + $0x130] sm:$0xff]  ;;  %v2336_v19 = vunpack.c.h.s8.bf16 %v2244_v14 }
 0x1bc   :  { %v1656_v21 = vpop.f32.mrf.mxu0  ;;  %2103 = vmatprep.subr.bf16.mxu0 %v1910_v33  ;;  %v1949_v33 = vunpack.c.l.s8.bf16 %v1845_v59  ;;  %v1945_v7 = vunpack.c.h.s8.bf16 %v1841_v29 }
 0x1bd   :  { %v1657_v38 = vadd.f32 %v1656_v21, %v4632_v53  ;;  %v2296_v21 = vunpack.c.h.s8.bf16 %v2224_v24 }
 0x1be   :  { %v1658_v39 = vpop.f32.mrf.mxu0 }
 0x1bf   :  { %2104 = vmatpush2.bf16.msra.mxu0 %v1909_v40  ;;  %v2299_v40 = vunpack.c.l.s8.bf16 %v2227_v3  ;;  %v1942_v39 = vunpack.c.l.s8.bf16 %v1842_v20 }
 0x1c0   :  { %v1659_v56 = vpop.f32.mrf.mxu0  ;;  %2105 = vmatprep.subr.bf16.mxu0 %v1906_v32  ;;  %v2223_v32 = vld [vmem:[#allocation6 + $0x20] sm:$0xff] }
 0x1c1   :  { %v1838_v56 = vld [vmem:[#allocation4 + $0x118] sm:$0xff] }
 0x1c2   :  { %v1736_v52 = vpop.f32.mrf.mxu0 }
 0x1c3   :  { %2106 = vmatpush2.bf16.msra.mxu0 %v1905_v23  ;;  %v2295_v23 = vunpack.c.h.s8.bf16 %v2223_v32 }
 0x1c4   :  { %v1738_v31 = vpop.f32.mrf.mxu0  ;;  %2107 = vmatprep.subr.bf16.mxu0 %v1902_v61  ;;  %v2292_v61 = vunpack.c.l.s8.bf16 %v2224_v24 }
 0x1c5   :  { %v1695_v10 = vpop.f32.mrf.mxu1 }
 0x1c6   :  { %v1696_v50 = vadd.f32 %v1695_v10, %v1655_v54  ;;  %v1740_v26 = vpop.f32.mrf.mxu0  ;;  %v2220_v54 = vld [vmem:[#allocation6 + $0x8] sm:$0xff]  ;;  %v1938_v10 = vunpack.c.h.s8.bf16 %v1838_v56 }
 0x1c7   :  { %v1697_v49 = vpop.f32.mrf.mxu1  ;;  %2108 = vmatpush2.bf16.msra.mxu0 %v1901_v57  ;;  %v1837_v57 = vld [vmem:[#allocation4 + $0x110] sm:$0xff] }
 0x1c8   :  { %v1737_v63 = vadd.f32 %v1736_v52, %v1696_v50  ;;  %v1698_v27 = vadd.f32 %v1697_v49, %v1657_v38  ;;  %v1741_v45 = vpop.f32.mrf.mxu0  ;;  %2411 = vmatprep.subr.bf16.mxu0 %v2312_v25  ;;  %v1941_v52 = vunpack.c.l.s8.bf16 %v1841_v29  ;;  %v2291_v38 = vunpack.c.l.s8.bf16 %v2223_v32 }
 0x1c9   :  { %v1699_v36 = vpop.f32.mrf.mxu1  ;;  %v2288_v50 = vunpack.c.h.s8.bf16 %v2220_v54  ;;  %v1934_v49 = vunpack.c.l.s8.bf16 %v1838_v56  ;;  %v1933_v26 = vunpack.c.l.s8.bf16 %v1837_v57  ;;  %v2247_v45 = vld [vmem:[#allocation6 + $0xe0] sm:$0xff] }
 0x1ca   :  { %v1767_v16 = vmul.f32 %v1756_v58, %v1737_v63  ;;  %v1739_v53 = vadd.f32 %v1738_v31, %v1698_v27  ;;  %2110 = vmatmul.mubr.bf16.vlgmr.msra.gmra.mxu0 %v4634_v1  ;;  %v2228_v1 = vld [vmem:[#allocation6 + $0x48] sm:$0xff]  ;;  %v2219_v58 = vld [vmem:[#allocation6] sm:$0xff]  ;;  %v1937_v31 = vunpack.c.h.s8.bf16 %v1837_v57  ;;  %v2284_v27 = vunpack.c.l.s8.bf16 %v2220_v54 }
 0x1cb   :  { %v1700_v41 = vpop.f32.mrf.mxu1  ;;  %2412 = vmatpush1.bf16.msra.mxu0 %v2311_v22  ;;  %v2304_v12 = vunpack.c.h.s8.bf16 %v2228_v1  ;;  %v2300_v8 = vunpack.c.l.s8.bf16 %v2228_v1  ;;  %v2287_v63 = vunpack.c.h.s8.bf16 %v2219_v58  ;;  %v2339_v0 = vunpack.c.l.s8.bf16 %v2247_v45  ;;  %v2235_v56 = vld [vmem:[#allocation6 + $0x80] sm:$0xff] }
 0x1cc   :  { %v1793_v30 = vadd.f32 %v1782_v44, %v1767_v16  ;;  %v1768_v34 = vmul.f32 %v1760_v47, %v1739_v53  ;;  %2413 = vmatprep.subr.bf16.mxu0 %v2308_v51  ;;  %v1866_v44 = vld [vmem:[#allocation4 + $0x1f8] sm:$0xff]  ;;  %v2248_v47 = vld [vmem:[#allocation6 + $0xe8] sm:$0xff]  ;;  %v1865_v16 = vld [vmem:[#allocation4 + $0x1f0] sm:$0xff]  ;;  %v2283_v53 = vunpack.c.l.s8.bf16 %v2219_v58 }
 0x1cd   :  { %v1994_v36 = vunpack.c.h.s8.bf16 %v1866_v44  ;;  %v1993_v41 = vunpack.c.h.s8.bf16 %v1865_v16  ;;  %v1858_v51 = vld [vmem:[#allocation4 + $0x1b8] sm:$0xff] }
 0x1ce   :  { %v1794_v46 = vadd.f32 %v1786_v42, %v1768_v34  ;;  %v1797_v62 = vmax.f32 %v1793_v30, 0.0  ;;  %v2344_v42 = vunpack.c.h.s8.bf16 %v2248_v47  ;;  %v1990_v30 = vunpack.c.l.s8.bf16 %v1866_v44 }
 0x1cf   :  { %2414 = vmatpush1.bf16.msra.mxu0 %v2307_v35  ;;  %v2343_v34 = vunpack.c.h.s8.bf16 %v2247_v45  ;;  %v1974_v35 = vunpack.c.l.s8.bf16 %v1858_v51 }
 0x1d0   :  { %v1798_v48 = vmax.f32 %v1794_v46, 0.0  ;;  %v4655_v13 = vpack.c.bf16 %v1797_v62, %v1797_v62  ;;  %2415 = vmatprep.subr.bf16.mxu0 %v2304_v12  ;;  %v1862_v46 = vld [vmem:[#allocation4 + $0x1d8] sm:$0xff]  ;;  %v2340_v62 = vunpack.c.l.s8.bf16 %v2248_v47 }
 0x1d1   :  { %v1982_v22 = vunpack.c.l.s8.bf16 %v1862_v46  ;;  %v1854_v12 = vld [vmem:[#allocation4 + $0x198] sm:$0xff] }
 0x1d2   :  { %v1802_v4 = vpack.c.bf16 %v1798_v48, %v1798_v48  ;;  %v1989_v48 = vunpack.c.l.s8.bf16 %v1865_v16  ;;  %v1966_v20 = vunpack.c.l.s8.bf16 %v1854_v12  ;;  %v2256_v16 = vld [vmem:[#allocation6 + $0x128] sm:$0xff] }
 0x1d3   :  { %2416 = vmatpush1.bf16.msra.mxu0 %v2303_v60 }
 0x1d4   :  { %2068 = vmatprep.mubr.bf16.mxu1 %v1802_v4  ;;  %2417 = vmatprep.subr.bf16.mxu0 %v2300_v8  ;;  %v2332_v8 = vunpack.c.l.s8.bf16 %v2244_v14 }
 0x1d5   :  { %2069 = vmatmul.mubr.bf16.vlgmr.msra.gmra.mxu1 %v4655_v13 }
 0x1d6   :  { %2119 = vmatpush1.bf16.msra.mxu1 %v1961_v43  ;;  %2150 = vmatprep.mubr.bf16.mxu1 %v1802_v4  ;;  %v1986_v4 = vunpack.c.h.s8.bf16 %v1862_v46  ;;  %v1861_v43 = vld [vmem:[#allocation4 + $0x1d0] sm:$0xff] }
 0x1d7   :  { %2120 = vmatprep.subr.bf16.mxu1 %v1958_v2  ;;  %2418 = vmatpush1.bf16.msra.mxu0 %v2299_v40  ;;  %v2243_v2 = vld [vmem:[#allocation6 + $0xc0] sm:$0xff]  ;;  %v1985_v25 = vunpack.c.h.s8.bf16 %v1861_v43  ;;  %v1981_v1 = vunpack.c.l.s8.bf16 %v1861_v43  ;;  %v2280_v43 = vld [vmem:[#allocation6 + $0x1e8] sm:$0xff] }
 0x1d8   :  { %2419 = vmatprep.subr.bf16.mxu0 %v2296_v21  ;;  %v2335_v17 = vunpack.c.h.s8.bf16 %v2243_v2  ;;  %v2239_v40 = vld [vmem:[#allocation6 + $0xa0] sm:$0xff] }
 0x1d9   :  { %v2327_v21 = vunpack.c.h.s8.bf16 %v2239_v40 }
 0x1da   :  { %2121 = vmatpush1.bf16.msra.mxu1 %v1957_v15  ;;  %v1978_v15 = vunpack.c.h.s8.bf16 %v1858_v51 }
 0x1db   :  { %2122 = vmatprep.subr.bf16.mxu1 %v1954_v55  ;;  %2420 = vmatpush1.bf16.msra.mxu0 %v2295_v23  ;;  %v1857_v55 = vld [vmem:[#allocation4 + $0x1b0] sm:$0xff] }
 0x1dc   :  { %2421 = vmatprep.subr.bf16.mxu0 %v2292_v61  ;;  %v1977_v59 = vunpack.c.h.s8.bf16 %v1857_v55  ;;  %v1973_v3 = vunpack.c.l.s8.bf16 %v1857_v55  ;;  %v2319_v61 = vunpack.c.h.s8.bf16 %v2235_v56 }
 0x1de   :  { %2123 = vmatpush1.bf16.msra.mxu1 %v1953_v18  ;;  %v1970_v18 = vunpack.c.h.s8.bf16 %v1854_v12 }
 0x1df   :  { %2124 = vmatprep.subr.bf16.mxu1 %v1950_v11  ;;  %2422 = vmatpush1.bf16.msra.mxu0 %v2291_v38  ;;  %v1853_v11 = vld [vmem:[#allocation4 + $0x190] sm:$0xff]  ;;  %v2263_v38 = vld [vmem:[#allocation6 + $0x160] sm:$0xff] }
 0x1e0   :  { %2423 = vmatprep.subr.bf16.mxu0 %v2288_v50  ;;  %v1969_v60 = vunpack.c.h.s8.bf16 %v1853_v11  ;;  %v1965_v24 = vunpack.c.l.s8.bf16 %v1853_v11  ;;  %v4660_v50 = vld [vmem:[#allocation6 + $0x78] sm:$0xff] }
 0x1e1   :  { %v2314_v58 = vunpack.c.h.s8.bf16 %v4660_v50 }
 0x1e2   :  { %2125 = vmatpush1.bf16.msra.mxu1 %v1949_v33  ;;  %v2331_v33 = vunpack.c.l.s8.bf16 %v2243_v2 }
 0x1e3   :  { %2126 = vmatprep.subr.bf16.mxu1 %v1946_v37  ;;  %2424 = vmatpush1.bf16.msra.mxu0 %v2287_v63  ;;  %v2240_v37 = vld [vmem:[#allocation6 + $0xa8] sm:$0xff] }
 0x1e4   :  { %2425 = vmatprep.subr.bf16.mxu0 %v2284_v27  ;;  %v2328_v29 = vunpack.c.h.s8.bf16 %v2240_v37  ;;  %v2324_v32 = vunpack.c.l.s8.bf16 %v2240_v37  ;;  %v2260_v63 = vld [vmem:[#allocation6 + $0x148] sm:$0xff]  ;;  %v2259_v27 = vld [vmem:[#allocation6 + $0x140] sm:$0xff] }
 0x1e5   :  { %v2368_v44 = vunpack.c.h.s8.bf16 %v2260_v63  ;;  %v2367_v47 = vunpack.c.h.s8.bf16 %v2259_v27  ;;  %v2268_v37 = vld [vmem:[#allocation6 + $0x188] sm:$0xff] }
 0x1e6   :  { %2127 = vmatpush1.bf16.msra.mxu1 %v1945_v7  ;;  %v2323_v7 = vunpack.c.l.s8.bf16 %v2239_v40  ;;  %v2267_v40 = vld [vmem:[#allocation6 + $0x180] sm:$0xff] }
 0x1e7   :  { %2128 = vmatprep.subr.bf16.mxu1 %v1942_v39  ;;  %2426 = vmatpush1.bf16.msra.mxu0 %v2283_v53  ;;  %v2236_v39 = vld [vmem:[#allocation6 + $0x88] sm:$0xff]  ;;  %v2360_v53 = vunpack.c.h.s8.bf16 %v2256_v16 }
 0x1e8   :  { %2427 = vmatprep.subr.bf16.mxu0 %v2344_v42  ;;  %v2320_v23 = vunpack.c.h.s8.bf16 %v2236_v39  ;;  %v2316_v54 = vunpack.c.l.s8.bf16 %v2236_v39  ;;  %v2255_v42 = vld [vmem:[#allocation6 + $0x120] sm:$0xff]  ;;  %v4663_v39 = vld [vmem:[#allocation6 + $0x178] sm:$0xff] }
 0x1e9   :  { %v2359_v45 = vunpack.c.h.s8.bf16 %v2255_v42 }
 0x1ea   :  { %2129 = vmatpush1.bf16.msra.mxu1 %v1941_v52  ;;  %v2315_v52 = vunpack.c.l.s8.bf16 %v2235_v56 }
 0x1eb   :  { %2130 = vmatprep.subr.bf16.mxu1 %v1938_v10  ;;  %2428 = vmatpush2.bf16.msra.mxu0 %v2343_v34  ;;  %v2264_v10 = vld [vmem:[#allocation6 + $0x168] sm:$0xff] }
 0x1ec   :  { %2429 = vmatprep.subr.bf16.mxu0 %v2340_v62  ;;  %v2376_v57 = vunpack.c.h.s8.bf16 %v2264_v10  ;;  %v2252_v34 = vld [vmem:[#allocation6 + $0x108] sm:$0xff]  ;;  %v2251_v62 = vld [vmem:[#allocation6 + $0x100] sm:$0xff] }
 0x1ed   :  { %v2352_v46 = vunpack.c.h.s8.bf16 %v2252_v34  ;;  %v2351_v14 = vunpack.c.h.s8.bf16 %v2251_v62 }
 0x1ee   :  { %2131 = vmatpush1.bf16.msra.mxu1 %v1937_v31  ;;  %v2372_v31 = vunpack.c.l.s8.bf16 %v2264_v10 }
 0x1ef   :  { %2132 = vmatprep.subr.bf16.mxu1 %v1934_v49  ;;  %2430 = vmatpush2.bf16.msra.mxu0 %v2339_v0  ;;  %v2371_v49 = vunpack.c.l.s8.bf16 %v2263_v38  ;;  %v2408_v0 = vunpack.c.h.s8.bf16 %v2280_v43 }
 0x1f0   :  { %2431 = vmatprep.subr.bf16.mxu0 %v2336_v19  ;;  %v2279_v19 = vld [vmem:[#allocation6 + $0x1e0] sm:$0xff] }
 0x1f1   :  { %v2407_v2 = vunpack.c.h.s8.bf16 %v2279_v19 }
 0x1f2   :  { %2133 = vmatpush1.bf16.msra.mxu1 %v1933_v26  ;;  %v2364_v26 = vunpack.c.l.s8.bf16 %v2260_v63 }
 0x1f3   :  { %2134 = vmatprep.subr.bf16.mxu1 %v1994_v36  ;;  %2432 = vmatpush2.bf16.msra.mxu0 %v2335_v17  ;;  %v2363_v36 = vunpack.c.l.s8.bf16 %v2259_v27  ;;  %v2276_v17 = vld [vmem:[#allocation6 + $0x1c8] sm:$0xff] }
 0x1f4   :  { %2433 = vmatprep.subr.bf16.mxu0 %v2332_v8  ;;  %v2400_v51 = vunpack.c.h.s8.bf16 %v2276_v17 }
 0x1f6   :  { %2135 = vmatpush2.bf16.msra.mxu1 %v1993_v41  ;;  %v2356_v41 = vunpack.c.l.s8.bf16 %v2256_v16 }
 0x1f7   :  { %2136 = vmatprep.subr.bf16.mxu1 %v1990_v30  ;;  %2434 = vmatpush2.bf16.msra.mxu0 %v2331_v33  ;;  %v2355_v30 = vunpack.c.l.s8.bf16 %v2255_v42 }
 0x1f8   :  { %2435 = vmatprep.subr.bf16.mxu0 %v2328_v29  ;;  %v2384_v29 = vunpack.c.h.s8.bf16 %v2268_v37 }
 0x1fa   :  { %2137 = vmatpush2.bf16.msra.mxu1 %v1989_v48  ;;  %v2348_v48 = vunpack.c.l.s8.bf16 %v2252_v34 }
 0x1fb   :  { %2138 = vmatprep.subr.bf16.mxu1 %v1986_v4  ;;  %2436 = vmatpush2.bf16.msra.mxu0 %v2327_v21  ;;  %v2347_v4 = vunpack.c.l.s8.bf16 %v2251_v62  ;;  %v2383_v21 = vunpack.c.h.s8.bf16 %v2267_v40 }
 0x1fc   :  { %2437 = vmatprep.subr.bf16.mxu0 %v2324_v32  ;;  %v2380_v32 = vunpack.c.l.s8.bf16 %v2268_v37 }
 0x1fe   :  { %2139 = vmatpush2.bf16.msra.mxu1 %v1985_v25  ;;  %v2404_v25 = vunpack.c.l.s8.bf16 %v2280_v43 }
 0x1ff   :  { %2140 = vmatprep.subr.bf16.mxu1 %v1982_v22  ;;  %2438 = vmatpush2.bf16.msra.mxu0 %v2323_v7  ;;  %v2403_v22 = vunpack.c.l.s8.bf16 %v2279_v19  ;;  %v2379_v7 = vunpack.c.l.s8.bf16 %v2267_v40  ;;  %v2245_v40 = vld [vmem:[#allocation6 + $0xd0] sm:$0xff] }
 0x200   :  { %2439 = vmatprep.subr.bf16.mxu0 %v2320_v23  ;;  %v2378_v23 = vunpack.c.h.s8.bf16 %v4663_v39 }
 0x202   :  { %2141 = vmatpush2.bf16.msra.mxu1 %v1981_v1  ;;  %v2275_v1 = vld [vmem:[#allocation6 + $0x1c0] sm:$0xff] }
 0x203   :  { %2142 = vmatprep.subr.bf16.mxu1 %v1978_v15  ;;  %2440 = vmatpush2.bf16.msra.mxu0 %v2319_v61  ;;  %v2399_v15 = vunpack.c.h.s8.bf16 %v2275_v1 }
 0x204   :  { %2441 = vmatprep.subr.bf16.mxu0 %v2316_v54 }
 0x206   :  { %2143 = vmatpush2.bf16.msra.mxu1 %v1977_v59  ;;  %v2396_v59 = vunpack.c.l.s8.bf16 %v2276_v17 }
 0x207   :  { %2144 = vmatprep.subr.bf16.mxu1 %v1974_v35  ;;  %2442 = vmatpush2.bf16.msra.mxu0 %v2315_v52  ;;  %v2395_v35 = vunpack.c.l.s8.bf16 %v2275_v1  ;;  %v4673_v52 = vld [vmem:[%s4836_s5] sm:$0xf] }
 0x208   :  { %2493 = vmatprep.subr.bf16.mxu0 %v2314_v58 }
 0x20a   :  { %2145 = vmatpush2.bf16.msra.mxu1 %v1973_v3  ;;  %v2272_v3 = vld [vmem:[#allocation6 + $0x1a8] sm:$0xff] }
 0x20b   :  { %2146 = vmatprep.subr.bf16.mxu1 %v1970_v18  ;;  %v2392_v11 = vunpack.c.h.s8.bf16 %v2272_v3 }
 0x20e   :  { %2147 = vmatpush2.bf16.msra.mxu1 %v1969_v60  ;;  %v2271_v60 = vld [vmem:[#allocation6 + $0x1a0] sm:$0xff] }
 0x20f   :  { %2148 = vmatprep.subr.bf16.mxu1 %v1966_v20  ;;  %v2391_v20 = vunpack.c.h.s8.bf16 %v2271_v60  ;;  %v2387_v33 = vunpack.c.l.s8.bf16 %v2271_v60 }
 0x212   :  { %2149 = vmatpush2.bf16.msra.mxu1 %v1965_v24  ;;  %v2388_v24 = vunpack.c.l.s8.bf16 %v2272_v3 }
 0x213   :  { %2452 = vmatprep.subr.bf16.mxu1 %v2376_v57  ;;  %v4678_v57 = vld [vmem:[%s4837_s6] sm:$0xf] }
 0x215   :  { %2151 = vmatmul.mubr.bf16.vlgmr.msra.gmra.mxu1 %v4655_v13  ;;  %v2375_v13 = vunpack.c.h.s8.bf16 %v2263_v38  ;;  %v2164_v38 = vrot.slane %v4673_v52, %v4607_v28 }
 0x217   :  { %2453 = vmatpush1.bf16.msra.mxu1 %v2375_v13 }
 0x218   :  { %2454 = vmatprep.subr.bf16.mxu1 %v2372_v31  ;;  %v2190_v31 = vrot.slane %v4678_v57, %v4607_v28 }
 0x21b   :  { %2455 = vmatpush1.bf16.msra.mxu1 %v2371_v49  ;;  %v2168_v49 = vrot.slane %v4673_v52, %v4615_v6 }
 0x21c   :  { %2456 = vmatprep.subr.bf16.mxu1 %v2368_v44 }
 0x21f   :  { %2457 = vmatpush1.bf16.msra.mxu1 %v2367_v47  ;;  %v2194_v47 = vrot.slane %v4678_v57, %v4615_v6 }
 0x220   :  { %2458 = vmatprep.subr.bf16.mxu1 %v2364_v26 }
 0x223   :  { %2459 = vmatpush1.bf16.msra.mxu1 %v2363_v36 }
 0x224   :  { %2460 = vmatprep.subr.bf16.mxu1 %v2360_v53 }
 0x227   :  { %2461 = vmatpush1.bf16.msra.mxu1 %v2359_v45 }
 0x228   :  { %2462 = vmatprep.subr.bf16.mxu1 %v2356_v41  ;;  %v2233_v41 = vld [vmem:[#allocation6 + $0x70] sm:$0xff] }
 0x22b   :  { %2463 = vmatpush1.bf16.msra.mxu1 %v2355_v30 }
 0x22c   :  { %2464 = vmatprep.subr.bf16.mxu1 %v2352_v46  ;;  %v2313_v46 = vunpack.c.h.s8.bf16 %v2233_v41 }
 0x22f   :  { %2465 = vmatpush1.bf16.msra.mxu1 %v2351_v14  ;;  %v2310_v14 = vunpack.c.l.s8.bf16 %v4660_v50  ;;  %v2225_v50 = vld [vmem:[#allocation6 + $0x30] sm:$0xff] }
 0x230   :  { %2466 = vmatprep.subr.bf16.mxu1 %v2348_v48  ;;  %v2230_v48 = vld [vmem:[#allocation6 + $0x58] sm:$0xff] }
 0x231   :  { %v2306_v43 = vunpack.c.h.s8.bf16 %v2230_v48 }
 0x233   :  { %2467 = vmatpush1.bf16.msra.mxu1 %v2347_v4  ;;  %v2309_v4 = vunpack.c.l.s8.bf16 %v2233_v41 }
 0x234   :  { %2468 = vmatprep.subr.bf16.mxu1 %v2408_v0  ;;  %v2229_v0 = vld [vmem:[#allocation6 + $0x50] sm:$0xff] }
 0x235   :  { %v2305_v19 = vunpack.c.h.s8.bf16 %v2229_v0 }
 0x237   :  { %2469 = vmatpush2.bf16.msra.mxu1 %v2407_v2  ;;  %v2302_v2 = vunpack.c.l.s8.bf16 %v2230_v48 }
 0x238   :  { %2470 = vmatprep.subr.bf16.mxu1 %v2404_v25  ;;  %v2226_v25 = vld [vmem:[#allocation6 + $0x38] sm:$0xff] }
 0x239   :  { %v2298_v17 = vunpack.c.h.s8.bf16 %v2226_v25  ;;  %v2294_v1 = vunpack.c.l.s8.bf16 %v2226_v25  ;;  %v2262_v25 = vld [vmem:[#allocation6 + $0x158] sm:$0xff] }
 0x23b   :  { %2471 = vmatpush2.bf16.msra.mxu1 %v2403_v22  ;;  %v2301_v22 = vunpack.c.l.s8.bf16 %v2229_v0 }
 0x23c   :  { %2472 = vmatprep.subr.bf16.mxu1 %v2400_v51  ;;  %v2297_v51 = vunpack.c.h.s8.bf16 %v2225_v50 }
 0x23f   :  { %2473 = vmatpush2.bf16.msra.mxu1 %v2399_v15  ;;  %v2222_v15 = vld [vmem:[#allocation6 + $0x18] sm:$0xff] }
 0x240   :  { %2474 = vmatprep.subr.bf16.mxu1 %v2396_v59  ;;  %v2290_v59 = vunpack.c.h.s8.bf16 %v2222_v15  ;;  %v2286_v3 = vunpack.c.l.s8.bf16 %v2222_v15  ;;  %v2648_v15 = vld [vmem:[#allocation7 + $0x68] sm:$0xff] }
 0x243   :  { %2475 = vmatpush2.bf16.msra.mxu1 %v2395_v35  ;;  %v2221_v35 = vld [vmem:[#allocation6 + $0x10] sm:$0xff] }
 0x244   :  { %2476 = vmatprep.subr.bf16.mxu1 %v2392_v11  ;;  %v2285_v11 = vunpack.c.l.s8.bf16 %v2221_v35 }
 0x247   :  { %2477 = vmatpush2.bf16.msra.mxu1 %v2391_v20  ;;  %v2249_v20 = vld [vmem:[#allocation6 + $0xf0] sm:$0xff] }
 0x248   :  { %2478 = vmatprep.subr.bf16.mxu1 %v2388_v24  ;;  %v2341_v37 = vunpack.c.l.s8.bf16 %v2249_v20 }
 0x24a   :  { %v2029_v55 = vpop.f32.mrf.mxu0 }
 0x24b   :  { %2479 = vmatpush2.bf16.msra.mxu1 %v2387_v33  ;;  %v2246_v33 = vld [vmem:[#allocation6 + $0xd8] sm:$0xff] }
 0x24c   :  { %v2031_v12 = vpop.f32.mrf.mxu0  ;;  %2480 = vmatprep.subr.bf16.mxu1 %v2384_v29  ;;  %v2338_v29 = vunpack.c.h.s8.bf16 %v2246_v33 }
 0x24e   :  { %v2033_v18 = vpop.f32.mrf.mxu0 }
 0x24f   :  { %2481 = vmatpush2.bf16.msra.mxu1 %v2383_v21  ;;  %v2250_v18 = vld [vmem:[#allocation6 + $0xf8] sm:$0xff]  ;;  %v2337_v21 = vunpack.c.h.s8.bf16 %v2245_v40 }
 0x250   :  { %v2034_v8 = vpop.f32.mrf.mxu0  ;;  %2482 = vmatprep.subr.bf16.mxu1 %v2380_v32  ;;  %v2346_v60 = vunpack.c.h.s8.bf16 %v2250_v18  ;;  %v2342_v24 = vunpack.c.l.s8.bf16 %v2250_v18  ;;  %v2334_v32 = vunpack.c.l.s8.bf16 %v2246_v33 }
 0x251   :  { %v2345_v8 = vunpack.c.h.s8.bf16 %v2249_v20 }
 0x253   :  { %2483 = vmatpush2.bf16.msra.mxu1 %v2379_v7  ;;  %v2242_v7 = vld [vmem:[#allocation6 + $0xb8] sm:$0xff] }
 0x254   :  { %2534 = vmatprep.subr.bf16.mxu1 %v2378_v23  ;;  %v2333_v23 = vunpack.c.l.s8.bf16 %v2245_v40 }
 0x28a   :  { %v4666_v56 = vpop.f32.mrf.mxu0 }
 0x28c   :  { %v4668_v61 = vpop.f32.mrf.mxu0 }
 0x28e   :  { %v2115_v54 = vpop.f32.mrf.mxu0 }
 0x28f   :  { %v2330_v54 = vunpack.c.h.s8.bf16 %v2242_v7 }
 0x290   :  { %v2116_v10 = vpop.f32.mrf.mxu0 }
 0x291   :  { %v2241_v10 = vld [vmem:[#allocation6 + $0xb0] sm:$0xff] }
 0x295   :  { %v2070_v13 = vpop.f32.mrf.mxu1 }
 0x296   :  { %v2071_v58 = vadd.f32 %v2070_v13, %v2029_v55  ;;  %v2293_v55 = vunpack.c.l.s8.bf16 %v2225_v50  ;;  %v2326_v13 = vunpack.c.l.s8.bf16 %v2242_v7  ;;  %v2261_v50 = vld [vmem:[#allocation6 + $0x150] sm:$0xff] }
 0x297   :  { %v2072_v63 = vpop.f32.mrf.mxu1  ;;  %v2365_v18 = vunpack.c.l.s8.bf16 %v2261_v50 }
 0x298   :  { %v2181_v44 = vmul.f32 %v2164_v38, %v2071_v58  ;;  %v2073_v27 = vadd.f32 %v2072_v63, %v2031_v12  ;;  %v2289_v12 = vunpack.c.h.s8.bf16 %v2221_v35  ;;  %v2329_v38 = vunpack.c.h.s8.bf16 %v2241_v10  ;;  %v2238_v58 = vld [vmem:[#allocation6 + $0x98] sm:$0xff] }
 0x299   :  { %v2074_v26 = vpop.f32.mrf.mxu1 }
 0x29a   :  { %v2207_v36 = vadd.f32 %v2190_v31, %v2181_v44  ;;  %v2182_v16 = vmul.f32 %v2168_v49, %v2073_v27  ;;  %v2172_v31 = vrot.slane %v4673_v52, %v4639_v9  ;;  %v2325_v49 = vunpack.c.l.s8.bf16 %v2241_v10  ;;  %v2237_v27 = vld [vmem:[#allocation6 + $0x90] sm:$0xff] }
 0x29b   :  { %v2075_v53 = vpop.f32.mrf.mxu1  ;;  %v2322_v44 = vunpack.c.h.s8.bf16 %v2238_v58  ;;  %v2198_v26 = vrot.slane %v4678_v57, %v4639_v9  ;;  %v2321_v41 = vunpack.c.h.s8.bf16 %v2237_v27 }
 0x29c   :  { %v2208_v42 = vadd.f32 %v2194_v47, %v2182_v16  ;;  %v2211_v45 = vmax.f32 %v2207_v36, 0.0  ;;  %v2176_v36 = vrot.slane %v4673_v52, %v4643_v5  ;;  %v2265_v52 = vld [vmem:[#allocation6 + $0x170] sm:$0xff] }
 0x29e   :  { %v2212_v30 = vmax.f32 %v2208_v42, 0.0  ;;  %v4688_v62 = vpack.c.bf16 %v2211_v45, %v2211_v45  ;;  %v2202_v45 = vrot.slane %v4678_v57, %v4643_v5  ;;  %v2374_v57 = vunpack.c.l.s8.bf16 %v4663_v39 }
 0x29f   :  { %v2728_v39 = vunpack.c.h.s8.bf16 %v2648_v15 }
 0x2a0   :  { %v2216_v34 = vpack.c.bf16 %v2212_v30, %v2212_v30 }
 0x2a2   :  { %2443 = vmatprep.mubr.bf16.mxu0 %v2216_v34 }
 0x2a3   :  { %2444 = vmatmul.mubr.bf16.vlgmr.msra.gmra.mxu0 %v4688_v62 }
 0x2a4   :  { %2494 = vmatpush1.bf16.msra.mxu0 %v2313_v46  ;;  %2525 = vmatprep.mubr.bf16.mxu0 %v2216_v34  ;;  %v2318_v34 = vunpack.c.l.s8.bf16 %v2238_v58 }
 0x2a5   :  { %2495 = vmatprep.subr.bf16.mxu0 %v2310_v14 }
 0x2a8   :  { %2496 = vmatpush1.bf16.msra.mxu0 %v2309_v4  ;;  %v2317_v4 = vunpack.c.l.s8.bf16 %v2237_v27 }
 0x2a9   :  { %2497 = vmatprep.subr.bf16.mxu0 %v2306_v43 }
 0x2ac   :  { %2498 = vmatpush1.bf16.msra.mxu0 %v2305_v19  ;;  %v2377_v19 = vunpack.c.h.s8.bf16 %v2265_v52 }
 0x2ad   :  { %2499 = vmatprep.subr.bf16.mxu0 %v2302_v2 }
 0x2b0   :  { %2500 = vmatpush1.bf16.msra.mxu0 %v2301_v22  ;;  %v2373_v22 = vunpack.c.l.s8.bf16 %v2265_v52  ;;  %v2663_v52 = vld [vmem:[#allocation7 + $0xe0] sm:$0xff] }
 0x2b1   :  { %2501 = vmatprep.subr.bf16.mxu0 %v2298_v17  ;;  %v2370_v17 = vunpack.c.h.s8.bf16 %v2262_v25 }
 0x2b4   :  { %2502 = vmatpush1.bf16.msra.mxu0 %v2297_v51  ;;  %v2369_v51 = vunpack.c.h.s8.bf16 %v2261_v50 }
 0x2b5   :  { %2503 = vmatprep.subr.bf16.mxu0 %v2294_v1  ;;  %v2366_v1 = vunpack.c.l.s8.bf16 %v2262_v25 }
 0x2b8   :  { %2504 = vmatpush1.bf16.msra.mxu0 %v2293_v55  ;;  %v2647_v55 = vld [vmem:[#allocation7 + $0x60] sm:$0xff] }
 0x2b9   :  { %2505 = vmatprep.subr.bf16.mxu0 %v2290_v59  ;;  %v2258_v59 = vld [vmem:[#allocation6 + $0x138] sm:$0xff]  ;;  %v2727_v35 = vunpack.c.h.s8.bf16 %v2647_v55 }
 0x2ba   :  { %v2358_v33 = vunpack.c.l.s8.bf16 %v2258_v59 }
 0x2bc   :  { %2506 = vmatpush1.bf16.msra.mxu0 %v2289_v12  ;;  %v2724_v12 = vunpack.c.l.s8.bf16 %v2648_v15 }
 0x2bd   :  { %2507 = vmatprep.subr.bf16.mxu0 %v2286_v3  ;;  %v2644_v3 = vld [vmem:[#allocation7 + $0x48] sm:$0xff] }
 0x2be   :  { %v2720_v20 = vunpack.c.h.s8.bf16 %v2644_v3  ;;  %v2716_v40 = vunpack.c.l.s8.bf16 %v2644_v3 }
 0x2c0   :  { %2508 = vmatpush1.bf16.msra.mxu0 %v2285_v11  ;;  %v2257_v11 = vld [vmem:[#allocation6 + $0x130] sm:$0xff] }
 0x2c1   :  { %2509 = vmatprep.subr.bf16.mxu0 %v2346_v60  ;;  %v2723_v60 = vunpack.c.l.s8.bf16 %v2647_v55  ;;  %v2659_v55 = vld [vmem:[#allocation7 + $0xc0] sm:$0xff] }
 0x2c4   :  { %2510 = vmatpush2.bf16.msra.mxu0 %v2345_v8  ;;  %v2643_v8 = vld [vmem:[#allocation7 + $0x40] sm:$0xff] }
 0x2c5   :  { %2511 = vmatprep.subr.bf16.mxu0 %v2342_v24  ;;  %v2361_v24 = vunpack.c.h.s8.bf16 %v2257_v11 }
 0x2c8   :  { %2512 = vmatpush2.bf16.msra.mxu0 %v2341_v37  ;;  %v2719_v37 = vunpack.c.h.s8.bf16 %v2643_v8 }
 0x2c9   :  { %2513 = vmatprep.subr.bf16.mxu0 %v2338_v29  ;;  %v2254_v29 = vld [vmem:[#allocation6 + $0x118] sm:$0xff] }
 0x2ca   :  { %v2354_v7 = vunpack.c.h.s8.bf16 %v2254_v29  ;;  %v2350_v58 = vunpack.c.l.s8.bf16 %v2254_v29 }
 0x2cc   :  { %2514 = vmatpush2.bf16.msra.mxu0 %v2337_v21  ;;  %v2640_v21 = vld [vmem:[#allocation7 + $0x28] sm:$0xff] }
 0x2cd   :  { %2515 = vmatprep.subr.bf16.mxu0 %v2334_v32  ;;  %v2357_v32 = vunpack.c.l.s8.bf16 %v2257_v11  ;;  %v2712_v10 = vunpack.c.h.s8.bf16 %v2640_v21 }
 0x2d0   :  { %2516 = vmatpush2.bf16.msra.mxu0 %v2333_v23  ;;  %v2253_v23 = vld [vmem:[#allocation6 + $0x110] sm:$0xff] }
 0x2d1   :  { %2517 = vmatprep.subr.bf16.mxu0 %v2330_v54  ;;  %v2715_v54 = vunpack.c.l.s8.bf16 %v2643_v8  ;;  %v2349_v27 = vunpack.c.l.s8.bf16 %v2253_v23 }
 0x2d4   :  { %2518 = vmatpush2.bf16.msra.mxu0 %v2329_v38  ;;  %v2639_v38 = vld [vmem:[#allocation7 + $0x20] sm:$0xff] }
 0x2d5   :  { %v2152_v63 = vpop.f32.mrf.mxu1  ;;  %2519 = vmatprep.subr.bf16.mxu0 %v2326_v13  ;;  %v2353_v13 = vunpack.c.h.s8.bf16 %v2253_v23 }
 0x2d6   :  { %v2153_v47 = vadd.f32 %v2152_v63, %v4666_v56  ;;  %v2708_v63 = vunpack.c.l.s8.bf16 %v2640_v21 }
 0x2d7   :  { %v2154_v16 = vpop.f32.mrf.mxu1 }
 0x2d8   :  { %v2183_v53 = vmul.f32 %v2172_v31, %v2153_v47  ;;  %v2155_v42 = vadd.f32 %v2154_v16, %v4668_v61  ;;  %2520 = vmatpush2.bf16.msra.mxu0 %v2325_v49  ;;  %v2711_v31 = vunpack.c.h.s8.bf16 %v2639_v38  ;;  %v2282_v49 = vld [vmem:[#allocation6 + $0x1f8] sm:$0xff] }
 0x2d9   :  { %v2156_v30 = vpop.f32.mrf.mxu1  ;;  %2521 = vmatprep.subr.bf16.mxu0 %v2322_v44  ;;  %v2636_v44 = vld [vmem:[#allocation7 + $0x8] sm:$0xff]  ;;  %v2410_v47 = vunpack.c.h.s8.bf16 %v2282_v49 }
 0x2da   :  { %v2209_v46 = vadd.f32 %v2198_v26, %v2183_v53  ;;  %v2184_v56 = vmul.f32 %v2176_v36, %v2155_v42  ;;  %v2281_v26 = vld [vmem:[#allocation6 + $0x1f0] sm:$0xff]  ;;  %v2707_v36 = vunpack.c.l.s8.bf16 %v2639_v38  ;;  %v2704_v16 = vunpack.c.h.s8.bf16 %v2636_v44  ;;  %v2635_v53 = vld [vmem:[#allocation7] sm:$0xff]  ;;  %v2278_v30 = vld [vmem:[#allocation6 + $0x1d8] sm:$0xff] }
 0x2db   :  { %v2157_v14 = vpop.f32.mrf.mxu1  ;;  %v2409_v42 = vunpack.c.h.s8.bf16 %v2281_v26 }
 0x2dc   :  { %v2210_v48 = vadd.f32 %v2202_v45, %v2184_v56  ;;  %2522 = vmatpush2.bf16.msra.mxu0 %v2321_v41  ;;  %v2213_v43 = vmax.f32 %v2209_v46, 0.0  ;;  %v2406_v45 = vunpack.c.l.s8.bf16 %v2282_v49  ;;  %v2703_v41 = vunpack.c.h.s8.bf16 %v2635_v53  ;;  %v2664_v46 = vld [vmem:[#allocation7 + $0xe8] sm:$0xff]  ;;  %v2679_v49 = vld [vmem:[#allocation7 + $0x160] sm:$0xff] }
 0x2dd   :  { %2523 = vmatprep.subr.bf16.mxu0 %v2318_v34  ;;  %v2700_v34 = vunpack.c.l.s8.bf16 %v2636_v44  ;;  %v2405_v56 = vunpack.c.l.s8.bf16 %v2281_v26  ;;  %v2402_v14 = vunpack.c.h.s8.bf16 %v2278_v30  ;;  %v2756_v25 = vunpack.c.l.s8.bf16 %v2664_v46  ;;  %v2676_v26 = vld [vmem:[#allocation7 + $0x148] sm:$0xff] }
 0x2de   :  { %v2214_v0 = vmax.f32 %v2210_v48, 0.0  ;;  %v4702_v2 = vpack.c.bf16 %v2213_v43, %v2213_v43  ;;  %v2277_v48 = vld [vmem:[#allocation6 + $0x1d0] sm:$0xff]  ;;  %v2760_v43 = vunpack.c.h.s8.bf16 %v2664_v46 }
 0x2e0   :  { %2524 = vmatpush2.bf16.msra.mxu0 %v2317_v4  ;;  %v2218_v61 = vpack.c.bf16 %v2214_v0, %v2214_v0  ;;  %v2699_v4 = vunpack.c.l.s8.bf16 %v2635_v53  ;;  %v2401_v0 = vunpack.c.h.s8.bf16 %v2277_v48 }
 0x2e1   :  { %2827 = vmatprep.subr.bf16.mxu0 %v2728_v39 }
 0x2e2   :  { %2484 = vmatprep.mubr.bf16.mxu1 %v2218_v61 }
 0x2e3   :  { %2485 = vmatmul.mubr.bf16.vlgmr.msra.gmra.mxu1 %v4702_v2  ;;  %2526 = vmatmul.mubr.bf16.vlgmr.msra.gmra.mxu0 %v4688_v62  ;;  %v2362_v62 = vunpack.c.h.s8.bf16 %v2258_v59 }
 0x2e4   :  { %2535 = vmatpush1.bf16.msra.mxu1 %v2377_v19  ;;  %2566 = vmatprep.mubr.bf16.mxu1 %v2218_v61  ;;  %v2398_v61 = vunpack.c.l.s8.bf16 %v2278_v30  ;;  %v2759_v19 = vunpack.c.h.s8.bf16 %v2663_v52 }
 0x2e5   :  { %2536 = vmatprep.subr.bf16.mxu1 %v2374_v57  ;;  %2828 = vmatpush1.bf16.msra.mxu0 %v2727_v35  ;;  %v2274_v57 = vld [vmem:[#allocation6 + $0x1b8] sm:$0xff]  ;;  %v2751_v35 = vunpack.c.h.s8.bf16 %v2659_v55 }
 0x2e6   :  { %2829 = vmatprep.subr.bf16.mxu0 %v2724_v12  ;;  %v2394_v50 = vunpack.c.h.s8.bf16 %v2274_v57  ;;  %v2390_v39 = vunpack.c.l.s8.bf16 %v2274_v57  ;;  %v2270_v12 = vld [vmem:[#allocation6 + $0x198] sm:$0xff] }
 0x2e7   :  { %v2386_v11 = vunpack.c.h.s8.bf16 %v2270_v12 }
 0x2e8   :  { %2537 = vmatpush1.bf16.msra.mxu1 %v2373_v22  ;;  %v2660_v22 = vld [vmem:[#allocation7 + $0xc8] sm:$0xff] }
 0x2e9   :  { %2538 = vmatprep.subr.bf16.mxu1 %v2370_v17  ;;  %2830 = vmatpush1.bf16.msra.mxu0 %v2723_v60  ;;  %v2397_v17 = vunpack.c.l.s8.bf16 %v2277_v48  ;;  %v2752_v15 = vunpack.c.h.s8.bf16 %v2660_v22  ;;  %v2748_v3 = vunpack.c.l.s8.bf16 %v2660_v22  ;;  %v2269_v60 = vld [vmem:[#allocation6 + $0x190] sm:$0xff]  ;;  %v2668_v48 = vld [vmem:[#allocation7 + $0x108] sm:$0xff] }
 0x2ea   :  { %2831 = vmatprep.subr.bf16.mxu0 %v2720_v20  ;;  %v2747_v20 = vunpack.c.l.s8.bf16 %v2659_v55 }
 0x2ec   :  { %2539 = vmatpush1.bf16.msra.mxu1 %v2369_v51  ;;  %v2273_v51 = vld [vmem:[#allocation6 + $0x1b0] sm:$0xff] }
 0x2ed   :  { %2540 = vmatprep.subr.bf16.mxu1 %v2366_v1  ;;  %2832 = vmatpush1.bf16.msra.mxu0 %v2719_v37  ;;  %v2755_v1 = vunpack.c.l.s8.bf16 %v2663_v52  ;;  %v2393_v59 = vunpack.c.h.s8.bf16 %v2273_v51  ;;  %v2382_v37 = vunpack.c.l.s8.bf16 %v2270_v12 }
 0x2ee   :  { %2833 = vmatprep.subr.bf16.mxu0 %v2716_v40  ;;  %v2381_v40 = vunpack.c.l.s8.bf16 %v2269_v60 }
 0x2f0   :  { %2541 = vmatpush1.bf16.msra.mxu1 %v2365_v18  ;;  %v2656_v18 = vld [vmem:[#allocation7 + $0xa8] sm:$0xff] }
 0x2f1   :  { %2542 = vmatprep.subr.bf16.mxu1 %v2362_v62  ;;  %2834 = vmatpush1.bf16.msra.mxu0 %v2715_v54  ;;  %v2389_v62 = vunpack.c.l.s8.bf16 %v2273_v51  ;;  %v2744_v8 = vunpack.c.h.s8.bf16 %v2656_v18  ;;  %v2740_v21 = vunpack.c.l.s8.bf16 %v2656_v18  ;;  %v2651_v54 = vld [vmem:[#allocation7 + $0x80] sm:$0xff]  ;;  %v2692_v51 = vld [vmem:[#allocation7 + $0x1c8] sm:$0xff] }
 0x2f2   :  { %2835 = vmatprep.subr.bf16.mxu0 %v2712_v10  ;;  %v2735_v10 = vunpack.c.h.s8.bf16 %v2651_v54 }
 0x2f4   :  { %2543 = vmatpush1.bf16.msra.mxu1 %v2361_v24  ;;  %v2655_v24 = vld [vmem:[#allocation7 + $0xa0] sm:$0xff] }
 0x2f5   :  { %2544 = vmatprep.subr.bf16.mxu1 %v2358_v33  ;;  %2836 = vmatpush1.bf16.msra.mxu0 %v2711_v31  ;;  %v2385_v33 = vunpack.c.h.s8.bf16 %v2269_v60  ;;  %v2743_v29 = vunpack.c.h.s8.bf16 %v2655_v24 }
 0x2f6   :  { %2837 = vmatprep.subr.bf16.mxu0 %v2708_v63  ;;  %v4708_v63 = vld [vmem:[#allocation7 + $0x78] sm:$0xff] }
 0x2f7   :  { %v2730_v44 = vunpack.c.h.s8.bf16 %v4708_v63 }
 0x2f8   :  { %2545 = vmatpush1.bf16.msra.mxu1 %v2357_v32  ;;  %v2739_v32 = vunpack.c.l.s8.bf16 %v2655_v24 }
 0x2f9   :  { %2546 = vmatprep.subr.bf16.mxu1 %v2354_v7  ;;  %2838 = vmatpush1.bf16.msra.mxu0 %v2707_v36  ;;  %v2652_v7 = vld [vmem:[#allocation7 + $0x88] sm:$0xff]  ;;  %v2784_v36 = vunpack.c.h.s8.bf16 %v2676_v26 }
 0x2fa   :  { %2839 = vmatprep.subr.bf16.mxu0 %v2704_v16  ;;  %v2736_v23 = vunpack.c.h.s8.bf16 %v2652_v7  ;;  %v2732_v38 = vunpack.c.l.s8.bf16 %v2652_v7  ;;  %v2675_v16 = vld [vmem:[#allocation7 + $0x140] sm:$0xff]  ;;  %v4711_v7 = vld [vmem:[#allocation7 + $0x178] sm:$0xff] }
 0x2fb   :  { %v2783_v53 = vunpack.c.h.s8.bf16 %v2675_v16 }
 0x2fc   :  { %2547 = vmatpush1.bf16.msra.mxu1 %v2353_v13  ;;  %v2731_v13 = vunpack.c.l.s8.bf16 %v2651_v54  ;;  %v4717_v54 = vld [vmem:[%s4839_s8] sm:$0xf] }
 0x2fd   :  { %2548 = vmatprep.subr.bf16.mxu1 %v2350_v58  ;;  %2840 = vmatpush1.bf16.msra.mxu0 %v2703_v41  ;;  %v2680_v58 = vld [vmem:[#allocation7 + $0x168] sm:$0xff] }
 0x2fe   :  { %2841 = vmatprep.subr.bf16.mxu0 %v2700_v34  ;;  %v2792_v31 = vunpack.c.h.s8.bf16 %v2680_v58  ;;  %v2672_v41 = vld [vmem:[#allocation7 + $0x128] sm:$0xff]  ;;  %v2671_v34 = vld [vmem:[#allocation7 + $0x120] sm:$0xff] }
 0x2ff   :  { %v2776_v30 = vunpack.c.h.s8.bf16 %v2672_v41  ;;  %v2775_v46 = vunpack.c.h.s8.bf16 %v2671_v34 }
 0x300   :  { %2549 = vmatpush1.bf16.msra.mxu1 %v2349_v27  ;;  %v2788_v27 = vunpack.c.l.s8.bf16 %v2680_v58 }
 0x301   :  { %2550 = vmatprep.subr.bf16.mxu1 %v2410_v47  ;;  %2842 = vmatpush1.bf16.msra.mxu0 %v2699_v4  ;;  %v2787_v47 = vunpack.c.l.s8.bf16 %v2679_v49  ;;  %v2768_v4 = vunpack.c.h.s8.bf16 %v2668_v48 }
 0x302   :  { %2843 = vmatprep.subr.bf16.mxu0 %v2760_v43  ;;  %v2667_v43 = vld [vmem:[#allocation7 + $0x100] sm:$0xff] }
 0x303   :  { %v2767_v52 = vunpack.c.h.s8.bf16 %v2667_v43 }
 0x304   :  { %2551 = vmatpush2.bf16.msra.mxu1 %v2409_v42  ;;  %v2780_v42 = vunpack.c.l.s8.bf16 %v2676_v26 }
 0x305   :  { %2552 = vmatprep.subr.bf16.mxu1 %v2406_v45  ;;  %2844 = vmatpush2.bf16.msra.mxu0 %v2759_v19  ;;  %v2779_v45 = vunpack.c.l.s8.bf16 %v2675_v16  ;;  %v2696_v19 = vld [vmem:[#allocation7 + $0x1e8] sm:$0xff] }
 0x306   :  { %2845 = vmatprep.subr.bf16.mxu0 %v2756_v25  ;;  %v2824_v57 = vunpack.c.h.s8.bf16 %v2696_v19  ;;  %v2695_v25 = vld [vmem:[#allocation7 + $0x1e0] sm:$0xff] }
 0x307   :  { %v2823_v22 = vunpack.c.h.s8.bf16 %v2695_v25 }
 0x308   :  { %2553 = vmatpush2.bf16.msra.mxu1 %v2405_v56  ;;  %v2772_v56 = vunpack.c.l.s8.bf16 %v2672_v41 }
 0x309   :  { %2554 = vmatprep.subr.bf16.mxu1 %v2402_v14  ;;  %2846 = vmatpush2.bf16.msra.mxu0 %v2755_v1  ;;  %v2771_v14 = vunpack.c.l.s8.bf16 %v2671_v34  ;;  %v2816_v1 = vunpack.c.h.s8.bf16 %v2692_v51 }
 0x30a   :  { %2847 = vmatprep.subr.bf16.mxu0 %v2752_v15  ;;  %v2691_v15 = vld [vmem:[#allocation7 + $0x1c0] sm:$0xff] }
 0x30b   :  { %v2815_v55 = vunpack.c.h.s8.bf16 %v2691_v15 }
 0x30c   :  { %2555 = vmatpush2.bf16.msra.mxu1 %v2401_v0  ;;  %v2764_v0 = vunpack.c.l.s8.bf16 %v2668_v48 }
 0x30d   :  { %2556 = vmatprep.subr.bf16.mxu1 %v2398_v61  ;;  %2848 = vmatpush2.bf16.msra.mxu0 %v2751_v35  ;;  %v2763_v61 = vunpack.c.l.s8.bf16 %v2667_v43  ;;  %v2688_v35 = vld [vmem:[#allocation7 + $0x1a8] sm:$0xff] }
 0x30e   :  { %2849 = vmatprep.subr.bf16.mxu0 %v2748_v3  ;;  %v2808_v12 = vunpack.c.h.s8.bf16 %v2688_v35  ;;  %v2687_v3 = vld [vmem:[#allocation7 + $0x1a0] sm:$0xff] }
 0x30f   :  { %v2807_v18 = vunpack.c.h.s8.bf16 %v2687_v3  ;;  %v2803_v60 = vunpack.c.l.s8.bf16 %v2687_v3 }
 0x310   :  { %2557 = vmatpush2.bf16.msra.mxu1 %v2397_v17  ;;  %v2820_v17 = vunpack.c.l.s8.bf16 %v2696_v19 }
 0x311   :  { %2558 = vmatprep.subr.bf16.mxu1 %v2394_v50  ;;  %2850 = vmatpush2.bf16.msra.mxu0 %v2747_v20  ;;  %v2819_v50 = vunpack.c.l.s8.bf16 %v2695_v25 }
 0x312   :  { %2851 = vmatprep.subr.bf16.mxu0 %v2744_v8  ;;  %v2684_v8 = vld [vmem:[#allocation7 + $0x188] sm:$0xff] }
 0x313   :  { %v2800_v24 = vunpack.c.h.s8.bf16 %v2684_v8 }
 0x314   :  { %2559 = vmatpush2.bf16.msra.mxu1 %v2393_v59  ;;  %v2812_v59 = vunpack.c.l.s8.bf16 %v2692_v51 }
 0x315   :  { %2560 = vmatprep.subr.bf16.mxu1 %v2390_v39  ;;  %2852 = vmatpush2.bf16.msra.mxu0 %v2743_v29  ;;  %v2811_v39 = vunpack.c.l.s8.bf16 %v2691_v15 }
 0x316   :  { %2853 = vmatprep.subr.bf16.mxu0 %v2740_v21  ;;  %v2796_v21 = vunpack.c.l.s8.bf16 %v2684_v8 }
 0x318   :  { %2561 = vmatpush2.bf16.msra.mxu1 %v2389_v62  ;;  %v2804_v62 = vunpack.c.l.s8.bf16 %v2688_v35  ;;  %v2637_v35 = vld [vmem:[#allocation7 + $0x10] sm:$0xff] }
 0x319   :  { %2562 = vmatprep.subr.bf16.mxu1 %v2386_v11  ;;  %2854 = vmatpush2.bf16.msra.mxu0 %v2739_v32 }
 0x31a   :  { %2855 = vmatprep.subr.bf16.mxu0 %v2736_v23  ;;  %v2794_v23 = vunpack.c.h.s8.bf16 %v4711_v7 }
 0x31c   :  { %2563 = vmatpush2.bf16.msra.mxu1 %v2385_v33  ;;  %v2683_v33 = vld [vmem:[#allocation7 + $0x180] sm:$0xff] }
 0x31d   :  { %2564 = vmatprep.subr.bf16.mxu1 %v2382_v37  ;;  %2856 = vmatpush2.bf16.msra.mxu0 %v2735_v10  ;;  %v2799_v29 = vunpack.c.h.s8.bf16 %v2683_v33  ;;  %v2795_v32 = vunpack.c.l.s8.bf16 %v2683_v33  ;;  %v4722_v10 = vld [vmem:[%s4840_s9] sm:$0xf] }
 0x31e   :  { %2857 = vmatprep.subr.bf16.mxu0 %v2732_v38  ;;  %v2580_v38 = vrot.slane %v4717_v54, %v4607_v28 }
 0x320   :  { %2565 = vmatpush2.bf16.msra.mxu1 %v2381_v40 }
 0x321   :  { %2858 = vmatpush2.bf16.msra.mxu0 %v2731_v13  ;;  %2868 = vmatprep.subr.bf16.mxu1 %v2792_v31 }
 0x322   :  { %2909 = vmatprep.subr.bf16.mxu0 %v2730_v44 }
 0x323   :  { %2567 = vmatmul.mubr.bf16.vlgmr.msra.gmra.mxu1 %v4702_v2  ;;  %v2791_v2 = vunpack.c.h.s8.bf16 %v2679_v49  ;;  %v2606_v49 = vrot.slane %v4722_v10, %v4607_v28 }
 0x325   :  { %2869 = vmatpush1.bf16.msra.mxu1 %v2791_v2  ;;  %v2584_v2 = vrot.slane %v4717_v54, %v4615_v6 }
 0x326   :  { %2870 = vmatprep.subr.bf16.mxu1 %v2788_v27 }
 0x329   :  { %2871 = vmatpush1.bf16.msra.mxu1 %v2787_v47 }
 0x32a   :  { %2872 = vmatprep.subr.bf16.mxu1 %v2784_v36  ;;  %v2610_v36 = vrot.slane %v4722_v10, %v4615_v6 }
 0x32d   :  { %2873 = vmatpush1.bf16.msra.mxu1 %v2783_v53 }
 0x32e   :  { %2874 = vmatprep.subr.bf16.mxu1 %v2780_v42 }
 0x331   :  { %2875 = vmatpush1.bf16.msra.mxu1 %v2779_v45 }
 0x332   :  { %2876 = vmatprep.subr.bf16.mxu1 %v2776_v30 }
 0x335   :  { %2877 = vmatpush1.bf16.msra.mxu1 %v2775_v46 }
 0x336   :  { %2878 = vmatprep.subr.bf16.mxu1 %v2772_v56  ;;  %v2649_v56 = vld [vmem:[#allocation7 + $0x70] sm:$0xff] }
 0x339   :  { %2879 = vmatpush1.bf16.msra.mxu1 %v2771_v14 }
 0x33a   :  { %2880 = vmatprep.subr.bf16.mxu1 %v2768_v4  ;;  %v2729_v4 = vunpack.c.h.s8.bf16 %v2649_v56 }
 0x33d   :  { %2881 = vmatpush1.bf16.msra.mxu1 %v2767_v52  ;;  %v2726_v52 = vunpack.c.l.s8.bf16 %v4708_v63  ;;  %v2641_v63 = vld [vmem:[#allocation7 + $0x30] sm:$0xff] }
 0x33e   :  { %2882 = vmatprep.subr.bf16.mxu1 %v2764_v0  ;;  %v2646_v0 = vld [vmem:[#allocation7 + $0x58] sm:$0xff] }
 0x33f   :  { %v2722_v19 = vunpack.c.h.s8.bf16 %v2646_v0 }
 0x341   :  { %2883 = vmatpush1.bf16.msra.mxu1 %v2763_v61  ;;  %v2725_v61 = vunpack.c.l.s8.bf16 %v2649_v56 }
 0x342   :  { %2884 = vmatprep.subr.bf16.mxu1 %v2824_v57  ;;  %v2645_v57 = vld [vmem:[#allocation7 + $0x50] sm:$0xff] }
 0x343   :  { %v2721_v25 = vunpack.c.h.s8.bf16 %v2645_v57 }
 0x345   :  { %2885 = vmatpush2.bf16.msra.mxu1 %v2823_v22  ;;  %v2718_v22 = vunpack.c.l.s8.bf16 %v2646_v0 }
 0x346   :  { %2886 = vmatprep.subr.bf16.mxu1 %v2820_v17  ;;  %v2642_v17 = vld [vmem:[#allocation7 + $0x38] sm:$0xff] }
 0x347   :  { %v2714_v51 = vunpack.c.h.s8.bf16 %v2642_v17  ;;  %v2710_v15 = vunpack.c.l.s8.bf16 %v2642_v17  ;;  %v2678_v17 = vld [vmem:[#allocation7 + $0x158] sm:$0xff] }
 0x349   :  { %2887 = vmatpush2.bf16.msra.mxu1 %v2819_v50  ;;  %v2717_v50 = vunpack.c.l.s8.bf16 %v2645_v57 }
 0x34a   :  { %2888 = vmatprep.subr.bf16.mxu1 %v2816_v1  ;;  %v2713_v1 = vunpack.c.h.s8.bf16 %v2641_v63 }
 0x34d   :  { %2889 = vmatpush2.bf16.msra.mxu1 %v2815_v55  ;;  %v2638_v55 = vld [vmem:[#allocation7 + $0x18] sm:$0xff] }
 0x34e   :  { %2890 = vmatprep.subr.bf16.mxu1 %v2812_v59  ;;  %v2709_v59 = vunpack.c.l.s8.bf16 %v2641_v63  ;;  %v2702_v3 = vunpack.c.l.s8.bf16 %v2638_v55  ;;  %v2677_v63 = vld [vmem:[#allocation7 + $0x150] sm:$0xff] }
 0x351   :  { %2891 = vmatpush2.bf16.msra.mxu1 %v2811_v39  ;;  %v2706_v39 = vunpack.c.h.s8.bf16 %v2638_v55  ;;  %v3054_v55 = vld [vmem:[%s4844_s13 + $0x18] sm:$0xff] }
 0x352   :  { %2892 = vmatprep.subr.bf16.mxu1 %v2808_v12  ;;  %v2705_v12 = vunpack.c.h.s8.bf16 %v2637_v35 }
 0x355   :  { %2893 = vmatpush2.bf16.msra.mxu1 %v2807_v18  ;;  %v2666_v18 = vld [vmem:[#allocation7 + $0xf8] sm:$0xff] }
 0x356   :  { %2894 = vmatprep.subr.bf16.mxu1 %v2804_v62  ;;  %v2701_v62 = vunpack.c.l.s8.bf16 %v2637_v35  ;;  %v2758_v8 = vunpack.c.l.s8.bf16 %v2666_v18 }
 0x359   :  { %2895 = vmatpush2.bf16.msra.mxu1 %v2803_v60  ;;  %v2665_v60 = vld [vmem:[#allocation7 + $0xf0] sm:$0xff] }
 0x35a   :  { %2896 = vmatprep.subr.bf16.mxu1 %v2800_v24  ;;  %v2662_v24 = vld [vmem:[#allocation7 + $0xd8] sm:$0xff]  ;;  %v2757_v33 = vunpack.c.l.s8.bf16 %v2665_v60 }
 0x35d   :  { %2897 = vmatpush2.bf16.msra.mxu1 %v2799_v29  ;;  %v2661_v29 = vld [vmem:[#allocation7 + $0xd0] sm:$0xff] }
 0x35e   :  { %2898 = vmatprep.subr.bf16.mxu1 %v2796_v21  ;;  %v2750_v21 = vunpack.c.l.s8.bf16 %v2662_v24 }
 0x361   :  { %2899 = vmatpush2.bf16.msra.mxu1 %v2795_v32  ;;  %v2658_v32 = vld [vmem:[#allocation7 + $0xb8] sm:$0xff] }
 0x362   :  { %2950 = vmatprep.subr.bf16.mxu1 %v2794_v23  ;;  %v2749_v23 = vunpack.c.l.s8.bf16 %v2661_v29 }
 0x363   :  { %v2445_v11 = vpop.f32.mrf.mxu0 }
 0x365   :  { %v2447_v20 = vpop.f32.mrf.mxu0 }
 0x367   :  { %v2449_v37 = vpop.f32.mrf.mxu0 }
 0x368   :  { %v2754_v37 = vunpack.c.h.s8.bf16 %v2662_v24 }
 0x369   :  { %v2450_v40 = vpop.f32.mrf.mxu0 }
 0x36a   :  { %v2753_v40 = vunpack.c.h.s8.bf16 %v2661_v29 }
 0x3a3   :  { %v2486_v13 = vpop.f32.mrf.mxu1  ;;  %v4726_v58 = vpop.f32.mrf.mxu0 }
 0x3a4   :  { %v2487_v31 = vadd.f32 %v2486_v13, %v2445_v11  ;;  %v2762_v11 = vunpack.c.h.s8.bf16 %v2666_v18  ;;  %v2657_v13 = vld [vmem:[#allocation7 + $0xb0] sm:$0xff] }
 0x3a5   :  { %v2488_v44 = vpop.f32.mrf.mxu1  ;;  %v4732_v27 = vpop.f32.mrf.mxu0 }
 0x3a6   :  { %v2597_v47 = vmul.f32 %v2580_v38, %v2487_v31  ;;  %v2489_v26 = vadd.f32 %v2488_v44, %v2447_v20  ;;  %v2761_v20 = vunpack.c.h.s8.bf16 %v2665_v60  ;;  %v2746_v38 = vunpack.c.h.s8.bf16 %v2658_v32 }
 0x3a7   :  { %v2490_v16 = vpop.f32.mrf.mxu1  ;;  %v2531_v53 = vpop.f32.mrf.mxu0  ;;  %v2745_v31 = vunpack.c.h.s8.bf16 %v2657_v13  ;;  %v2588_v44 = vrot.slane %v4717_v54, %v4639_v9 }
 0x3a8   :  { %v2623_v42 = vadd.f32 %v2606_v49, %v2597_v47  ;;  %v2598_v45 = vmul.f32 %v2584_v2, %v2489_v26  ;;  %v2742_v49 = vunpack.c.l.s8.bf16 %v2658_v32  ;;  %v2654_v2 = vld [vmem:[#allocation7 + $0x98] sm:$0xff]  ;;  %v2741_v47 = vunpack.c.l.s8.bf16 %v2657_v13  ;;  %v2653_v16 = vld [vmem:[#allocation7 + $0x90] sm:$0xff] }
 0x3a9   :  { %v2491_v41 = vpop.f32.mrf.mxu1  ;;  %v2532_v30 = vpop.f32.mrf.mxu0  ;;  %v2737_v56 = vunpack.c.h.s8.bf16 %v2653_v16 }
 0x3aa   :  { %v2624_v34 = vadd.f32 %v2610_v36, %v2598_v45  ;;  %v2627_v46 = vmax.f32 %v2623_v42, 0.0  ;;  %v2738_v36 = vunpack.c.h.s8.bf16 %v2654_v2  ;;  %v2614_v42 = vrot.slane %v4722_v10, %v4639_v9 }
 0x3ab   :  { %v2592_v45 = vrot.slane %v4717_v54, %v4643_v5  ;;  %v2681_v54 = vld [vmem:[#allocation7 + $0x170] sm:$0xff] }
 0x3ac   :  { %v2628_v14 = vmax.f32 %v2624_v34, 0.0  ;;  %v4736_v43 = vpack.c.bf16 %v2627_v46, %v2627_v46  ;;  %v2618_v46 = vrot.slane %v4722_v10, %v4643_v5  ;;  %v2790_v10 = vunpack.c.l.s8.bf16 %v4711_v7  ;;  %v3058_v7 = vld [vmem:[%s4844_s13 + $0x38] sm:$0xff] }
 0x3ad   :  { %v3081_v35 = vunpack.c.l.s8.bf16 %v3058_v7 }
 0x3ae   :  { %v2632_v48 = vpack.c.bf16 %v2628_v14, %v2628_v14 }
 0x3b0   :  { %2859 = vmatprep.mubr.bf16.mxu0 %v2632_v48 }
 0x3b1   :  { %2860 = vmatmul.mubr.bf16.vlgmr.msra.gmra.mxu0 %v4736_v43 }
 0x3b2   :  { %2910 = vmatpush1.bf16.msra.mxu0 %v2729_v4  ;;  %2941 = vmatprep.mubr.bf16.mxu0 %v2632_v48  ;;  %v2734_v48 = vunpack.c.l.s8.bf16 %v2654_v2 }
 0x3b3   :  { %2911 = vmatprep.subr.bf16.mxu0 %v2726_v52 }
 0x3b6   :  { %2912 = vmatpush1.bf16.msra.mxu0 %v2725_v61  ;;  %v2733_v61 = vunpack.c.l.s8.bf16 %v2653_v16  ;;  %v2697_v16 = vld [vmem:[#allocation7 + $0x1f0] sm:$0xff] }
 0x3b7   :  { %2913 = vmatprep.subr.bf16.mxu0 %v2722_v19 }
 0x3ba   :  { %2914 = vmatpush1.bf16.msra.mxu0 %v2721_v25  ;;  %v2793_v25 = vunpack.c.h.s8.bf16 %v2681_v54 }
 0x3bb   :  { %2915 = vmatprep.subr.bf16.mxu0 %v2718_v22 }
 0x3be   :  { %2916 = vmatpush1.bf16.msra.mxu0 %v2717_v50  ;;  %v2789_v50 = vunpack.c.l.s8.bf16 %v2681_v54 }
 0x3bf   :  { %2917 = vmatprep.subr.bf16.mxu0 %v2714_v51  ;;  %v2786_v51 = vunpack.c.h.s8.bf16 %v2678_v17 }
 0x3c2   :  { %2918 = vmatpush1.bf16.msra.mxu0 %v2713_v1  ;;  %v2785_v1 = vunpack.c.h.s8.bf16 %v2677_v63 }
 0x3c3   :  { %2919 = vmatprep.subr.bf16.mxu0 %v2710_v15  ;;  %v2782_v15 = vunpack.c.l.s8.bf16 %v2678_v17 }
 0x3c6   :  { %2920 = vmatpush1.bf16.msra.mxu0 %v2709_v59  ;;  %v2674_v59 = vld [vmem:[#allocation7 + $0x138] sm:$0xff] }
 0x3c7   :  { %2921 = vmatprep.subr.bf16.mxu0 %v2706_v39  ;;  %v3074_v39 = vunpack.c.h.s8.bf16 %v3054_v55  ;;  %v2778_v18 = vunpack.c.h.s8.bf16 %v2674_v59  ;;  %v2774_v24 = vunpack.c.l.s8.bf16 %v2674_v59  ;;  %v3062_v59 = vld [vmem:[%s4844_s13 + $0x58] sm:$0xff] }
 0x3ca   :  { %2922 = vmatpush1.bf16.msra.mxu0 %v2705_v12  ;;  %v3057_v12 = vld [vmem:[%s4844_s13 + $0x30] sm:$0xff] }
 0x3cb   :  { %2923 = vmatprep.subr.bf16.mxu0 %v2702_v3  ;;  %v2781_v3 = vunpack.c.l.s8.bf16 %v2677_v63  ;;  %v3080_v60 = vunpack.c.h.s8.bf16 %v3057_v12  ;;  %v3079_v29 = vunpack.c.l.s8.bf16 %v3057_v12  ;;  %v3065_v12 = vld [vmem:[%s4844_s13 + $0x70] sm:$0xff] }
 0x3ce   :  { %2924 = vmatpush1.bf16.msra.mxu0 %v2701_v62  ;;  %v2673_v62 = vld [vmem:[#allocation7 + $0x130] sm:$0xff] }
 0x3cf   :  { %2925 = vmatprep.subr.bf16.mxu0 %v2762_v11  ;;  %v3073_v11 = vunpack.c.l.s8.bf16 %v3054_v55 }
 0x3d2   :  { %2926 = vmatpush2.bf16.msra.mxu0 %v2761_v20  ;;  %v3053_v20 = vld [vmem:[%s4844_s13 + $0x10] sm:$0xff] }
 0x3d3   :  { %2927 = vmatprep.subr.bf16.mxu0 %v2758_v8  ;;  %v2777_v8 = vunpack.c.h.s8.bf16 %v2673_v62 }
 0x3d6   :  { %2928 = vmatpush2.bf16.msra.mxu0 %v2757_v33  ;;  %v3072_v33 = vunpack.c.h.s8.bf16 %v3053_v20 }
 0x3d7   :  { %2929 = vmatprep.subr.bf16.mxu0 %v2754_v37  ;;  %v2670_v37 = vld [vmem:[#allocation7 + $0x118] sm:$0xff] }
 0x3d8   :  { %v2770_v32 = vunpack.c.h.s8.bf16 %v2670_v37  ;;  %v2766_v2 = vunpack.c.l.s8.bf16 %v2670_v37 }
 0x3da   :  { %2930 = vmatpush2.bf16.msra.mxu0 %v2753_v40  ;;  %v4770_v40 = vld [vmem:[%s4844_s13 + $0x28] sm:$0xff] }
 0x3db   :  { %2931 = vmatprep.subr.bf16.mxu0 %v2750_v21  ;;  %v2773_v21 = vunpack.c.l.s8.bf16 %v2673_v62  ;;  %v3078_v13 = vunpack.c.h.s8.bf16 %v4770_v40  ;;  %v3077_v17 = vunpack.c.l.s8.bf16 %v4770_v40  ;;  %v3061_v62 = vld [vmem:[%s4844_s13 + $0x50] sm:$0xff] }
 0x3de   :  { %2932 = vmatpush2.bf16.msra.mxu0 %v2749_v23  ;;  %v2669_v23 = vld [vmem:[#allocation7 + $0x110] sm:$0xff] }
 0x3df   :  { %2933 = vmatprep.subr.bf16.mxu0 %v2746_v38  ;;  %v3071_v38 = vunpack.c.l.s8.bf16 %v3053_v20  ;;  %v3064_v20 = vld [vmem:[%s4844_s13 + $0x68] sm:$0xff] }
 0x3e0   :  { %v3093_v40 = vunpack.c.l.s8.bf16 %v3064_v20 }
 0x3e2   :  { %2934 = vmatpush2.bf16.msra.mxu0 %v2745_v31  ;;  %v3052_v31 = vld [vmem:[%s4844_s13 + $0x8] sm:$0xff] }
 0x3e3   :  { %v2568_v26 = vpop.f32.mrf.mxu1  ;;  %2935 = vmatprep.subr.bf16.mxu0 %v2742_v49  ;;  %v2769_v49 = vunpack.c.h.s8.bf16 %v2669_v23 }
 0x3e4   :  { %v2569_v53 = vadd.f32 %v2568_v26, %v4726_v58  ;;  %v2765_v26 = vunpack.c.l.s8.bf16 %v2669_v23  ;;  %v3063_v23 = vld [vmem:[%s4844_s13 + $0x60] sm:$0xff] }
 0x3e5   :  { %v2570_v41 = vpop.f32.mrf.mxu1 }
 0x3e6   :  { %v2599_v30 = vmul.f32 %v2588_v44, %v2569_v53  ;;  %v2571_v34 = vadd.f32 %v2570_v41, %v4732_v27  ;;  %2936 = vmatpush2.bf16.msra.mxu0 %v2741_v47  ;;  %v3070_v44 = vunpack.c.h.s8.bf16 %v3052_v31  ;;  %v2698_v47 = vld [vmem:[#allocation7 + $0x1f8] sm:$0xff]  ;;  %v2825_v53 = vunpack.c.h.s8.bf16 %v2697_v16 }
 0x3e7   :  { %v2572_v14 = vpop.f32.mrf.mxu1  ;;  %2937 = vmatprep.subr.bf16.mxu0 %v2738_v36  ;;  %v2826_v36 = vunpack.c.h.s8.bf16 %v2698_v47  ;;  %v2821_v41 = vunpack.c.l.s8.bf16 %v2697_v16 }
 0x3e8   :  { %v2625_v4 = vadd.f32 %v2614_v42, %v2599_v30  ;;  %v2600_v58 = vmul.f32 %v2592_v45, %v2571_v34  ;;  %v2822_v42 = vunpack.c.l.s8.bf16 %v2698_v47  ;;  %v2694_v45 = vld [vmem:[#allocation7 + $0x1d8] sm:$0xff]  ;;  %v2693_v34 = vld [vmem:[#allocation7 + $0x1d0] sm:$0xff] }
 0x3e9   :  { %v2573_v52 = vpop.f32.mrf.mxu1  ;;  %v2818_v30 = vunpack.c.h.s8.bf16 %v2694_v45  ;;  %v2690_v14 = vld [vmem:[#allocation7 + $0x1b8] sm:$0xff] }
 0x3ea   :  { %v2626_v0 = vadd.f32 %v2618_v46, %v2600_v58  ;;  %2938 = vmatpush2.bf16.msra.mxu0 %v2737_v56  ;;  %v2629_v19 = vmax.f32 %v2625_v4, 0.0  ;;  %v2817_v46 = vunpack.c.h.s8.bf16 %v2693_v34  ;;  %v2814_v56 = vunpack.c.l.s8.bf16 %v2694_v45  ;;  %v2689_v58 = vld [vmem:[#allocation7 + $0x1b0] sm:$0xff] }
 0x3eb   :  { %2939 = vmatprep.subr.bf16.mxu0 %v2734_v48  ;;  %v2813_v48 = vunpack.c.l.s8.bf16 %v2693_v34  ;;  %v2810_v4 = vunpack.c.h.s8.bf16 %v2690_v14  ;;  %v2809_v52 = vunpack.c.h.s8.bf16 %v2689_v58 }
 0x3ec   :  { %v2630_v57 = vmax.f32 %v2626_v0, 0.0  ;;  %v4750_v22 = vpack.c.bf16 %v2629_v19, %v2629_v19  ;;  %v2806_v0 = vunpack.c.l.s8.bf16 %v2690_v14  ;;  %v2805_v19 = vunpack.c.l.s8.bf16 %v2689_v58 }
 0x3ee   :  { %2940 = vmatpush2.bf16.msra.mxu0 %v2733_v61  ;;  %v2634_v27 = vpack.c.bf16 %v2630_v57, %v2630_v57  ;;  %v2686_v61 = vld [vmem:[#allocation7 + $0x198] sm:$0xff]  ;;  %v2685_v57 = vld [vmem:[#allocation7 + $0x190] sm:$0xff] }
 0x3ef   :  { %v2802_v54 = vunpack.c.h.s8.bf16 %v2686_v61 }
 0x3f0   :  { %2900 = vmatprep.mubr.bf16.mxu1 %v2634_v27 }
 0x3f1   :  { %2901 = vmatmul.mubr.bf16.vlgmr.msra.gmra.mxu1 %v4750_v22  ;;  %2942 = vmatmul.mubr.bf16.vlgmr.msra.gmra.mxu0 %v4736_v43  ;;  %v3082_v43 = vunpack.c.h.s8.bf16 %v3058_v7 }
 0x3f2   :  { %2951 = vmatpush1.bf16.msra.mxu1 %v2793_v25  ;;  %2982 = vmatprep.mubr.bf16.mxu1 %v2634_v27  ;;  %v2801_v27 = vunpack.c.h.s8.bf16 %v2685_v57  ;;  %v2798_v25 = vunpack.c.l.s8.bf16 %v2686_v61 }
 0x3f3   :  { %2952 = vmatprep.subr.bf16.mxu1 %v2790_v10  ;;  %3411 = vmatprep.subr.bf16.mxu0 %v3082_v43  ;;  %v2797_v10 = vunpack.c.l.s8.bf16 %v2685_v57 }
 0x3f4   :  { %3412 = vmatpush3.bf16.msra.mxu0 %v3074_v39  ;;  %v3090_v39 = vunpack.c.h.s8.bf16 %v3062_v59 }
 0x3f5   :  { %3413 = vmatprep.subr.bf16.mxu0 %v3081_v35 }
 0x3f6   :  { %2953 = vmatpush1.bf16.msra.mxu1 %v2789_v50  ;;  %v3069_v50 = vunpack.c.l.s8.bf16 %v3052_v31  ;;  %v3059_v31 = vld [vmem:[%s4844_s13 + $0x40] sm:$0xff] }
 0x3f7   :  { %2954 = vmatprep.subr.bf16.mxu1 %v2786_v51  ;;  %v3055_v51 = vld [vmem:[%s4844_s13 + $0x20] sm:$0xff]  ;;  %v3083_v47 = vunpack.c.l.s8.bf16 %v3059_v31 }
 0x3f8   :  { %3414 = vmatpush3.bf16.msra.mxu0 %v3073_v11  ;;  %v3076_v63 = vunpack.c.h.s8.bf16 %v3055_v51  ;;  %v3075_v7 = vunpack.c.l.s8.bf16 %v3055_v51  ;;  %v3088_v11 = vunpack.c.h.s8.bf16 %v3061_v62 }
 0x3f9   :  { %3415 = vmatprep.subr.bf16.mxu0 %v3080_v60  ;;  %v3095_v60 = vunpack.c.l.s8.bf16 %v3065_v12 }
 0x3fa   :  { %2955 = vmatpush1.bf16.msra.mxu1 %v2785_v1  ;;  %v3051_v1 = vld [vmem:[%s4844_s13] sm:$0xff] }
 0x3fb   :  { %2956 = vmatprep.subr.bf16.mxu1 %v2782_v15  ;;  %v3068_v15 = vunpack.c.h.s8.bf16 %v3051_v1  ;;  %v3067_v55 = vunpack.c.l.s8.bf16 %v3051_v1 }
 0x3fc   :  { %3416 = vmatpush3.bf16.msra.mxu0 %v3072_v33  ;;  %v3060_v33 = vld [vmem:[%s4844_s13 + $0x48] sm:$0xff] }
 0x3fd   :  { %3417 = vmatprep.subr.bf16.mxu0 %v3079_v29  ;;  %v3086_v37 = vunpack.c.h.s8.bf16 %v3060_v33 }
 0x3fe   :  { %2957 = vmatpush1.bf16.msra.mxu1 %v2781_v3  ;;  %v3089_v3 = vunpack.c.l.s8.bf16 %v3062_v59 }
 0x3ff   :  { %2958 = vmatprep.subr.bf16.mxu1 %v2778_v18  ;;  %v3096_v18 = vunpack.c.h.s8.bf16 %v3065_v12 }
 0x400   :  { %3418 = vmatpush3.bf16.msra.mxu0 %v3071_v38 }
 0x401   :  { %3419 = vmatprep.subr.bf16.mxu0 %v3078_v13  ;;  %v3092_v13 = vunpack.c.h.s8.bf16 %v3063_v23 }
 0x402   :  { %2959 = vmatpush1.bf16.msra.mxu1 %v2777_v8  ;;  %v3087_v8 = vunpack.c.l.s8.bf16 %v3061_v62 }
 0x403   :  { %2960 = vmatprep.subr.bf16.mxu1 %v2774_v24  ;;  %v3094_v24 = vunpack.c.h.s8.bf16 %v3064_v20 }
 0x404   :  { %3420 = vmatpush3.bf16.msra.mxu0 %v3070_v44  ;;  %v3091_v44 = vunpack.c.l.s8.bf16 %v3063_v23 }
 0x405   :  { %3421 = vmatprep.subr.bf16.mxu0 %v3077_v17 }
 0x406   :  { %2961 = vmatpush1.bf16.msra.mxu1 %v2773_v21  ;;  %v3085_v21 = vunpack.c.l.s8.bf16 %v3060_v33 }
 0x407   :  { %2962 = vmatprep.subr.bf16.mxu1 %v2770_v32 }
 0x408   :  { %3422 = vmatpush3.bf16.msra.mxu0 %v3069_v50 }
 0x409   :  { %3423 = vmatprep.subr.bf16.mxu0 %v3076_v63 }
 0x40a   :  { %2963 = vmatpush1.bf16.msra.mxu1 %v2769_v49  ;;  %v3084_v49 = vunpack.c.h.s8.bf16 %v3059_v31 }
 0x40b   :  { %2964 = vmatprep.subr.bf16.mxu1 %v2766_v2 }
 0x40c   :  { %3424 = vmatpush3.bf16.msra.mxu0 %v3068_v15 }
 0x40d   :  { %3425 = vmatprep.subr.bf16.mxu0 %v3075_v7 }
 0x40e   :  { %2965 = vmatpush1.bf16.msra.mxu1 %v2765_v26  ;;  %v2991_v26 = vld [vmem:[%s4842_s11] sm:$0xf] }
 0x40f   :  { %2966 = vmatprep.subr.bf16.mxu1 %v2826_v36  ;;  %v3017_v36 = vld [vmem:[%s4843_s12] sm:$0xf]  ;;  %v2996_v16 = vrot.slane %v2991_v26, %v4607_v28 }
 0x410   :  { %3426 = vmatpush3.bf16.msra.mxu0 %v3067_v55  ;;  %v3030_v51 = vrot.slane %v3017_v36, %v4639_v9  ;;  %v3034_v7 = vrot.slane %v3017_v36, %v4643_v5 }
 0x412   :  { %2967 = vmatpush2.bf16.msra.mxu1 %v2825_v53 }
 0x413   :  { %2968 = vmatprep.subr.bf16.mxu1 %v2822_v42 }
 0x416   :  { %2969 = vmatpush2.bf16.msra.mxu1 %v2821_v41  ;;  %v3022_v41 = vrot.slane %v3017_v36, %v4607_v28  ;;  %v3004_v28 = vrot.slane %v2991_v26, %v4639_v9 }
 0x417   :  { %2970 = vmatprep.subr.bf16.mxu1 %v2818_v30  ;;  %v3000_v30 = vrot.slane %v2991_v26, %v4615_v6 }
 0x41a   :  { %2971 = vmatpush2.bf16.msra.mxu1 %v2817_v46 }
 0x41b   :  { %2972 = vmatprep.subr.bf16.mxu1 %v2814_v56 }
 0x41e   :  { %2973 = vmatpush2.bf16.msra.mxu1 %v2813_v48  ;;  %v3026_v48 = vrot.slane %v3017_v36, %v4615_v6  ;;  %v3008_v6 = vrot.slane %v2991_v26, %v4643_v5  ;;  %v3409_v5 = vld [vmem:[%s4845_s14] ss:$0 sm:$0xff] }
 0x41f   :  { %2974 = vmatprep.subr.bf16.mxu1 %v2810_v4 }
 0x422   :  { %2975 = vmatpush2.bf16.msra.mxu1 %v2809_v52 }
 0x423   :  { %2976 = vmatprep.subr.bf16.mxu1 %v2806_v0 }
 0x426   :  { %2977 = vmatpush2.bf16.msra.mxu1 %v2805_v19 }
 0x427   :  { %2978 = vmatprep.subr.bf16.mxu1 %v2802_v54 }
 0x42a   :  { %2979 = vmatpush2.bf16.msra.mxu1 %v2801_v27 }
 0x42b   :  { %2980 = vmatprep.subr.bf16.mxu1 %v2798_v25 }
 0x42e   :  { %2981 = vmatpush2.bf16.msra.mxu1 %v2797_v10 }
 0x431   :  { %2983 = vmatmul.mubr.bf16.vlgmr.msra.gmra.mxu1 %v4750_v22  ;;  %v3066_v22 = vld [vmem:[%s4844_s13 + $0x78] sm:$0xff] }
 0x432   :  { %v3098_v43 = vunpack.c.h.s8.bf16 %v3066_v22  ;;  %v3097_v35 = vunpack.c.l.s8.bf16 %v3066_v22 }
 0x434   :  { %3433 = vmatprep.subr.bf16.mxu1 %v3098_v43 }
 0x435   :  { %3434 = vmatpush3.bf16.msra.mxu1 %v3090_v39 }
 0x436   :  { %3435 = vmatprep.subr.bf16.mxu1 %v3097_v35 }
 0x439   :  { %3436 = vmatpush3.bf16.msra.mxu1 %v3089_v3 }
 0x43a   :  { %3437 = vmatprep.subr.bf16.mxu1 %v3096_v18 }
 0x43d   :  { %3438 = vmatpush3.bf16.msra.mxu1 %v3088_v11 }
 0x43e   :  { %3439 = vmatprep.subr.bf16.mxu1 %v3095_v60 }
 0x441   :  { %3440 = vmatpush3.bf16.msra.mxu1 %v3087_v8 }
 0x442   :  { %3441 = vmatprep.subr.bf16.mxu1 %v3094_v24 }
 0x445   :  { %3442 = vmatpush3.bf16.msra.mxu1 %v3086_v37 }
 0x446   :  { %3443 = vmatprep.subr.bf16.mxu1 %v3093_v40  ;;  %v3410_v40 = vld [vmem:[%s4846_s15] ss:$0 sm:$0xff] }
 0x449   :  { %3444 = vmatpush3.bf16.msra.mxu1 %v3085_v21 }
 0x44a   :  { %3445 = vmatprep.subr.bf16.mxu1 %v3092_v13 }
 0x44d   :  { %3446 = vmatpush3.bf16.msra.mxu1 %v3084_v49 }
 0x44e   :  { %3447 = vmatprep.subr.bf16.mxu1 %v3091_v44 }
 0x451   :  { %3448 = vmatpush3.bf16.msra.mxu1 %v3083_v47 }
 0x471   :  { %v2861_v29 = vpop.f32.mrf.mxu0 }
 0x473   :  { %v2863_v32 = vpop.f32.mrf.mxu0 }
 0x475   :  { %v2865_v38 = vpop.f32.mrf.mxu0 }
 0x477   :  { %v2866_v2 = vpop.f32.mrf.mxu0 }
 0x4b1   :  { %v2902_v53 = vpop.f32.mrf.mxu1  ;;  %v2943_v42 = vpop.f32.mrf.mxu0 }
 0x4b2   :  { %v2903_v45 = vadd.f32 %v2902_v53, %v2861_v29 }
 0x4b3   :  { %v2904_v34 = vpop.f32.mrf.mxu1  ;;  %v2945_v46 = vpop.f32.mrf.mxu0 }
 0x4b4   :  { %v3013_v56 = vmul.f32 %v2996_v16, %v2903_v45  ;;  %v2905_v14 = vadd.f32 %v2904_v34, %v2863_v32 }
 0x4b5   :  { %v2906_v4 = vpop.f32.mrf.mxu1  ;;  %v2947_v58 = vpop.f32.mrf.mxu0 }
 0x4b6   :  { %v3039_v52 = vadd.f32 %v3022_v41, %v3013_v56  ;;  %v3014_v0 = vmul.f32 %v3000_v30, %v2905_v14 }
 0x4b7   :  { %v2907_v61 = vpop.f32.mrf.mxu1  ;;  %v2948_v19 = vpop.f32.mrf.mxu0 }
 0x4b8   :  { %v3040_v54 = vadd.f32 %v3026_v48, %v3014_v0  ;;  %v3043_v57 = vmax.f32 %v3039_v52, 0.0 }
 0x4ba   :  { %v3044_v27 = vmax.f32 %v3040_v54, 0.0  ;;  %v3047_v10 = vpack.c.bf16 %v3043_v57, %v3043_v57 }
 0x4bc   :  { %v3048_v25 = vpack.c.bf16 %v3044_v27, %v3044_v27 }
 0x4be   :  { %3131 = vmatprep.mubr.bf16.mxu0 %v3048_v25 }
 0x4bf   :  { %3132 = vmatmul.mubr.bf16.vlgmr.msra.gmra.mxu0 %v3047_v10 }
 0x4f1   :  { %v2984_v17 = vpop.f32.mrf.mxu1 }
 0x4f2   :  { %v2985_v50 = vadd.f32 %v2984_v17, %v2943_v42 }
 0x4f3   :  { %v2986_v63 = vpop.f32.mrf.mxu1 }
 0x4f4   :  { %v3015_v1 = vmul.f32 %v3004_v28, %v2985_v50  ;;  %v2987_v15 = vadd.f32 %v2986_v63, %v2945_v46 }
 0x4f5   :  { %v2988_v55 = vpop.f32.mrf.mxu1 }
 0x4f6   :  { %v3041_v22 = vadd.f32 %v3030_v51, %v3015_v1  ;;  %v3016_v59 = vmul.f32 %v3008_v6, %v2987_v15 }
 0x4f7   :  { %v2989_v43 = vpop.f32.mrf.mxu1 }
 0x4f8   :  { %v3042_v39 = vadd.f32 %v3034_v7, %v3016_v59  ;;  %v3045_v35 = vmax.f32 %v3041_v22, 0.0 }
 0x4fa   :  { %v3046_v12 = vmax.f32 %v3042_v39, 0.0  ;;  %v3049_v18 = vpack.c.bf16 %v3045_v35, %v3045_v35 }
 0x4fc   :  { %v3050_v3 = vpack.c.bf16 %v3046_v12, %v3046_v12 }
 0x4fe   :  { %3171 = vmatprep.mubr.bf16.mxu1 %v3050_v3 }
 0x4ff   :  { %3172 = vmatmul.mubr.bf16.vlgmr.msra.gmra.mxu1 %v3049_v18 }
 0x57f   :  { %v3427_v62 = vpop.f32.mrf.mxu0 }
 0x581   :  { %v3428_v9 = vpop.f32.mrf.mxu0 }
 0x582   :  { %v3429_v11 = vadd.f32 %v3428_v9, %v3427_v62 }
 0x583   :  { %v3430_v60 = vpop.f32.mrf.mxu0 }
 0x585   :  { %v3431_v20 = vpop.f32.mrf.mxu0 }
 0x5bf   :  { %v3449_v8 = vpop.f32.mrf.mxu1 }
 0x5c1   :  { %v3450_v24 = vpop.f32.mrf.mxu1 }
 0x5c2   :  { %v3451_v33 = vadd.f32 %v3450_v24, %v3449_v8 }
 0x5c3   :  { %v3452_v37 = vpop.f32.mrf.mxu1 }
 0x5c4   :  { %v3174_v29 = vadd.f32 %v3451_v33, %v3429_v11 }
 0x5c5   :  { %v3453_v21 = vpop.f32.mrf.mxu1 }
 0x5c6   :  { %v3186_v32 = vmul.f32 %v3409_v5, %v3174_v29 }
 0x5c8   :  { %v3194_v23 = vadd.f32 %v3410_v40, %v3186_v32 }
 0x5ca   :  { %v3195_v38 = vpack.c.bf16 %v3194_v23, %v3194_v23 }
 0x5cc   :  { %3196 = vst [vmem:[%s4847_s16] sm:$0xf] %v3195_v38 }
 0x5cd   :  { %3201 = vsyncpa [#allocation3], 1 }
 0x5ce   :  { %3202 = vsyncpa [#allocation5], 1 }
 0x5cf   :  { %3203 = vsyncpa [#allocation8], 1 }

</bundles_post_ra>
